<compile_context>
chip_gen: v6e
topology: v6e:2x2x1
jax: 0.10.0
libtpu: 0.0.40
codegen_flags: <defaults>
</compile_context>

<pallas_src>
import math
import jax
import jax.numpy as jnp
from jax.experimental import pallas as pl
from jax.experimental.pallas import tpu as pltpu

# ----------------------- small deterministic configuration -----------------
BATCH    = 2        # self.batchSize
K_NEG    = 8        # self.K (column 0 is the positive, copied from y)
FEAT_DIM = 2048     # encoder / memory feature dim (hard-coded in the module)
N_MEM    = 256      # memory bank rows (module uses 50000; shrunk for the test)
T_TEMP   = 0.07     # self.T
MOMENTUM = 0.5      # self.momentum
Z_CONST  = 52580.0  # hard-coded normalizer in forward()
IMG      = 16       # small CIFAR-like spatial size
CIN      = 3
C1       = 64       # conv1 output channels
KPAD     = 128      # im2col contraction dim: 3*3*3=27 zero-padded to 128 (lane-dense)
NORM_EPS = 1e-12
INV_T    = 1.0 / T_TEMP
INV_Z    = 1.0 / Z_CONST


# --------------------------- fused Pallas kernel ----------------------------
def fused_kernel(idx_ref, y_ref,                    # scalar-prefetch (SMEM)
                 p_ref, wc_ref, wp_ref, mem_ref,    # inputs
                 bank_ref, out_ref,                 # outputs (bank aliased to mem)
                 gbuf, ubuf, gsem, wsem):           # scratch
    # idx_ref: (B, K) i32  SMEM, idx[:, 0] == y
    # y_ref  : (B,)   i32  SMEM
    # p_ref  : (B, HW, KPAD) bf16   im2col patches
    # wc_ref : (KPAD, C1)    bf16   conv1 weight (zero-padded rows)
    # wp_ref : (C1, FEAT)    bf16   projection weight (1/(Ho*Wo) pre-folded)
    # mem_ref: (N, FEAT) f32 HBM (memory_space=pl.ANY), aliased with bank_ref
    # bank_ref: (N, FEAT) f32 HBM output == `temp`
    # out_ref : (B, K)   f32 NCE logits
    # gbuf: (B*K, FEAT) f32 VMEM gather buffer; ubuf: (B, FEAT) f32 updated rows

    # ---- 1. kick off all B*K memory-row gathers (overlap with encoder compute)
    gathers = []
    for b in range(BATCH):
        for k in range(K_NEG):
            n = b * K_NEG + k
            cp = pltpu.make_async_copy(
                mem_ref.at[pl.ds(idx_ref[b, k], 1), :],
                gbuf.at[pl.ds(n, 1), :],
                gsem.at[n])
            cp.start()
            gathers.append(cp)

    # ---- 2. encoder: conv1 as im2col matmul (bf16 MXU) -> ReLU -> global pool
    pooled_rows = []
    for b in range(BATCH):
        h = jnp.dot(p_ref[b], wc_ref[...],
                    preferred_element_type=jnp.float32)           # (HW, C1)
        h = jnp.maximum(h, 0.0)
        pooled_rows.append(jnp.sum(h, axis=0, keepdims=True))     # (1, C1)
    pooled = jnp.concatenate(pooled_rows, axis=0)                 # (B, C1) f32
    feats = jnp.dot(pooled.astype(jnp.bfloat16), wp_ref[...],
                    preferred_element_type=jnp.float32)           # (B, FEAT) f32

    # ---- 3. L2 normalize (EUP rsqrt)
    fn = feats * jax.lax.rsqrt(
        jnp.sum(feats * feats, axis=1, keepdims=True) + NORM_EPS)

    # ---- 4. wait for gathers; NCE similarities + logits
    for cp in gathers:
        cp.wait()
    sims_rows = []
    for b in range(BATCH):
        gb = gbuf[pl.ds(b * K_NEG, K_NEG), :]                     # (K, FEAT)
        fb = fn[b:b + 1, :]                                       # (1, FEAT)
        sims_rows.append(jnp.einsum("nd,kd->nk", fb, gb,
                                    preferred_element_type=jnp.float32))
    sims = jnp.concatenate(sims_rows, axis=0)                     # (B, K)
    out_ref[...] = jnp.exp(sims * INV_T) * INV_Z

    # ---- 5. momentum update of the positive rows, renormalize
    pos = jnp.concatenate([gbuf[pl.ds(b * K_NEG, 1), :] for b in range(BATCH)],
                          axis=0)                                 # (B, FEAT) == memory[y]
    wpos = pos * MOMENTUM + fn * (1.0 - MOMENTUM)
    ubuf[...] = wpos * jax.lax.rsqrt(
        jnp.sum(wpos * wpos, axis=1, keepdims=True) + NORM_EPS)

    # ---- 6. scatter the B updated rows into the aliased bank (no full clone)
    writes = []
    for b in range(BATCH):
        cp = pltpu.make_async_copy(
            ubuf.at[pl.ds(b, 1), :],
            bank_ref.at[pl.ds(y_ref[b], 1), :],
            wsem.at[b])
        cp.start()
        writes.append(cp)
    for cp in writes:
        cp.wait()


# --------------------------- wrappers ---------------------------------------
def im2col(x_nhwc):
    """(B, H, W, Cin) -> (B, Ho*Wo, KPAD) patch matrix (3x3, stride 1, pad 0)."""
    B, H, W, Cin = x_nhwc.shape
    Ho, Wo = H - 2, W - 2
    cols = [x_nhwc[:, dh:dh + Ho, dw:dw + Wo, :]
            for dh in range(3) for dw in range(3)]                 # 9 x (B, Ho, Wo, Cin)
    p = jnp.concatenate(cols, axis=-1).reshape(B, Ho * Wo, 9 * Cin)
    return jnp.pad(p, ((0, 0), (0, 0), (0, KPAD - 9 * Cin)))


def prep_conv_weight(w_hwio):
    """HWIO (3,3,Cin,C1) -> (KPAD, C1), row order matching im2col columns."""
    w = w_hwio.reshape(9 * CIN, C1)
    return jnp.pad(w, ((0, KPAD - 9 * CIN), (0, 0)))


def resnet_cifar_forward(x_nchw, y, idx, params, memory):
    """Mirrors ResNetCifar.forward(x, y): returns (output (B, K), temp (N, D)).

    NOTE: `memory` is donated (aliased to `temp`) — the caller must replace its
    bank with the returned `temp`, which matches the usual SimCLR usage.
    """
    x = jnp.transpose(x_nchw, (0, 2, 3, 1)).astype(jnp.float32)    # NCHW -> NHWC
    B, H, W, _ = x.shape
    Ho, Wo = H - 2, W - 2
    HW = Ho * Wo

    patches = im2col(x).astype(jnp.bfloat16)                       # (B, HW, KPAD) bf16
    wc = prep_conv_weight(params["conv1_w"]).astype(jnp.bfloat16)  # (KPAD, C1) bf16
    # fold the 1/(Ho*Wo) average-pool scale into the projection weight (bf16 MXU)
    wp = (params["proj_w"] * (1.0 / HW)).astype(jnp.bfloat16)      # (C1, FEAT) bf16

    N, D = memory.shape
    grid_spec = pltpu.PrefetchScalarGridSpec(
        num_scalar_prefetch=2,                                     # idx, y -> SMEM
        grid=(1,),
        in_specs=[
            pl.BlockSpec((B, HW, KPAD), lambda i, idx, y: (0, 0, 0)),
            pl.BlockSpec((KPAD, C1), lambda i, idx, y: (0, 0)),
            pl.BlockSpec((C1, FEAT_DIM), lambda i, idx, y: (0, 0)),
            pl.BlockSpec(memory_space=pl.ANY),                     # bank stays in HBM
        ],
        out_specs=[
            pl.BlockSpec(memory_space=pl.ANY),                     # temp (aliased bank)
            pl.BlockSpec((B, K_NEG), lambda i, idx, y: (0, 0)),    # logits
        ],
        scratch_shapes=[
            pltpu.VMEM((BATCH * K_NEG, FEAT_DIM), jnp.float32),    # gather buffer
            pltpu.VMEM((BATCH, FEAT_DIM), jnp.float32),            # updated rows
            pltpu.SemaphoreType.DMA((BATCH * K_NEG,)),
            pltpu.SemaphoreType.DMA((BATCH,)),
        ],
    )
    temp, logits = pl.pallas_call(
        fused_kernel,
        out_shape=(jax.ShapeDtypeStruct((N, D), jnp.float32),
                   jax.ShapeDtypeStruct((B, K_NEG), jnp.float32)),
        grid_spec=grid_spec,
        # flattened inputs: idx=0, y=1, patches=2, wc=3, wp=4, memory=5
        input_output_aliases={5: 0},
        compiler_params=pltpu.CompilerParams(dimension_semantics=("arbitrary",)),
    )(idx, y, patches, wc, wp, memory)
    return logits, temp


# --------------------------- pure-JAX reference -----------------------------
def reference_forward(x_nchw, y, idx, params, memory):
    x = jnp.transpose(x_nchw, (0, 2, 3, 1)).astype(jnp.float32)
    B, H, W, _ = x.shape
    Ho, Wo = H - 2, W - 2
    patches = im2col(x).astype(jnp.bfloat16)
    wc = prep_conv_weight(params["conv1_w"]).astype(jnp.bfloat16)
    wp = (params["proj_w"] * (1.0 / (Ho * Wo))).astype(jnp.bfloat16)
    h = jnp.maximum(jnp.einsum("bhk,kc->bhc", patches, wc,
                               preferred_element_type=jnp.float32), 0.0)
    pooled = jnp.sum(h, axis=1)                                     # (B, C1)
    feats = jnp.dot(pooled.astype(jnp.bfloat16), wp,
                    preferred_element_type=jnp.float32)             # (B, FEAT)
    fn = feats * jax.lax.rsqrt(jnp.sum(feats * feats, axis=1, keepdims=True) + NORM_EPS)
    w = memory[idx.reshape(-1)].reshape(B, K_NEG, FEAT_DIM)
    sims = jnp.einsum("bkd,bd->bk", w, fn, precision=jax.lax.Precision.HIGHEST)
    out = jnp.exp(sims / T_TEMP) / Z_CONST
    wpos = w[:, 0, :] * MOMENTUM + fn * (1.0 - MOMENTUM)
    upd = wpos * jax.lax.rsqrt(jnp.sum(wpos * wpos, axis=1, keepdims=True) + NORM_EPS)
    temp = memory.at[y].set(upd)
    return out, temp


# --------------------------- main -------------------------------------------
if __name__ == "__main__":
    key = jax.random.PRNGKey(0)
    k_x, k_w, k_p, k_m, k_y, k_i = jax.random.split(key, 6)

    # deterministic synthetic parameters (module __init__ shapes)
    conv1_w_oihw = jax.random.normal(k_w, (C1, CIN, 3, 3), jnp.float32) * 0.1
    params = {
        "conv1_w": jnp.transpose(conv1_w_oihw, (2, 3, 1, 0)),            # HWIO
        "proj_w": jax.random.normal(k_p, (C1, FEAT_DIM), jnp.float32) * 0.05,
    }
    stdv = 1.0 / math.sqrt(FEAT_DIM / 3)
    memory = jax.random.uniform(k_m, (N_MEM, FEAT_DIM), jnp.float32) * (2 * stdv) - stdv

    # inputs
    x = jax.random.normal(k_x, (BATCH, CIN, IMG, IMG), jnp.float32)      # NCHW like PyTorch
    y = jax.random.choice(k_y, N_MEM, (BATCH,), replace=False).astype(jnp.int32)
    # AliasMethod with uniform unigrams == uniform draw; column 0 <- y
    idx = jax.random.randint(k_i, (BATCH, K_NEG), 0, N_MEM, dtype=jnp.int32)
    idx = idx.at[:, 0].set(y)

    # reference must run BEFORE the kernel: `memory` is donated to the kernel
    ref_out, ref_temp = reference_forward(x, y, idx, params, memory)
    jax.block_until_ready((ref_out, ref_temp))

    forward = jax.jit(resnet_cifar_forward, donate_argnums=(4,))
    output, temp = forward(x, y, idx, params, memory)
    jax.block_until_ready((output, temp))

    assert output.shape == (BATCH, K_NEG) and temp.shape == (N_MEM, FEAT_DIM)
    assert bool(jnp.all(jnp.isfinite(output))) and bool(jnp.all(jnp.isfinite(temp)))
    assert bool(jnp.allclose(output, ref_out, rtol=5e-2, atol=1e-8))
    assert bool(jnp.allclose(temp, ref_temp, rtol=1e-2, atol=1e-3))
    print("KERNEL_OK")
</pallas_src>

<mosaic_0001>
module attributes {stable_mosaic.version = 11 : i64} {
  func.func @fused_kernel(%arg0: i32, %arg1: memref<2x8xi32, #tpu.memory_space<smem>>, %arg2: memref<2xi32, #tpu.memory_space<smem>>, %arg3: memref<2x196x128xbf16, #tpu.memory_space<vmem>>, %arg4: memref<128x64xbf16, #tpu.memory_space<vmem>>, %arg5: memref<64x2048xbf16, #tpu.memory_space<vmem>>, %arg6: memref<256x2048xf32, #tpu.memory_space<any>>, %arg7: memref<256x2048xf32, #tpu.memory_space<any>>, %arg8: memref<2x8xf32, #tpu.memory_space<vmem>>, %arg9: memref<16x2048xf32, #tpu.memory_space<vmem>>, %arg10: memref<2x2048xf32, #tpu.memory_space<vmem>>, %arg11: memref<16x!tpu.dma_semaphore, #tpu.memory_space<semaphore_mem>>, %arg12: memref<2x!tpu.dma_semaphore, #tpu.memory_space<semaphore_mem>>) attributes {dimension_semantics = [#tpu.dimension_semantics<arbitrary>], iteration_bounds = array<i64: 1>, scalar_prefetch = 2 : i64, scratch_operands = 4 : i64, tpu.core_type = #tpu.core_type<tc>, window_params = [{pipeline_mode = #tpu.pipeline_mode<synchronous>, transform_indices = @transform_0, window_bounds = array<i64: 2, 196, 128>}, {pipeline_mode = #tpu.pipeline_mode<synchronous>, transform_indices = @transform_1, window_bounds = array<i64: 128, 64>}, {pipeline_mode = #tpu.pipeline_mode<synchronous>, transform_indices = @transform_2, window_bounds = array<i64: 64, 2048>}, {}, {}, {pipeline_mode = #tpu.pipeline_mode<synchronous>, transform_indices = @transform_5, window_bounds = array<i64: 2, 8>}]} {
    %c0 = arith.constant 0 : index
    %c0_0 = arith.constant 0 : index
    %0 = memref.load %arg1[%c0, %c0_0] : memref<2x8xi32, #tpu.memory_space<smem>>
    %c0_i32 = arith.constant 0 : i32
    %c0_i32_1 = arith.constant 0 : i32
    %1 = tpu.memref_slice %arg6[%0, %c0_i32_1] : memref<256x2048xf32, #tpu.memory_space<any>> -> memref<1x2048xf32, #tpu.memory_space<any>>
    %c0_i32_2 = arith.constant 0 : i32
    %c0_i32_3 = arith.constant 0 : i32
    %2 = tpu.memref_slice %arg9[%c0_i32_2, %c0_i32_3] : memref<16x2048xf32, #tpu.memory_space<vmem>> -> memref<1x2048xf32, #tpu.memory_space<vmem>>
    %3 = tpu.memref_slice %arg11[%c0_i32] : memref<16x!tpu.dma_semaphore, #tpu.memory_space<semaphore_mem>> -> memref<1x!tpu.dma_semaphore, #tpu.memory_space<semaphore_mem>>
    %4 = tpu.memref_squeeze %3 : memref<1x!tpu.dma_semaphore, #tpu.memory_space<semaphore_mem>> -> memref<!tpu.dma_semaphore, #tpu.memory_space<semaphore_mem>>
    tpu.enqueue_dma source(%1 : memref<1x2048xf32, #tpu.memory_space<any>>) target(%2 : memref<1x2048xf32, #tpu.memory_space<vmem>>) target_semaphore(%4 : memref<!tpu.dma_semaphore, #tpu.memory_space<semaphore_mem>>)
    %c0_4 = arith.constant 0 : index
    %c1 = arith.constant 1 : index
    %5 = memref.load %arg1[%c0_4, %c1] : memref<2x8xi32, #tpu.memory_space<smem>>
    %c1_i32 = arith.constant 1 : i32
    %c0_i32_5 = arith.constant 0 : i32
    %6 = tpu.memref_slice %arg6[%5, %c0_i32_5] : memref<256x2048xf32, #tpu.memory_space<any>> -> memref<1x2048xf32, #tpu.memory_space<any>>
    %c1_i32_6 = arith.constant 1 : i32
    %c0_i32_7 = arith.constant 0 : i32
    %7 = tpu.memref_slice %arg9[%c1_i32_6, %c0_i32_7] : memref<16x2048xf32, #tpu.memory_space<vmem>> -> memref<1x2048xf32, #tpu.memory_space<vmem>>
    %8 = tpu.memref_slice %arg11[%c1_i32] : memref<16x!tpu.dma_semaphore, #tpu.memory_space<semaphore_mem>> -> memref<1x!tpu.dma_semaphore, #tpu.memory_space<semaphore_mem>>
    %9 = tpu.memref_squeeze %8 : memref<1x!tpu.dma_semaphore, #tpu.memory_space<semaphore_mem>> -> memref<!tpu.dma_semaphore, #tpu.memory_space<semaphore_mem>>
    tpu.enqueue_dma source(%6 : memref<1x2048xf32, #tpu.memory_space<any>>) target(%7 : memref<1x2048xf32, #tpu.memory_space<vmem>>) target_semaphore(%9 : memref<!tpu.dma_semaphore, #tpu.memory_space<semaphore_mem>>)
    %c0_8 = arith.constant 0 : index
    %c2 = arith.constant 2 : index
    %10 = memref.load %arg1[%c0_8, %c2] : memref<2x8xi32, #tpu.memory_space<smem>>
    %c2_i32 = arith.constant 2 : i32
    %c0_i32_9 = arith.constant 0 : i32
    %11 = tpu.memref_slice %arg6[%10, %c0_i32_9] : memref<256x2048xf32, #tpu.memory_space<any>> -> memref<1x2048xf32, #tpu.memory_space<any>>
    %c2_i32_10 = arith.constant 2 : i32
    %c0_i32_11 = arith.constant 0 : i32
    %12 = tpu.memref_slice %arg9[%c2_i32_10, %c0_i32_11] : memref<16x2048xf32, #tpu.memory_space<vmem>> -> memref<1x2048xf32, #tpu.memory_space<vmem>>
    %13 = tpu.memref_slice %arg11[%c2_i32] : memref<16x!tpu.dma_semaphore, #tpu.memory_space<semaphore_mem>> -> memref<1x!tpu.dma_semaphore, #tpu.memory_space<semaphore_mem>>
    %14 = tpu.memref_squeeze %13 : memref<1x!tpu.dma_semaphore, #tpu.memory_space<semaphore_mem>> -> memref<!tpu.dma_semaphore, #tpu.memory_space<semaphore_mem>>
    tpu.enqueue_dma source(%11 : memref<1x2048xf32, #tpu.memory_space<any>>) target(%12 : memref<1x2048xf32, #tpu.memory_space<vmem>>) target_semaphore(%14 : memref<!tpu.dma_semaphore, #tpu.memory_space<semaphore_mem>>)
    %c0_12 = arith.constant 0 : index
    %c3 = arith.constant 3 : index
    %15 = memref.load %arg1[%c0_12, %c3] : memref<2x8xi32, #tpu.memory_space<smem>>
    %c3_i32 = arith.constant 3 : i32
    %c0_i32_13 = arith.constant 0 : i32
    %16 = tpu.memref_slice %arg6[%15, %c0_i32_13] : memref<256x2048xf32, #tpu.memory_space<any>> -> memref<1x2048xf32, #tpu.memory_space<any>>
    %c3_i32_14 = arith.constant 3 : i32
    %c0_i32_15 = arith.constant 0 : i32
    %17 = tpu.memref_slice %arg9[%c3_i32_14, %c0_i32_15] : memref<16x2048xf32, #tpu.memory_space<vmem>> -> memref<1x2048xf32, #tpu.memory_space<vmem>>
    %18 = tpu.memref_slice %arg11[%c3_i32] : memref<16x!tpu.dma_semaphore, #tpu.memory_space<semaphore_mem>> -> memref<1x!tpu.dma_semaphore, #tpu.memory_space<semaphore_mem>>
    %19 = tpu.memref_squeeze %18 : memref<1x!tpu.dma_semaphore, #tpu.memory_space<semaphore_mem>> -> memref<!tpu.dma_semaphore, #tpu.memory_space<semaphore_mem>>
    tpu.enqueue_dma source(%16 : memref<1x2048xf32, #tpu.memory_space<any>>) target(%17 : memref<1x2048xf32, #tpu.memory_space<vmem>>) target_semaphore(%19 : memref<!tpu.dma_semaphore, #tpu.memory_space<semaphore_mem>>)
    %c0_16 = arith.constant 0 : index
    %c4 = arith.constant 4 : index
    %20 = memref.load %arg1[%c0_16, %c4] : memref<2x8xi32, #tpu.memory_space<smem>>
    %c4_i32 = arith.constant 4 : i32
    %c0_i32_17 = arith.constant 0 : i32
    %21 = tpu.memref_slice %arg6[%20, %c0_i32_17] : memref<256x2048xf32, #tpu.memory_space<any>> -> memref<1x2048xf32, #tpu.memory_space<any>>
    %c4_i32_18 = arith.constant 4 : i32
    %c0_i32_19 = arith.constant 0 : i32
    %22 = tpu.memref_slice %arg9[%c4_i32_18, %c0_i32_19] : memref<16x2048xf32, #tpu.memory_space<vmem>> -> memref<1x2048xf32, #tpu.memory_space<vmem>>
    %23 = tpu.memref_slice %arg11[%c4_i32] : memref<16x!tpu.dma_semaphore, #tpu.memory_space<semaphore_mem>> -> memref<1x!tpu.dma_semaphore, #tpu.memory_space<semaphore_mem>>
    %24 = tpu.memref_squeeze %23 : memref<1x!tpu.dma_semaphore, #tpu.memory_space<semaphore_mem>> -> memref<!tpu.dma_semaphore, #tpu.memory_space<semaphore_mem>>
    tpu.enqueue_dma source(%21 : memref<1x2048xf32, #tpu.memory_space<any>>) target(%22 : memref<1x2048xf32, #tpu.memory_space<vmem>>) target_semaphore(%24 : memref<!tpu.dma_semaphore, #tpu.memory_space<semaphore_mem>>)
    %c0_20 = arith.constant 0 : index
    %c5 = arith.constant 5 : index
    %25 = memref.load %arg1[%c0_20, %c5] : memref<2x8xi32, #tpu.memory_space<smem>>
    %c5_i32 = arith.constant 5 : i32
    %c0_i32_21 = arith.constant 0 : i32
    %26 = tpu.memref_slice %arg6[%25, %c0_i32_21] : memref<256x2048xf32, #tpu.memory_space<any>> -> memref<1x2048xf32, #tpu.memory_space<any>>
    %c5_i32_22 = arith.constant 5 : i32
    %c0_i32_23 = arith.constant 0 : i32
    %27 = tpu.memref_slice %arg9[%c5_i32_22, %c0_i32_23] : memref<16x2048xf32, #tpu.memory_space<vmem>> -> memref<1x2048xf32, #tpu.memory_space<vmem>>
    %28 = tpu.memref_slice %arg11[%c5_i32] : memref<16x!tpu.dma_semaphore, #tpu.memory_space<semaphore_mem>> -> memref<1x!tpu.dma_semaphore, #tpu.memory_space<semaphore_mem>>
    %29 = tpu.memref_squeeze %28 : memref<1x!tpu.dma_semaphore, #tpu.memory_space<semaphore_mem>> -> memref<!tpu.dma_semaphore, #tpu.memory_space<semaphore_mem>>
    tpu.enqueue_dma source(%26 : memref<1x2048xf32, #tpu.memory_space<any>>) target(%27 : memref<1x2048xf32, #tpu.memory_space<vmem>>) target_semaphore(%29 : memref<!tpu.dma_semaphore, #tpu.memory_space<semaphore_mem>>)
    %c0_24 = arith.constant 0 : index
    %c6 = arith.constant 6 : index
    %30 = memref.load %arg1[%c0_24, %c6] : memref<2x8xi32, #tpu.memory_space<smem>>
    %c6_i32 = arith.constant 6 : i32
    %c0_i32_25 = arith.constant 0 : i32
    %31 = tpu.memref_slice %arg6[%30, %c0_i32_25] : memref<256x2048xf32, #tpu.memory_space<any>> -> memref<1x2048xf32, #tpu.memory_space<any>>
    %c6_i32_26 = arith.constant 6 : i32
    %c0_i32_27 = arith.constant 0 : i32
    %32 = tpu.memref_slice %arg9[%c6_i32_26, %c0_i32_27] : memref<16x2048xf32, #tpu.memory_space<vmem>> -> memref<1x2048xf32, #tpu.memory_space<vmem>>
    %33 = tpu.memref_slice %arg11[%c6_i32] : memref<16x!tpu.dma_semaphore, #tpu.memory_space<semaphore_mem>> -> memref<1x!tpu.dma_semaphore, #tpu.memory_space<semaphore_mem>>
    %34 = tpu.memref_squeeze %33 : memref<1x!tpu.dma_semaphore, #tpu.memory_space<semaphore_mem>> -> memref<!tpu.dma_semaphore, #tpu.memory_space<semaphore_mem>>
    tpu.enqueue_dma source(%31 : memref<1x2048xf32, #tpu.memory_space<any>>) target(%32 : memref<1x2048xf32, #tpu.memory_space<vmem>>) target_semaphore(%34 : memref<!tpu.dma_semaphore, #tpu.memory_space<semaphore_mem>>)
    %c0_28 = arith.constant 0 : index
    %c7 = arith.constant 7 : index
    %35 = memref.load %arg1[%c0_28, %c7] : memref<2x8xi32, #tpu.memory_space<smem>>
    %c7_i32 = arith.constant 7 : i32
    %c0_i32_29 = arith.constant 0 : i32
    %36 = tpu.memref_slice %arg6[%35, %c0_i32_29] : memref<256x2048xf32, #tpu.memory_space<any>> -> memref<1x2048xf32, #tpu.memory_space<any>>
    %c7_i32_30 = arith.constant 7 : i32
    %c0_i32_31 = arith.constant 0 : i32
    %37 = tpu.memref_slice %arg9[%c7_i32_30, %c0_i32_31] : memref<16x2048xf32, #tpu.memory_space<vmem>> -> memref<1x2048xf32, #tpu.memory_space<vmem>>
    %38 = tpu.memref_slice %arg11[%c7_i32] : memref<16x!tpu.dma_semaphore, #tpu.memory_space<semaphore_mem>> -> memref<1x!tpu.dma_semaphore, #tpu.memory_space<semaphore_mem>>
    %39 = tpu.memref_squeeze %38 : memref<1x!tpu.dma_semaphore, #tpu.memory_space<semaphore_mem>> -> memref<!tpu.dma_semaphore, #tpu.memory_space<semaphore_mem>>
    tpu.enqueue_dma source(%36 : memref<1x2048xf32, #tpu.memory_space<any>>) target(%37 : memref<1x2048xf32, #tpu.memory_space<vmem>>) target_semaphore(%39 : memref<!tpu.dma_semaphore, #tpu.memory_space<semaphore_mem>>)
    %c1_32 = arith.constant 1 : index
    %c0_33 = arith.constant 0 : index
    %40 = memref.load %arg1[%c1_32, %c0_33] : memref<2x8xi32, #tpu.memory_space<smem>>
    %c8_i32 = arith.constant 8 : i32
    %c0_i32_34 = arith.constant 0 : i32
    %41 = tpu.memref_slice %arg6[%40, %c0_i32_34] : memref<256x2048xf32, #tpu.memory_space<any>> -> memref<1x2048xf32, #tpu.memory_space<any>>
    %c8_i32_35 = arith.constant 8 : i32
    %c0_i32_36 = arith.constant 0 : i32
    %42 = tpu.memref_slice %arg9[%c8_i32_35, %c0_i32_36] : memref<16x2048xf32, #tpu.memory_space<vmem>> -> memref<1x2048xf32, #tpu.memory_space<vmem>>
    %43 = tpu.memref_slice %arg11[%c8_i32] : memref<16x!tpu.dma_semaphore, #tpu.memory_space<semaphore_mem>> -> memref<1x!tpu.dma_semaphore, #tpu.memory_space<semaphore_mem>>
    %44 = tpu.memref_squeeze %43 : memref<1x!tpu.dma_semaphore, #tpu.memory_space<semaphore_mem>> -> memref<!tpu.dma_semaphore, #tpu.memory_space<semaphore_mem>>
    tpu.enqueue_dma source(%41 : memref<1x2048xf32, #tpu.memory_space<any>>) target(%42 : memref<1x2048xf32, #tpu.memory_space<vmem>>) target_semaphore(%44 : memref<!tpu.dma_semaphore, #tpu.memory_space<semaphore_mem>>)
    %c1_37 = arith.constant 1 : index
    %c1_38 = arith.constant 1 : index
    %45 = memref.load %arg1[%c1_37, %c1_38] : memref<2x8xi32, #tpu.memory_space<smem>>
    %c9_i32 = arith.constant 9 : i32
    %c0_i32_39 = arith.constant 0 : i32
    %46 = tpu.memref_slice %arg6[%45, %c0_i32_39] : memref<256x2048xf32, #tpu.memory_space<any>> -> memref<1x2048xf32, #tpu.memory_space<any>>
    %c9_i32_40 = arith.constant 9 : i32
    %c0_i32_41 = arith.constant 0 : i32
    %47 = tpu.memref_slice %arg9[%c9_i32_40, %c0_i32_41] : memref<16x2048xf32, #tpu.memory_space<vmem>> -> memref<1x2048xf32, #tpu.memory_space<vmem>>
    %48 = tpu.memref_slice %arg11[%c9_i32] : memref<16x!tpu.dma_semaphore, #tpu.memory_space<semaphore_mem>> -> memref<1x!tpu.dma_semaphore, #tpu.memory_space<semaphore_mem>>
    %49 = tpu.memref_squeeze %48 : memref<1x!tpu.dma_semaphore, #tpu.memory_space<semaphore_mem>> -> memref<!tpu.dma_semaphore, #tpu.memory_space<semaphore_mem>>
    tpu.enqueue_dma source(%46 : memref<1x2048xf32, #tpu.memory_space<any>>) target(%47 : memref<1x2048xf32, #tpu.memory_space<vmem>>) target_semaphore(%49 : memref<!tpu.dma_semaphore, #tpu.memory_space<semaphore_mem>>)
    %c1_42 = arith.constant 1 : index
    %c2_43 = arith.constant 2 : index
    %50 = memref.load %arg1[%c1_42, %c2_43] : memref<2x8xi32, #tpu.memory_space<smem>>
    %c10_i32 = arith.constant 10 : i32
    %c0_i32_44 = arith.constant 0 : i32
    %51 = tpu.memref_slice %arg6[%50, %c0_i32_44] : memref<256x2048xf32, #tpu.memory_space<any>> -> memref<1x2048xf32, #tpu.memory_space<any>>
    %c10_i32_45 = arith.constant 10 : i32
    %c0_i32_46 = arith.constant 0 : i32
    %52 = tpu.memref_slice %arg9[%c10_i32_45, %c0_i32_46] : memref<16x2048xf32, #tpu.memory_space<vmem>> -> memref<1x2048xf32, #tpu.memory_space<vmem>>
    %53 = tpu.memref_slice %arg11[%c10_i32] : memref<16x!tpu.dma_semaphore, #tpu.memory_space<semaphore_mem>> -> memref<1x!tpu.dma_semaphore, #tpu.memory_space<semaphore_mem>>
    %54 = tpu.memref_squeeze %53 : memref<1x!tpu.dma_semaphore, #tpu.memory_space<semaphore_mem>> -> memref<!tpu.dma_semaphore, #tpu.memory_space<semaphore_mem>>
    tpu.enqueue_dma source(%51 : memref<1x2048xf32, #tpu.memory_space<any>>) target(%52 : memref<1x2048xf32, #tpu.memory_space<vmem>>) target_semaphore(%54 : memref<!tpu.dma_semaphore, #tpu.memory_space<semaphore_mem>>)
    %c1_47 = arith.constant 1 : index
    %c3_48 = arith.constant 3 : index
    %55 = memref.load %arg1[%c1_47, %c3_48] : memref<2x8xi32, #tpu.memory_space<smem>>
    %c11_i32 = arith.constant 11 : i32
    %c0_i32_49 = arith.constant 0 : i32
    %56 = tpu.memref_slice %arg6[%55, %c0_i32_49] : memref<256x2048xf32, #tpu.memory_space<any>> -> memref<1x2048xf32, #tpu.memory_space<any>>
    %c11_i32_50 = arith.constant 11 : i32
    %c0_i32_51 = arith.constant 0 : i32
    %57 = tpu.memref_slice %arg9[%c11_i32_50, %c0_i32_51] : memref<16x2048xf32, #tpu.memory_space<vmem>> -> memref<1x2048xf32, #tpu.memory_space<vmem>>
    %58 = tpu.memref_slice %arg11[%c11_i32] : memref<16x!tpu.dma_semaphore, #tpu.memory_space<semaphore_mem>> -> memref<1x!tpu.dma_semaphore, #tpu.memory_space<semaphore_mem>>
    %59 = tpu.memref_squeeze %58 : memref<1x!tpu.dma_semaphore, #tpu.memory_space<semaphore_mem>> -> memref<!tpu.dma_semaphore, #tpu.memory_space<semaphore_mem>>
    tpu.enqueue_dma source(%56 : memref<1x2048xf32, #tpu.memory_space<any>>) target(%57 : memref<1x2048xf32, #tpu.memory_space<vmem>>) target_semaphore(%59 : memref<!tpu.dma_semaphore, #tpu.memory_space<semaphore_mem>>)
    %c1_52 = arith.constant 1 : index
    %c4_53 = arith.constant 4 : index
    %60 = memref.load %arg1[%c1_52, %c4_53] : memref<2x8xi32, #tpu.memory_space<smem>>
    %c12_i32 = arith.constant 12 : i32
    %c0_i32_54 = arith.constant 0 : i32
    %61 = tpu.memref_slice %arg6[%60, %c0_i32_54] : memref<256x2048xf32, #tpu.memory_space<any>> -> memref<1x2048xf32, #tpu.memory_space<any>>
    %c12_i32_55 = arith.constant 12 : i32
    %c0_i32_56 = arith.constant 0 : i32
    %62 = tpu.memref_slice %arg9[%c12_i32_55, %c0_i32_56] : memref<16x2048xf32, #tpu.memory_space<vmem>> -> memref<1x2048xf32, #tpu.memory_space<vmem>>
    %63 = tpu.memref_slice %arg11[%c12_i32] : memref<16x!tpu.dma_semaphore, #tpu.memory_space<semaphore_mem>> -> memref<1x!tpu.dma_semaphore, #tpu.memory_space<semaphore_mem>>
    %64 = tpu.memref_squeeze %63 : memref<1x!tpu.dma_semaphore, #tpu.memory_space<semaphore_mem>> -> memref<!tpu.dma_semaphore, #tpu.memory_space<semaphore_mem>>
    tpu.enqueue_dma source(%61 : memref<1x2048xf32, #tpu.memory_space<any>>) target(%62 : memref<1x2048xf32, #tpu.memory_space<vmem>>) target_semaphore(%64 : memref<!tpu.dma_semaphore, #tpu.memory_space<semaphore_mem>>)
    %c1_57 = arith.constant 1 : index
    %c5_58 = arith.constant 5 : index
    %65 = memref.load %arg1[%c1_57, %c5_58] : memref<2x8xi32, #tpu.memory_space<smem>>
    %c13_i32 = arith.constant 13 : i32
    %c0_i32_59 = arith.constant 0 : i32
    %66 = tpu.memref_slice %arg6[%65, %c0_i32_59] : memref<256x2048xf32, #tpu.memory_space<any>> -> memref<1x2048xf32, #tpu.memory_space<any>>
    %c13_i32_60 = arith.constant 13 : i32
    %c0_i32_61 = arith.constant 0 : i32
    %67 = tpu.memref_slice %arg9[%c13_i32_60, %c0_i32_61] : memref<16x2048xf32, #tpu.memory_space<vmem>> -> memref<1x2048xf32, #tpu.memory_space<vmem>>
    %68 = tpu.memref_slice %arg11[%c13_i32] : memref<16x!tpu.dma_semaphore, #tpu.memory_space<semaphore_mem>> -> memref<1x!tpu.dma_semaphore, #tpu.memory_space<semaphore_mem>>
    %69 = tpu.memref_squeeze %68 : memref<1x!tpu.dma_semaphore, #tpu.memory_space<semaphore_mem>> -> memref<!tpu.dma_semaphore, #tpu.memory_space<semaphore_mem>>
    tpu.enqueue_dma source(%66 : memref<1x2048xf32, #tpu.memory_space<any>>) target(%67 : memref<1x2048xf32, #tpu.memory_space<vmem>>) target_semaphore(%69 : memref<!tpu.dma_semaphore, #tpu.memory_space<semaphore_mem>>)
    %c1_62 = arith.constant 1 : index
    %c6_63 = arith.constant 6 : index
    %70 = memref.load %arg1[%c1_62, %c6_63] : memref<2x8xi32, #tpu.memory_space<smem>>
    %c14_i32 = arith.constant 14 : i32
    %c0_i32_64 = arith.constant 0 : i32
    %71 = tpu.memref_slice %arg6[%70, %c0_i32_64] : memref<256x2048xf32, #tpu.memory_space<any>> -> memref<1x2048xf32, #tpu.memory_space<any>>
    %c14_i32_65 = arith.constant 14 : i32
    %c0_i32_66 = arith.constant 0 : i32
    %72 = tpu.memref_slice %arg9[%c14_i32_65, %c0_i32_66] : memref<16x2048xf32, #tpu.memory_space<vmem>> -> memref<1x2048xf32, #tpu.memory_space<vmem>>
    %73 = tpu.memref_slice %arg11[%c14_i32] : memref<16x!tpu.dma_semaphore, #tpu.memory_space<semaphore_mem>> -> memref<1x!tpu.dma_semaphore, #tpu.memory_space<semaphore_mem>>
    %74 = tpu.memref_squeeze %73 : memref<1x!tpu.dma_semaphore, #tpu.memory_space<semaphore_mem>> -> memref<!tpu.dma_semaphore, #tpu.memory_space<semaphore_mem>>
    tpu.enqueue_dma source(%71 : memref<1x2048xf32, #tpu.memory_space<any>>) target(%72 : memref<1x2048xf32, #tpu.memory_space<vmem>>) target_semaphore(%74 : memref<!tpu.dma_semaphore, #tpu.memory_space<semaphore_mem>>)
    %c1_67 = arith.constant 1 : index
    %c7_68 = arith.constant 7 : index
    %75 = memref.load %arg1[%c1_67, %c7_68] : memref<2x8xi32, #tpu.memory_space<smem>>
    %c15_i32 = arith.constant 15 : i32
    %c0_i32_69 = arith.constant 0 : i32
    %76 = tpu.memref_slice %arg6[%75, %c0_i32_69] : memref<256x2048xf32, #tpu.memory_space<any>> -> memref<1x2048xf32, #tpu.memory_space<any>>
    %c15_i32_70 = arith.constant 15 : i32
    %c0_i32_71 = arith.constant 0 : i32
    %77 = tpu.memref_slice %arg9[%c15_i32_70, %c0_i32_71] : memref<16x2048xf32, #tpu.memory_space<vmem>> -> memref<1x2048xf32, #tpu.memory_space<vmem>>
    %78 = tpu.memref_slice %arg11[%c15_i32] : memref<16x!tpu.dma_semaphore, #tpu.memory_space<semaphore_mem>> -> memref<1x!tpu.dma_semaphore, #tpu.memory_space<semaphore_mem>>
    %79 = tpu.memref_squeeze %78 : memref<1x!tpu.dma_semaphore, #tpu.memory_space<semaphore_mem>> -> memref<!tpu.dma_semaphore, #tpu.memory_space<semaphore_mem>>
    tpu.enqueue_dma source(%76 : memref<1x2048xf32, #tpu.memory_space<any>>) target(%77 : memref<1x2048xf32, #tpu.memory_space<vmem>>) target_semaphore(%79 : memref<!tpu.dma_semaphore, #tpu.memory_space<semaphore_mem>>)
    %c0_72 = arith.constant 0 : index
    %c0_73 = arith.constant 0 : index
    %c0_74 = arith.constant 0 : index
    %80 = vector.load %arg3[%c0_72, %c0_73, %c0_74] : memref<2x196x128xbf16, #tpu.memory_space<vmem>>, vector<1x196x128xbf16>
    %81 = vector.shape_cast %80 : vector<1x196x128xbf16> to vector<196x128xbf16>
    %c0_75 = arith.constant 0 : index
    %c0_76 = arith.constant 0 : index
    %82 = vector.load %arg4[%c0_75, %c0_76] : memref<128x64xbf16, #tpu.memory_space<vmem>>, vector<128x64xbf16>
    %cst = arith.constant dense<0.000000e+00> : vector<196x64xf32>
    %83 = tpu.matmul %81, %82, %cst {dimension_numbers = #tpu.dot_dimension_numbers<[1], [0], [0], [1], [0, 0, 1, 1], [], []>} : vector<196x128xbf16>, vector<128x64xbf16>, vector<196x64xf32> -> vector<196x64xf32>
    %cst_77 = arith.constant 0.000000e+00 : f32
    %84 = vector.broadcast %cst_77 : f32 to vector<196x64xf32>
    %85 = arith.maximumf %83, %84 : vector<196x64xf32>
    %cst_78 = arith.constant dense<0.000000e+00> : vector<64xf32>
    %86 = vector.multi_reduction <add>, %85, %cst_78 [0] : vector<196x64xf32> to vector<64xf32>
    %87 = vector.shape_cast %86 : vector<64xf32> to vector<1x64xf32>
    %c1_79 = arith.constant 1 : index
    %c0_80 = arith.constant 0 : index
    %c0_81 = arith.constant 0 : index
    %88 = vector.load %arg3[%c1_79, %c0_80, %c0_81] : memref<2x196x128xbf16, #tpu.memory_space<vmem>>, vector<1x196x128xbf16>
    %89 = vector.shape_cast %88 : vector<1x196x128xbf16> to vector<196x128xbf16>
    %c0_82 = arith.constant 0 : index
    %c0_83 = arith.constant 0 : index
    %90 = vector.load %arg4[%c0_82, %c0_83] : memref<128x64xbf16, #tpu.memory_space<vmem>>, vector<128x64xbf16>
    %cst_84 = arith.constant dense<0.000000e+00> : vector<196x64xf32>
    %91 = tpu.matmul %89, %90, %cst_84 {dimension_numbers = #tpu.dot_dimension_numbers<[1], [0], [0], [1], [0, 0, 1, 1], [], []>} : vector<196x128xbf16>, vector<128x64xbf16>, vector<196x64xf32> -> vector<196x64xf32>
    %cst_85 = arith.constant 0.000000e+00 : f32
    %92 = vector.broadcast %cst_85 : f32 to vector<196x64xf32>
    %93 = arith.maximumf %91, %92 : vector<196x64xf32>
    %cst_86 = arith.constant dense<0.000000e+00> : vector<64xf32>
    %94 = vector.multi_reduction <add>, %93, %cst_86 [0] : vector<196x64xf32> to vector<64xf32>
    %95 = vector.shape_cast %94 : vector<64xf32> to vector<1x64xf32>
    %96 = tpu.concatenate %87, %95 in 0 : vector<1x64xf32>, vector<1x64xf32> -> vector<2x64xf32>
    %97 = arith.truncf %96 : vector<2x64xf32> to vector<2x64xbf16>
    %c0_87 = arith.constant 0 : index
    %c0_88 = arith.constant 0 : index
    %98 = vector.load %arg5[%c0_87, %c0_88] : memref<64x2048xbf16, #tpu.memory_space<vmem>>, vector<64x2048xbf16>
    %cst_89 = arith.constant dense<0.000000e+00> : vector<2x2048xf32>
    %99 = tpu.matmul %97, %98, %cst_89 {dimension_numbers = #tpu.dot_dimension_numbers<[1], [0], [0], [1], [0, 0, 1, 1], [], []>} : vector<2x64xbf16>, vector<64x2048xbf16>, vector<2x2048xf32> -> vector<2x2048xf32>
    %100 = arith.mulf %99, %99 : vector<2x2048xf32>
    %cst_90 = arith.constant dense<0.000000e+00> : vector<2xf32>
    %101 = vector.multi_reduction <add>, %100, %cst_90 [1] : vector<2x2048xf32> to vector<2xf32>
    %102 = vector.shape_cast %101 : vector<2xf32> to vector<2x1xf32>
    %cst_91 = arith.constant 9.99999996E-13 : f32
    %103 = vector.broadcast %cst_91 : f32 to vector<2x1xf32>
    %104 = arith.addf %102, %103 : vector<2x1xf32>
    %105 = math.rsqrt %104 : vector<2x1xf32>
    %106 = vector.broadcast %105 : vector<2x1xf32> to vector<2x2048xf32>
    %107 = arith.mulf %99, %106 : vector<2x2048xf32>
    %c0_i32_92 = arith.constant 0 : i32
    %c0_i32_93 = arith.constant 0 : i32
    %108 = tpu.memref_slice %arg6[%0, %c0_i32_93] : memref<256x2048xf32, #tpu.memory_space<any>> -> memref<1x2048xf32, #tpu.memory_space<any>>
    %c0_i32_94 = arith.constant 0 : i32
    %c0_i32_95 = arith.constant 0 : i32
    %109 = tpu.memref_slice %arg9[%c0_i32_94, %c0_i32_95] : memref<16x2048xf32, #tpu.memory_space<vmem>> -> memref<1x2048xf32, #tpu.memory_space<vmem>>
    %110 = tpu.memref_slice %arg11[%c0_i32_92] : memref<16x!tpu.dma_semaphore, #tpu.memory_space<semaphore_mem>> -> memref<1x!tpu.dma_semaphore, #tpu.memory_space<semaphore_mem>>
    %111 = tpu.memref_squeeze %110 : memref<1x!tpu.dma_semaphore, #tpu.memory_space<semaphore_mem>> -> memref<!tpu.dma_semaphore, #tpu.memory_space<semaphore_mem>>
    tpu.wait_dma2 semaphore(%111 : memref<!tpu.dma_semaphore, #tpu.memory_space<semaphore_mem>>) src(%108 : memref<1x2048xf32, #tpu.memory_space<any>>) dst(%109 : memref<1x2048xf32, #tpu.memory_space<vmem>>)
    %c1_i32_96 = arith.constant 1 : i32
    %c0_i32_97 = arith.constant 0 : i32
    %112 = tpu.memref_slice %arg6[%5, %c0_i32_97] : memref<256x2048xf32, #tpu.memory_space<any>> -> memref<1x2048xf32, #tpu.memory_space<any>>
    %c1_i32_98 = arith.constant 1 : i32
    %c0_i32_99 = arith.constant 0 : i32
    %113 = tpu.memref_slice %arg9[%c1_i32_98, %c0_i32_99] : memref<16x2048xf32, #tpu.memory_space<vmem>> -> memref<1x2048xf32, #tpu.memory_space<vmem>>
    %114 = tpu.memref_slice %arg11[%c1_i32_96] : memref<16x!tpu.dma_semaphore, #tpu.memory_space<semaphore_mem>> -> memref<1x!tpu.dma_semaphore, #tpu.memory_space<semaphore_mem>>
    %115 = tpu.memref_squeeze %114 : memref<1x!tpu.dma_semaphore, #tpu.memory_space<semaphore_mem>> -> memref<!tpu.dma_semaphore, #tpu.memory_space<semaphore_mem>>
    tpu.wait_dma2 semaphore(%115 : memref<!tpu.dma_semaphore, #tpu.memory_space<semaphore_mem>>) src(%112 : memref<1x2048xf32, #tpu.memory_space<any>>) dst(%113 : memref<1x2048xf32, #tpu.memory_space<vmem>>)
    %c2_i32_100 = arith.constant 2 : i32
    %c0_i32_101 = arith.constant 0 : i32
    %116 = tpu.memref_slice %arg6[%10, %c0_i32_101] : memref<256x2048xf32, #tpu.memory_space<any>> -> memref<1x2048xf32, #tpu.memory_space<any>>
    %c2_i32_102 = arith.constant 2 : i32
    %c0_i32_103 = arith.constant 0 : i32
    %117 = tpu.memref_slice %arg9[%c2_i32_102, %c0_i32_103] : memref<16x2048xf32, #tpu.memory_space<vmem>> -> memref<1x2048xf32, #tpu.memory_space<vmem>>
    %118 = tpu.memref_slice %arg11[%c2_i32_100] : memref<16x!tpu.dma_semaphore, #tpu.memory_space<semaphore_mem>> -> memref<1x!tpu.dma_semaphore, #tpu.memory_space<semaphore_mem>>
    %119 = tpu.memref_squeeze %118 : memref<1x!tpu.dma_semaphore, #tpu.memory_space<semaphore_mem>> -> memref<!tpu.dma_semaphore, #tpu.memory_space<semaphore_mem>>
    tpu.wait_dma2 semaphore(%119 : memref<!tpu.dma_semaphore, #tpu.memory_space<semaphore_mem>>) src(%116 : memref<1x2048xf32, #tpu.memory_space<any>>) dst(%117 : memref<1x2048xf32, #tpu.memory_space<vmem>>)
    %c3_i32_104 = arith.constant 3 : i32
    %c0_i32_105 = arith.constant 0 : i32
    %120 = tpu.memref_slice %arg6[%15, %c0_i32_105] : memref<256x2048xf32, #tpu.memory_space<any>> -> memref<1x2048xf32, #tpu.memory_space<any>>
    %c3_i32_106 = arith.constant 3 : i32
    %c0_i32_107 = arith.constant 0 : i32
    %121 = tpu.memref_slice %arg9[%c3_i32_106, %c0_i32_107] : memref<16x2048xf32, #tpu.memory_space<vmem>> -> memref<1x2048xf32, #tpu.memory_space<vmem>>
    %122 = tpu.memref_slice %arg11[%c3_i32_104] : memref<16x!tpu.dma_semaphore, #tpu.memory_space<semaphore_mem>> -> memref<1x!tpu.dma_semaphore, #tpu.memory_space<semaphore_mem>>
    %123 = tpu.memref_squeeze %122 : memref<1x!tpu.dma_semaphore, #tpu.memory_space<semaphore_mem>> -> memref<!tpu.dma_semaphore, #tpu.memory_space<semaphore_mem>>
    tpu.wait_dma2 semaphore(%123 : memref<!tpu.dma_semaphore, #tpu.memory_space<semaphore_mem>>) src(%120 : memref<1x2048xf32, #tpu.memory_space<any>>) dst(%121 : memref<1x2048xf32, #tpu.memory_space<vmem>>)
    %c4_i32_108 = arith.constant 4 : i32
    %c0_i32_109 = arith.constant 0 : i32
    %124 = tpu.memref_slice %arg6[%20, %c0_i32_109] : memref<256x2048xf32, #tpu.memory_space<any>> -> memref<1x2048xf32, #tpu.memory_space<any>>
    %c4_i32_110 = arith.constant 4 : i32
    %c0_i32_111 = arith.constant 0 : i32
    %125 = tpu.memref_slice %arg9[%c4_i32_110, %c0_i32_111] : memref<16x2048xf32, #tpu.memory_space<vmem>> -> memref<1x2048xf32, #tpu.memory_space<vmem>>
    %126 = tpu.memref_slice %arg11[%c4_i32_108] : memref<16x!tpu.dma_semaphore, #tpu.memory_space<semaphore_mem>> -> memref<1x!tpu.dma_semaphore, #tpu.memory_space<semaphore_mem>>
    %127 = tpu.memref_squeeze %126 : memref<1x!tpu.dma_semaphore, #tpu.memory_space<semaphore_mem>> -> memref<!tpu.dma_semaphore, #tpu.memory_space<semaphore_mem>>
    tpu.wait_dma2 semaphore(%127 : memref<!tpu.dma_semaphore, #tpu.memory_space<semaphore_mem>>) src(%124 : memref<1x2048xf32, #tpu.memory_space<any>>) dst(%125 : memref<1x2048xf32, #tpu.memory_space<vmem>>)
    %c5_i32_112 = arith.constant 5 : i32
    %c0_i32_113 = arith.constant 0 : i32
    %128 = tpu.memref_slice %arg6[%25, %c0_i32_113] : memref<256x2048xf32, #tpu.memory_space<any>> -> memref<1x2048xf32, #tpu.memory_space<any>>
    %c5_i32_114 = arith.constant 5 : i32
    %c0_i32_115 = arith.constant 0 : i32
    %129 = tpu.memref_slice %arg9[%c5_i32_114, %c0_i32_115] : memref<16x2048xf32, #tpu.memory_space<vmem>> -> memref<1x2048xf32, #tpu.memory_space<vmem>>
    %130 = tpu.memref_slice %arg11[%c5_i32_112] : memref<16x!tpu.dma_semaphore, #tpu.memory_space<semaphore_mem>> -> memref<1x!tpu.dma_semaphore, #tpu.memory_space<semaphore_mem>>
    %131 = tpu.memref_squeeze %130 : memref<1x!tpu.dma_semaphore, #tpu.memory_space<semaphore_mem>> -> memref<!tpu.dma_semaphore, #tpu.memory_space<semaphore_mem>>
    tpu.wait_dma2 semaphore(%131 : memref<!tpu.dma_semaphore, #tpu.memory_space<semaphore_mem>>) src(%128 : memref<1x2048xf32, #tpu.memory_space<any>>) dst(%129 : memref<1x2048xf32, #tpu.memory_space<vmem>>)
    %c6_i32_116 = arith.constant 6 : i32
    %c0_i32_117 = arith.constant 0 : i32
    %132 = tpu.memref_slice %arg6[%30, %c0_i32_117] : memref<256x2048xf32, #tpu.memory_space<any>> -> memref<1x2048xf32, #tpu.memory_space<any>>
    %c6_i32_118 = arith.constant 6 : i32
    %c0_i32_119 = arith.constant 0 : i32
    %133 = tpu.memref_slice %arg9[%c6_i32_118, %c0_i32_119] : memref<16x2048xf32, #tpu.memory_space<vmem>> -> memref<1x2048xf32, #tpu.memory_space<vmem>>
    %134 = tpu.memref_slice %arg11[%c6_i32_116] : memref<16x!tpu.dma_semaphore, #tpu.memory_space<semaphore_mem>> -> memref<1x!tpu.dma_semaphore, #tpu.memory_space<semaphore_mem>>
    %135 = tpu.memref_squeeze %134 : memref<1x!tpu.dma_semaphore, #tpu.memory_space<semaphore_mem>> -> memref<!tpu.dma_semaphore, #tpu.memory_space<semaphore_mem>>
    tpu.wait_dma2 semaphore(%135 : memref<!tpu.dma_semaphore, #tpu.memory_space<semaphore_mem>>) src(%132 : memref<1x2048xf32, #tpu.memory_space<any>>) dst(%133 : memref<1x2048xf32, #tpu.memory_space<vmem>>)
    %c7_i32_120 = arith.constant 7 : i32
    %c0_i32_121 = arith.constant 0 : i32
    %136 = tpu.memref_slice %arg6[%35, %c0_i32_121] : memref<256x2048xf32, #tpu.memory_space<any>> -> memref<1x2048xf32, #tpu.memory_space<any>>
    %c7_i32_122 = arith.constant 7 : i32
    %c0_i32_123 = arith.constant 0 : i32
    %137 = tpu.memref_slice %arg9[%c7_i32_122, %c0_i32_123] : memref<16x2048xf32, #tpu.memory_space<vmem>> -> memref<1x2048xf32, #tpu.memory_space<vmem>>
    %138 = tpu.memref_slice %arg11[%c7_i32_120] : memref<16x!tpu.dma_semaphore, #tpu.memory_space<semaphore_mem>> -> memref<1x!tpu.dma_semaphore, #tpu.memory_space<semaphore_mem>>
    %139 = tpu.memref_squeeze %138 : memref<1x!tpu.dma_semaphore, #tpu.memory_space<semaphore_mem>> -> memref<!tpu.dma_semaphore, #tpu.memory_space<semaphore_mem>>
    tpu.wait_dma2 semaphore(%139 : memref<!tpu.dma_semaphore, #tpu.memory_space<semaphore_mem>>) src(%136 : memref<1x2048xf32, #tpu.memory_space<any>>) dst(%137 : memref<1x2048xf32, #tpu.memory_space<vmem>>)
    %c8_i32_124 = arith.constant 8 : i32
    %c0_i32_125 = arith.constant 0 : i32
    %140 = tpu.memref_slice %arg6[%40, %c0_i32_125] : memref<256x2048xf32, #tpu.memory_space<any>> -> memref<1x2048xf32, #tpu.memory_space<any>>
    %c8_i32_126 = arith.constant 8 : i32
    %c0_i32_127 = arith.constant 0 : i32
    %141 = tpu.memref_slice %arg9[%c8_i32_126, %c0_i32_127] : memref<16x2048xf32, #tpu.memory_space<vmem>> -> memref<1x2048xf32, #tpu.memory_space<vmem>>
    %142 = tpu.memref_slice %arg11[%c8_i32_124] : memref<16x!tpu.dma_semaphore, #tpu.memory_space<semaphore_mem>> -> memref<1x!tpu.dma_semaphore, #tpu.memory_space<semaphore_mem>>
    %143 = tpu.memref_squeeze %142 : memref<1x!tpu.dma_semaphore, #tpu.memory_space<semaphore_mem>> -> memref<!tpu.dma_semaphore, #tpu.memory_space<semaphore_mem>>
    tpu.wait_dma2 semaphore(%143 : memref<!tpu.dma_semaphore, #tpu.memory_space<semaphore_mem>>) src(%140 : memref<1x2048xf32, #tpu.memory_space<any>>) dst(%141 : memref<1x2048xf32, #tpu.memory_space<vmem>>)
    %c9_i32_128 = arith.constant 9 : i32
    %c0_i32_129 = arith.constant 0 : i32
    %144 = tpu.memref_slice %arg6[%45, %c0_i32_129] : memref<256x2048xf32, #tpu.memory_space<any>> -> memref<1x2048xf32, #tpu.memory_space<any>>
    %c9_i32_130 = arith.constant 9 : i32
    %c0_i32_131 = arith.constant 0 : i32
    %145 = tpu.memref_slice %arg9[%c9_i32_130, %c0_i32_131] : memref<16x2048xf32, #tpu.memory_space<vmem>> -> memref<1x2048xf32, #tpu.memory_space<vmem>>
    %146 = tpu.memref_slice %arg11[%c9_i32_128] : memref<16x!tpu.dma_semaphore, #tpu.memory_space<semaphore_mem>> -> memref<1x!tpu.dma_semaphore, #tpu.memory_space<semaphore_mem>>
    %147 = tpu.memref_squeeze %146 : memref<1x!tpu.dma_semaphore, #tpu.memory_space<semaphore_mem>> -> memref<!tpu.dma_semaphore, #tpu.memory_space<semaphore_mem>>
    tpu.wait_dma2 semaphore(%147 : memref<!tpu.dma_semaphore, #tpu.memory_space<semaphore_mem>>) src(%144 : memref<1x2048xf32, #tpu.memory_space<any>>) dst(%145 : memref<1x2048xf32, #tpu.memory_space<vmem>>)
    %c10_i32_132 = arith.constant 10 : i32
    %c0_i32_133 = arith.constant 0 : i32
    %148 = tpu.memref_slice %arg6[%50, %c0_i32_133] : memref<256x2048xf32, #tpu.memory_space<any>> -> memref<1x2048xf32, #tpu.memory_space<any>>
    %c10_i32_134 = arith.constant 10 : i32
    %c0_i32_135 = arith.constant 0 : i32
    %149 = tpu.memref_slice %arg9[%c10_i32_134, %c0_i32_135] : memref<16x2048xf32, #tpu.memory_space<vmem>> -> memref<1x2048xf32, #tpu.memory_space<vmem>>
    %150 = tpu.memref_slice %arg11[%c10_i32_132] : memref<16x!tpu.dma_semaphore, #tpu.memory_space<semaphore_mem>> -> memref<1x!tpu.dma_semaphore, #tpu.memory_space<semaphore_mem>>
    %151 = tpu.memref_squeeze %150 : memref<1x!tpu.dma_semaphore, #tpu.memory_space<semaphore_mem>> -> memref<!tpu.dma_semaphore, #tpu.memory_space<semaphore_mem>>
    tpu.wait_dma2 semaphore(%151 : memref<!tpu.dma_semaphore, #tpu.memory_space<semaphore_mem>>) src(%148 : memref<1x2048xf32, #tpu.memory_space<any>>) dst(%149 : memref<1x2048xf32, #tpu.memory_space<vmem>>)
    %c11_i32_136 = arith.constant 11 : i32
    %c0_i32_137 = arith.constant 0 : i32
    %152 = tpu.memref_slice %arg6[%55, %c0_i32_137] : memref<256x2048xf32, #tpu.memory_space<any>> -> memref<1x2048xf32, #tpu.memory_space<any>>
    %c11_i32_138 = arith.constant 11 : i32
    %c0_i32_139 = arith.constant 0 : i32
    %153 = tpu.memref_slice %arg9[%c11_i32_138, %c0_i32_139] : memref<16x2048xf32, #tpu.memory_space<vmem>> -> memref<1x2048xf32, #tpu.memory_space<vmem>>
    %154 = tpu.memref_slice %arg11[%c11_i32_136] : memref<16x!tpu.dma_semaphore, #tpu.memory_space<semaphore_mem>> -> memref<1x!tpu.dma_semaphore, #tpu.memory_space<semaphore_mem>>
    %155 = tpu.memref_squeeze %154 : memref<1x!tpu.dma_semaphore, #tpu.memory_space<semaphore_mem>> -> memref<!tpu.dma_semaphore, #tpu.memory_space<semaphore_mem>>
    tpu.wait_dma2 semaphore(%155 : memref<!tpu.dma_semaphore, #tpu.memory_space<semaphore_mem>>) src(%152 : memref<1x2048xf32, #tpu.memory_space<any>>) dst(%153 : memref<1x2048xf32, #tpu.memory_space<vmem>>)
    %c12_i32_140 = arith.constant 12 : i32
    %c0_i32_141 = arith.constant 0 : i32
    %156 = tpu.memref_slice %arg6[%60, %c0_i32_141] : memref<256x2048xf32, #tpu.memory_space<any>> -> memref<1x2048xf32, #tpu.memory_space<any>>
    %c12_i32_142 = arith.constant 12 : i32
    %c0_i32_143 = arith.constant 0 : i32
    %157 = tpu.memref_slice %arg9[%c12_i32_142, %c0_i32_143] : memref<16x2048xf32, #tpu.memory_space<vmem>> -> memref<1x2048xf32, #tpu.memory_space<vmem>>
    %158 = tpu.memref_slice %arg11[%c12_i32_140] : memref<16x!tpu.dma_semaphore, #tpu.memory_space<semaphore_mem>> -> memref<1x!tpu.dma_semaphore, #tpu.memory_space<semaphore_mem>>
    %159 = tpu.memref_squeeze %158 : memref<1x!tpu.dma_semaphore, #tpu.memory_space<semaphore_mem>> -> memref<!tpu.dma_semaphore, #tpu.memory_space<semaphore_mem>>
    tpu.wait_dma2 semaphore(%159 : memref<!tpu.dma_semaphore, #tpu.memory_space<semaphore_mem>>) src(%156 : memref<1x2048xf32, #tpu.memory_space<any>>) dst(%157 : memref<1x2048xf32, #tpu.memory_space<vmem>>)
    %c13_i32_144 = arith.constant 13 : i32
    %c0_i32_145 = arith.constant 0 : i32
    %160 = tpu.memref_slice %arg6[%65, %c0_i32_145] : memref<256x2048xf32, #tpu.memory_space<any>> -> memref<1x2048xf32, #tpu.memory_space<any>>
    %c13_i32_146 = arith.constant 13 : i32
    %c0_i32_147 = arith.constant 0 : i32
    %161 = tpu.memref_slice %arg9[%c13_i32_146, %c0_i32_147] : memref<16x2048xf32, #tpu.memory_space<vmem>> -> memref<1x2048xf32, #tpu.memory_space<vmem>>
    %162 = tpu.memref_slice %arg11[%c13_i32_144] : memref<16x!tpu.dma_semaphore, #tpu.memory_space<semaphore_mem>> -> memref<1x!tpu.dma_semaphore, #tpu.memory_space<semaphore_mem>>
    %163 = tpu.memref_squeeze %162 : memref<1x!tpu.dma_semaphore, #tpu.memory_space<semaphore_mem>> -> memref<!tpu.dma_semaphore, #tpu.memory_space<semaphore_mem>>
    tpu.wait_dma2 semaphore(%163 : memref<!tpu.dma_semaphore, #tpu.memory_space<semaphore_mem>>) src(%160 : memref<1x2048xf32, #tpu.memory_space<any>>) dst(%161 : memref<1x2048xf32, #tpu.memory_space<vmem>>)
    %c14_i32_148 = arith.constant 14 : i32
    %c0_i32_149 = arith.constant 0 : i32
    %164 = tpu.memref_slice %arg6[%70, %c0_i32_149] : memref<256x2048xf32, #tpu.memory_space<any>> -> memref<1x2048xf32, #tpu.memory_space<any>>
    %c14_i32_150 = arith.constant 14 : i32
    %c0_i32_151 = arith.constant 0 : i32
    %165 = tpu.memref_slice %arg9[%c14_i32_150, %c0_i32_151] : memref<16x2048xf32, #tpu.memory_space<vmem>> -> memref<1x2048xf32, #tpu.memory_space<vmem>>
    %166 = tpu.memref_slice %arg11[%c14_i32_148] : memref<16x!tpu.dma_semaphore, #tpu.memory_space<semaphore_mem>> -> memref<1x!tpu.dma_semaphore, #tpu.memory_space<semaphore_mem>>
    %167 = tpu.memref_squeeze %166 : memref<1x!tpu.dma_semaphore, #tpu.memory_space<semaphore_mem>> -> memref<!tpu.dma_semaphore, #tpu.memory_space<semaphore_mem>>
    tpu.wait_dma2 semaphore(%167 : memref<!tpu.dma_semaphore, #tpu.memory_space<semaphore_mem>>) src(%164 : memref<1x2048xf32, #tpu.memory_space<any>>) dst(%165 : memref<1x2048xf32, #tpu.memory_space<vmem>>)
    %c15_i32_152 = arith.constant 15 : i32
    %c0_i32_153 = arith.constant 0 : i32
    %168 = tpu.memref_slice %arg6[%75, %c0_i32_153] : memref<256x2048xf32, #tpu.memory_space<any>> -> memref<1x2048xf32, #tpu.memory_space<any>>
    %c15_i32_154 = arith.constant 15 : i32
    %c0_i32_155 = arith.constant 0 : i32
    %169 = tpu.memref_slice %arg9[%c15_i32_154, %c0_i32_155] : memref<16x2048xf32, #tpu.memory_space<vmem>> -> memref<1x2048xf32, #tpu.memory_space<vmem>>
    %170 = tpu.memref_slice %arg11[%c15_i32_152] : memref<16x!tpu.dma_semaphore, #tpu.memory_space<semaphore_mem>> -> memref<1x!tpu.dma_semaphore, #tpu.memory_space<semaphore_mem>>
    %171 = tpu.memref_squeeze %170 : memref<1x!tpu.dma_semaphore, #tpu.memory_space<semaphore_mem>> -> memref<!tpu.dma_semaphore, #tpu.memory_space<semaphore_mem>>
    tpu.wait_dma2 semaphore(%171 : memref<!tpu.dma_semaphore, #tpu.memory_space<semaphore_mem>>) src(%168 : memref<1x2048xf32, #tpu.memory_space<any>>) dst(%169 : memref<1x2048xf32, #tpu.memory_space<vmem>>)
    %c0_156 = arith.constant 0 : index
    %c0_157 = arith.constant 0 : index
    %172 = vector.load %arg9[%c0_156, %c0_157] : memref<16x2048xf32, #tpu.memory_space<vmem>>, vector<8x2048xf32>
    %173 = vector.extract_strided_slice %107 {offsets = [0, 0], sizes = [1, 2048], strides = [1, 1]} : vector<2x2048xf32> to vector<1x2048xf32>
    "tpu.trace_start"() <{level = 10 : i32, message = "nd,kd->nk"}> : () -> ()
    %cst_158 = arith.constant dense<0.000000e+00> : vector<1x8xf32>
    %174 = tpu.matmul %173, %172, %cst_158 {dimension_numbers = #tpu.dot_dimension_numbers<[1], [1], [0], [0], [0, 0, 1, 0], [], []>} : vector<1x2048xf32>, vector<8x2048xf32>, vector<1x8xf32> -> vector<1x8xf32>
    "tpu.trace_stop"() : () -> ()
    %c8 = arith.constant 8 : index
    %c0_159 = arith.constant 0 : index
    %175 = vector.load %arg9[%c8, %c0_159] : memref<16x2048xf32, #tpu.memory_space<vmem>>, vector<8x2048xf32>
    %176 = vector.extract_strided_slice %107 {offsets = [1, 0], sizes = [1, 2048], strides = [1, 1]} : vector<2x2048xf32> to vector<1x2048xf32>
    "tpu.trace_start"() <{level = 10 : i32, message = "nd,kd->nk"}> : () -> ()
    %cst_160 = arith.constant dense<0.000000e+00> : vector<1x8xf32>
    %177 = tpu.matmul %176, %175, %cst_160 {dimension_numbers = #tpu.dot_dimension_numbers<[1], [1], [0], [0], [0, 0, 1, 0], [], []>} : vector<1x2048xf32>, vector<8x2048xf32>, vector<1x8xf32> -> vector<1x8xf32>
    "tpu.trace_stop"() : () -> ()
    %178 = tpu.concatenate %174, %177 in 0 : vector<1x8xf32>, vector<1x8xf32> -> vector<2x8xf32>
    %cst_161 = arith.constant 14.2857141 : f32
    %179 = vector.broadcast %cst_161 : f32 to vector<2x8xf32>
    %180 = arith.mulf %178, %179 : vector<2x8xf32>
    %181 = math.exp %180 : vector<2x8xf32>
    %cst_162 = arith.constant 1.90186383E-5 : f32
    %182 = vector.broadcast %cst_162 : f32 to vector<2x8xf32>
    %183 = arith.mulf %181, %182 : vector<2x8xf32>
    %c0_163 = arith.constant 0 : index
    %c0_164 = arith.constant 0 : index
    %184 = vector.load %arg8[%c0_163, %c0_164] : memref<2x8xf32, #tpu.memory_space<vmem>>, vector<2x8xf32>
    tpu.vector_store %arg8[%c0_163, %c0_164], %183 {strides = array<i32>} : memref<2x8xf32, #tpu.memory_space<vmem>>, vector<2x8xf32>,
    %c0_165 = arith.constant 0 : index
    %c0_166 = arith.constant 0 : index
    %185 = vector.load %arg9[%c0_165, %c0_166] : memref<16x2048xf32, #tpu.memory_space<vmem>>, vector<1x2048xf32>
    %c8_167 = arith.constant 8 : index
    %c0_168 = arith.constant 0 : index
    %186 = vector.load %arg9[%c8_167, %c0_168] : memref<16x2048xf32, #tpu.memory_space<vmem>>, vector<1x2048xf32>
    %187 = tpu.concatenate %185, %186 in 0 : vector<1x2048xf32>, vector<1x2048xf32> -> vector<2x2048xf32>
    %cst_169 = arith.constant 5.000000e-01 : f32
    %188 = vector.broadcast %cst_169 : f32 to vector<2x2048xf32>
    %189 = arith.mulf %187, %188 : vector<2x2048xf32>
    %cst_170 = arith.constant 5.000000e-01 : f32
    %190 = vector.broadcast %cst_170 : f32 to vector<2x2048xf32>
    %191 = arith.mulf %107, %190 : vector<2x2048xf32>
    %192 = arith.addf %189, %191 : vector<2x2048xf32>
    %193 = arith.mulf %192, %192 : vector<2x2048xf32>
    %cst_171 = arith.constant dense<0.000000e+00> : vector<2xf32>
    %194 = vector.multi_reduction <add>, %193, %cst_171 [1] : vector<2x2048xf32> to vector<2xf32>
    %195 = vector.shape_cast %194 : vector<2xf32> to vector<2x1xf32>
    %cst_172 = arith.constant 9.99999996E-13 : f32
    %196 = vector.broadcast %cst_172 : f32 to vector<2x1xf32>
    %197 = arith.addf %195, %196 : vector<2x1xf32>
    %198 = math.rsqrt %197 : vector<2x1xf32>
    %199 = vector.broadcast %198 : vector<2x1xf32> to vector<2x2048xf32>
    %200 = arith.mulf %192, %199 : vector<2x2048xf32>
    %c0_173 = arith.constant 0 : index
    %c0_174 = arith.constant 0 : index
    %201 = vector.load %arg10[%c0_173, %c0_174] : memref<2x2048xf32, #tpu.memory_space<vmem>>, vector<2x2048xf32>
    tpu.vector_store %arg10[%c0_173, %c0_174], %200 {strides = array<i32>} : memref<2x2048xf32, #tpu.memory_space<vmem>>, vector<2x2048xf32>,
    %c0_175 = arith.constant 0 : index
    %202 = memref.load %arg2[%c0_175] : memref<2xi32, #tpu.memory_space<smem>>
    %c0_i32_176 = arith.constant 0 : i32
    %c0_i32_177 = arith.constant 0 : i32
    %c0_i32_178 = arith.constant 0 : i32
    %203 = tpu.memref_slice %arg10[%c0_i32_177, %c0_i32_178] : memref<2x2048xf32, #tpu.memory_space<vmem>> -> memref<1x2048xf32, #tpu.memory_space<vmem>>
    %c0_i32_179 = arith.constant 0 : i32
    %204 = tpu.memref_slice %arg7[%202, %c0_i32_179] : memref<256x2048xf32, #tpu.memory_space<any>> -> memref<1x2048xf32, #tpu.memory_space<any>>
    %205 = tpu.memref_slice %arg12[%c0_i32_176] : memref<2x!tpu.dma_semaphore, #tpu.memory_space<semaphore_mem>> -> memref<1x!tpu.dma_semaphore, #tpu.memory_space<semaphore_mem>>
    %206 = tpu.memref_squeeze %205 : memref<1x!tpu.dma_semaphore, #tpu.memory_space<semaphore_mem>> -> memref<!tpu.dma_semaphore, #tpu.memory_space<semaphore_mem>>
    tpu.enqueue_dma source(%203 : memref<1x2048xf32, #tpu.memory_space<vmem>>) target(%204 : memref<1x2048xf32, #tpu.memory_space<any>>) target_semaphore(%206 : memref<!tpu.dma_semaphore, #tpu.memory_space<semaphore_mem>>)
    %c1_180 = arith.constant 1 : index
    %207 = memref.load %arg2[%c1_180] : memref<2xi32, #tpu.memory_space<smem>>
    %c1_i32_181 = arith.constant 1 : i32
    %c1_i32_182 = arith.constant 1 : i32
    %c0_i32_183 = arith.constant 0 : i32
    %208 = tpu.memref_slice %arg10[%c1_i32_182, %c0_i32_183] : memref<2x2048xf32, #tpu.memory_space<vmem>> -> memref<1x2048xf32, #tpu.memory_space<vmem>>
    %c0_i32_184 = arith.constant 0 : i32
    %209 = tpu.memref_slice %arg7[%207, %c0_i32_184] : memref<256x2048xf32, #tpu.memory_space<any>> -> memref<1x2048xf32, #tpu.memory_space<any>>
    %210 = tpu.memref_slice %arg12[%c1_i32_181] : memref<2x!tpu.dma_semaphore, #tpu.memory_space<semaphore_mem>> -> memref<1x!tpu.dma_semaphore, #tpu.memory_space<semaphore_mem>>
    %211 = tpu.memref_squeeze %210 : memref<1x!tpu.dma_semaphore, #tpu.memory_space<semaphore_mem>> -> memref<!tpu.dma_semaphore, #tpu.memory_space<semaphore_mem>>
    tpu.enqueue_dma source(%208 : memref<1x2048xf32, #tpu.memory_space<vmem>>) target(%209 : memref<1x2048xf32, #tpu.memory_space<any>>) target_semaphore(%211 : memref<!tpu.dma_semaphore, #tpu.memory_space<semaphore_mem>>)
    %c0_i32_185 = arith.constant 0 : i32
    %c0_i32_186 = arith.constant 0 : i32
    %c0_i32_187 = arith.constant 0 : i32
    %212 = tpu.memref_slice %arg10[%c0_i32_186, %c0_i32_187] : memref<2x2048xf32, #tpu.memory_space<vmem>> -> memref<1x2048xf32, #tpu.memory_space<vmem>>
    %c0_i32_188 = arith.constant 0 : i32
    %213 = tpu.memref_slice %arg7[%202, %c0_i32_188] : memref<256x2048xf32, #tpu.memory_space<any>> -> memref<1x2048xf32, #tpu.memory_space<any>>
    %214 = tpu.memref_slice %arg12[%c0_i32_185] : memref<2x!tpu.dma_semaphore, #tpu.memory_space<semaphore_mem>> -> memref<1x!tpu.dma_semaphore, #tpu.memory_space<semaphore_mem>>
    %215 = tpu.memref_squeeze %214 : memref<1x!tpu.dma_semaphore, #tpu.memory_space<semaphore_mem>> -> memref<!tpu.dma_semaphore, #tpu.memory_space<semaphore_mem>>
    tpu.wait_dma2 semaphore(%215 : memref<!tpu.dma_semaphore, #tpu.memory_space<semaphore_mem>>) src(%212 : memref<1x2048xf32, #tpu.memory_space<vmem>>) dst(%213 : memref<1x2048xf32, #tpu.memory_space<any>>)
    %c1_i32_189 = arith.constant 1 : i32
    %c1_i32_190 = arith.constant 1 : i32
    %c0_i32_191 = arith.constant 0 : i32
    %216 = tpu.memref_slice %arg10[%c1_i32_190, %c0_i32_191] : memref<2x2048xf32, #tpu.memory_space<vmem>> -> memref<1x2048xf32, #tpu.memory_space<vmem>>
    %c0_i32_192 = arith.constant 0 : i32
    %217 = tpu.memref_slice %arg7[%207, %c0_i32_192] : memref<256x2048xf32, #tpu.memory_space<any>> -> memref<1x2048xf32, #tpu.memory_space<any>>
    %218 = tpu.memref_slice %arg12[%c1_i32_189] : memref<2x!tpu.dma_semaphore, #tpu.memory_space<semaphore_mem>> -> memref<1x!tpu.dma_semaphore, #tpu.memory_space<semaphore_mem>>
    %219 = tpu.memref_squeeze %218 : memref<1x!tpu.dma_semaphore, #tpu.memory_space<semaphore_mem>> -> memref<!tpu.dma_semaphore, #tpu.memory_space<semaphore_mem>>
    tpu.wait_dma2 semaphore(%219 : memref<!tpu.dma_semaphore, #tpu.memory_space<semaphore_mem>>) src(%216 : memref<1x2048xf32, #tpu.memory_space<vmem>>) dst(%217 : memref<1x2048xf32, #tpu.memory_space<any>>)
    return
  }
  func.func @transform_0(%arg0: i32, %arg1: memref<2x8xi32, #tpu.memory_space<smem>>, %arg2: memref<2xi32, #tpu.memory_space<smem>>) -> (i32, i32, i32) {
    %c0_i32 = arith.constant 0 : i32
    %c0_i32_0 = arith.constant 0 : i32
    %c0_i32_1 = arith.constant 0 : i32
    %c0_i32_2 = arith.constant 0 : i32
    return %c0_i32, %c0_i32_0, %c0_i32_1 : i32, i32, i32
  }
  func.func @transform_1(%arg0: i32, %arg1: memref<2x8xi32, #tpu.memory_space<smem>>, %arg2: memref<2xi32, #tpu.memory_space<smem>>) -> (i32, i32) {
    %c0_i32 = arith.constant 0 : i32
    %c0_i32_0 = arith.constant 0 : i32
    %c0_i32_1 = arith.constant 0 : i32
    return %c0_i32, %c0_i32_0 : i32, i32
  }
  func.func @transform_2(%arg0: i32, %arg1: memref<2x8xi32, #tpu.memory_space<smem>>, %arg2: memref<2xi32, #tpu.memory_space<smem>>) -> (i32, i32) {
    %c0_i32 = arith.constant 0 : i32
    %c0_i32_0 = arith.constant 0 : i32
    %c0_i32_1 = arith.constant 0 : i32
    return %c0_i32, %c0_i32_0 : i32, i32
  }
  func.func @transform_5(%arg0: i32, %arg1: memref<2x8xi32, #tpu.memory_space<smem>>, %arg2: memref<2xi32, #tpu.memory_space<smem>>) -> (i32, i32) {
    %c0_i32 = arith.constant 0 : i32
    %c0_i32_0 = arith.constant 0 : i32
    %c0_i32_1 = arith.constant 0 : i32
    return %c0_i32, %c0_i32_0 : i32, i32
  }
}

</mosaic_0001>

<bundles_post_ra>
// kernel: resnet_cifar_forward.1
= control target key start
LH: loop header
LB: loop body
LE: loop exit
PB: predicated region body
PF: predicated region fallthrough
CT: control target
= control target key end

     0   :  { %s7639_s0 = inlined_call_operand.vmem [shape: s32[2,8], index: 0, kind: input, shape index: {}]   ;;  %s7640_s2 = inlined_call_operand.vmem [shape: bf16[2,196,128], index: 2, kind: input, shape index: {}]   ;;  %s7641_s3 = inlined_call_operand.vmem [shape: bf16[128,64], index: 3, kind: input, shape index: {}]   ;;  %s7642_s4 = inlined_call_operand.vmem [shape: bf16[64,2048], index: 4, kind: input, shape index: {}]   ;;  %s7643_s5 = inlined_call_operand.vmem [shape: f32[256,2048], index: 5, kind: input, shape index: {}, may-alias: {5,6}]   ;;  %s7644_s6 = inlined_call_operand.vmem [shape: f32[256,2048], index: 6, kind: output, shape index: {0}, may-alias: {5,6}]   ;;  %s7645_s7 = inlined_call_operand.hbm [shape: f32[2,8], index: 7, kind: output, shape index: {1}]   ;;  %s7646_s1 = inlined_call_operand.vmem [shape: s32[2], index: 1, kind: input, shape index: {}]  }
   0x1   :  { %s13_s26 = sshll.u32 %s7639_s0, 4  ;;  %s17_s29 = sshll.u32 %s7646_s1, 4  ;;  %s14_s26 = int_to_ptr.vmem [resolvable:$true] %s13_s26  ;;  %s18_s29 = int_to_ptr.vmem [resolvable:$true] %s17_s29 }
   0x2   :  { %s6227_s30 = scalar_lea.vmem %s14_s26, 32  ;;  %p6232_p1 = scmp.lt.s32.totalorder %s14_s26, %s14_s26 }
   0x3   :  { %p6228_p0 = scmp.ne.s32.totalorder %s14_s26, %s6227_s30  ;;  %p6233_p2 = scmp.lt.s32.totalorder %s6227_s30, %s6227_s30 }
   0x5   :  { %p6234_p3 = por %p6233_p2, %p6232_p1 }
   0x7   :  { %p6235_p4 = pnand %p6234_p3, %p6228_p0 }
   0x9   :  { %6238 = shalt.err (!%p6235_p4)  }
   0xa   :  { %s6311_s8 = smov [#allocation7]   ;;  %s6239_s9 = scalar_lea.vmem %s18_s29, 16 }
   0xb   :  { %16 = dma.vmem_to_smem %s14_s26, 32, %s6311_s8, [#allocation6] }
   0xc   :  { %p6240_p5 = scmp.ne.s32.totalorder %s18_s29, %s6239_s9  ;;  %p6244_p6 = scmp.lt.s32.totalorder %s18_s29, %s18_s29 }
   0xd   :  { %p6245_p7 = scmp.lt.s32.totalorder %s6239_s9, %s6239_s9 }
   0xf   :  { %p6246_p8 = por %p6245_p7, %p6244_p6 }
  0x11   :  { %p6247_p9 = pnand %p6246_p8, %p6240_p5 }
  0x13   :  { %6250 = shalt.err (!%p6247_p9)  }
  0x14   :  { %s6312_s0 = smov [#allocation8]  }
  0x15   :  { %20 = dma.vmem_to_smem %s18_s29, 16, %s6312_s0, [#allocation6] }
  0x16   :  { %6271 = dma.done.wait [#allocation6], 48 }
  0x17   :  { %6272 = vsyncadd [#allocation6], 4294967248 }
  0x18   :  { %22 = sfence }
  0x19   :  { %23 = vsyncpa [#allocation10], 0  ;;  %s31_s1 = sld [smem:[#allocation7]] }
  0x1f   :  { %s32_s10 = sshrl.u32 %s31_s1, 3  ;;  %s33_s11 = sand.u32 7, %s31_s1  }
  0x20   :  { %s5819_s12 = sshll.u32 %s32_s10, 7 }
  0x21   :  { %s35_s13 = sadd.s32 %s5819_s12, %s33_s11 }
  0x22   :  { %s6367_s16 = scalar_lea.vmem %s7643_s5, %s35_s13 }
  0x23   :  { %v55_v0 = vld [vmem:[%s6367_s16] sm:$0x1]  ;;  %v57_v1 = vld [vmem:[%s6367_s16 + $0x8] sm:$0x1]  ;;  %v59_v2 = vld [vmem:[%s6367_s16 + $0x10] sm:$0x1] }
  0x24   :  { %56 = vst [vmem:[#allocation2] sm:$0x1] %v55_v0  ;;  %58 = vst [vmem:[#allocation2 + $0x8] sm:$0x1] %v57_v1  ;;  %v61_v3 = vld [vmem:[%s6367_s16 + $0x18] sm:$0x1] }
  0x25   :  { %60 = vst [vmem:[#allocation2 + $0x10] sm:$0x1] %v59_v2  ;;  %v63_v4 = vld [vmem:[%s6367_s16 + $0x20] sm:$0x1]  ;;  %v65_v5 = vld [vmem:[%s6367_s16 + $0x28] sm:$0x1] }
  0x26   :  { %62 = vst [vmem:[#allocation2 + $0x18] sm:$0x1] %v61_v3  ;;  %64 = vst [vmem:[#allocation2 + $0x20] sm:$0x1] %v63_v4  ;;  %v67_v6 = vld [vmem:[%s6367_s16 + $0x30] sm:$0x1] }
  0x27   :  { %66 = vst [vmem:[#allocation2 + $0x28] sm:$0x1] %v65_v5  ;;  %v69_v7 = vld [vmem:[%s6367_s16 + $0x38] sm:$0x1]  ;;  %v71_v8 = vld [vmem:[%s6367_s16 + $0x40] sm:$0x1] }
  0x28   :  { %68 = vst [vmem:[#allocation2 + $0x30] sm:$0x1] %v67_v6  ;;  %70 = vst [vmem:[#allocation2 + $0x38] sm:$0x1] %v69_v7  ;;  %v73_v9 = vld [vmem:[%s6367_s16 + $0x48] sm:$0x1] }
  0x29   :  { %72 = vst [vmem:[#allocation2 + $0x40] sm:$0x1] %v71_v8  ;;  %v75_v10 = vld [vmem:[%s6367_s16 + $0x50] sm:$0x1]  ;;  %v77_v11 = vld [vmem:[%s6367_s16 + $0x58] sm:$0x1] }
  0x2a   :  { %74 = vst [vmem:[#allocation2 + $0x48] sm:$0x1] %v73_v9  ;;  %76 = vst [vmem:[#allocation2 + $0x50] sm:$0x1] %v75_v10  ;;  %v79_v12 = vld [vmem:[%s6367_s16 + $0x60] sm:$0x1] }
  0x2b   :  { %78 = vst [vmem:[#allocation2 + $0x58] sm:$0x1] %v77_v11  ;;  %v81_v13 = vld [vmem:[%s6367_s16 + $0x68] sm:$0x1]  ;;  %v83_v14 = vld [vmem:[%s6367_s16 + $0x70] sm:$0x1] }
  0x2c   :  { %80 = vst [vmem:[#allocation2 + $0x60] sm:$0x1] %v79_v12  ;;  %82 = vst [vmem:[#allocation2 + $0x68] sm:$0x1] %v81_v13  ;;  %v85_v15 = vld [vmem:[%s6367_s16 + $0x78] sm:$0x1] }
  0x2d   :  { %84 = vst [vmem:[#allocation2 + $0x70] sm:$0x1] %v83_v14  ;;  %86 = vst [vmem:[#allocation2 + $0x78] sm:$0x1] %v85_v15 }
  0x2e   :  { %150 = vsyncadd [#allocation4], 256  ;;  %s5820_s17 = sld [smem:[#allocation7 + $0x1]] }
  0x34   :  { %s152_s18 = sshrl.u32 %s5820_s17, 3  ;;  %s153_s19 = sand.u32 7, %s5820_s17  }
  0x35   :  { %s5821_s20 = sshll.u32 %s152_s18, 7 }
  0x36   :  { %s155_s21 = sadd.s32 %s5821_s20, %s153_s19 }
  0x37   :  { %s6388_s24 = scalar_lea.vmem %s7643_s5, %s155_s21 }
  0x38   :  { %v177_v16 = vld [vmem:[%s6388_s24] sm:$0x1]  ;;  %v179_v17 = vld [vmem:[%s6388_s24 + $0x8] sm:$0x1]  ;;  %v181_v18 = vld [vmem:[%s6388_s24 + $0x10] sm:$0x1] }
  0x39   :  { %178 = vst [vmem:[#allocation2 + $0x1] sm:$0x1] %v177_v16  ;;  %180 = vst [vmem:[#allocation2 + $0x9] sm:$0x1] %v179_v17  ;;  %v183_v19 = vld [vmem:[%s6388_s24 + $0x18] sm:$0x1] }
  0x3a   :  { %182 = vst [vmem:[#allocation2 + $0x11] sm:$0x1] %v181_v18  ;;  %v185_v20 = vld [vmem:[%s6388_s24 + $0x20] sm:$0x1]  ;;  %v187_v21 = vld [vmem:[%s6388_s24 + $0x28] sm:$0x1] }
  0x3b   :  { %184 = vst [vmem:[#allocation2 + $0x19] sm:$0x1] %v183_v19  ;;  %186 = vst [vmem:[#allocation2 + $0x21] sm:$0x1] %v185_v20  ;;  %v189_v22 = vld [vmem:[%s6388_s24 + $0x30] sm:$0x1] }
  0x3c   :  { %188 = vst [vmem:[#allocation2 + $0x29] sm:$0x1] %v187_v21  ;;  %v191_v23 = vld [vmem:[%s6388_s24 + $0x38] sm:$0x1]  ;;  %v193_v24 = vld [vmem:[%s6388_s24 + $0x40] sm:$0x1] }
  0x3d   :  { %190 = vst [vmem:[#allocation2 + $0x31] sm:$0x1] %v189_v22  ;;  %192 = vst [vmem:[#allocation2 + $0x39] sm:$0x1] %v191_v23  ;;  %v195_v25 = vld [vmem:[%s6388_s24 + $0x48] sm:$0x1] }
  0x3e   :  { %194 = vst [vmem:[#allocation2 + $0x41] sm:$0x1] %v193_v24  ;;  %v197_v26 = vld [vmem:[%s6388_s24 + $0x50] sm:$0x1]  ;;  %v199_v27 = vld [vmem:[%s6388_s24 + $0x58] sm:$0x1] }
  0x3f   :  { %196 = vst [vmem:[#allocation2 + $0x49] sm:$0x1] %v195_v25  ;;  %198 = vst [vmem:[#allocation2 + $0x51] sm:$0x1] %v197_v26  ;;  %v201_v28 = vld [vmem:[%s6388_s24 + $0x60] sm:$0x1] }
  0x40   :  { %200 = vst [vmem:[#allocation2 + $0x59] sm:$0x1] %v199_v27  ;;  %v203_v29 = vld [vmem:[%s6388_s24 + $0x68] sm:$0x1]  ;;  %v205_v30 = vld [vmem:[%s6388_s24 + $0x70] sm:$0x1] }
  0x41   :  { %202 = vst [vmem:[#allocation2 + $0x61] sm:$0x1] %v201_v28  ;;  %204 = vst [vmem:[#allocation2 + $0x69] sm:$0x1] %v203_v29  ;;  %v207_v31 = vld [vmem:[%s6388_s24 + $0x78] sm:$0x1] }
  0x42   :  { %206 = vst [vmem:[#allocation2 + $0x71] sm:$0x1] %v205_v30  ;;  %208 = vst [vmem:[#allocation2 + $0x79] sm:$0x1] %v207_v31 }
  0x43   :  { %272 = vsyncadd [#allocation4 + $0x1], 256  ;;  %s5822_s25 = sld [smem:[#allocation7 + $0x2]] }
  0x49   :  { %s274_s26 = sshrl.u32 %s5822_s25, 3  ;;  %s275_s27 = sand.u32 7, %s5822_s25  }
  0x4a   :  { %s5823_s28 = sshll.u32 %s274_s26, 7 }
  0x4b   :  { %s277_s29 = sadd.s32 %s5823_s28, %s275_s27 }
  0x4c   :  { %s6409_s9 = scalar_lea.vmem %s7643_s5, %s277_s29 }
  0x4d   :  { %v299_v32 = vld [vmem:[%s6409_s9] sm:$0x1]  ;;  %v301_v33 = vld [vmem:[%s6409_s9 + $0x8] sm:$0x1]  ;;  %v303_v34 = vld [vmem:[%s6409_s9 + $0x10] sm:$0x1] }
  0x4e   :  { %300 = vst [vmem:[#allocation2 + $0x2] sm:$0x1] %v299_v32  ;;  %302 = vst [vmem:[#allocation2 + $0xa] sm:$0x1] %v301_v33  ;;  %v305_v35 = vld [vmem:[%s6409_s9 + $0x18] sm:$0x1] }
  0x4f   :  { %304 = vst [vmem:[#allocation2 + $0x12] sm:$0x1] %v303_v34  ;;  %v307_v36 = vld [vmem:[%s6409_s9 + $0x20] sm:$0x1]  ;;  %v309_v37 = vld [vmem:[%s6409_s9 + $0x28] sm:$0x1] }
  0x50   :  { %306 = vst [vmem:[#allocation2 + $0x1a] sm:$0x1] %v305_v35  ;;  %308 = vst [vmem:[#allocation2 + $0x22] sm:$0x1] %v307_v36  ;;  %v311_v38 = vld [vmem:[%s6409_s9 + $0x30] sm:$0x1] }
  0x51   :  { %310 = vst [vmem:[#allocation2 + $0x2a] sm:$0x1] %v309_v37  ;;  %v313_v39 = vld [vmem:[%s6409_s9 + $0x38] sm:$0x1]  ;;  %v315_v40 = vld [vmem:[%s6409_s9 + $0x40] sm:$0x1] }
  0x52   :  { %312 = vst [vmem:[#allocation2 + $0x32] sm:$0x1] %v311_v38  ;;  %314 = vst [vmem:[#allocation2 + $0x3a] sm:$0x1] %v313_v39  ;;  %v317_v41 = vld [vmem:[%s6409_s9 + $0x48] sm:$0x1] }
  0x53   :  { %316 = vst [vmem:[#allocation2 + $0x42] sm:$0x1] %v315_v40  ;;  %v319_v42 = vld [vmem:[%s6409_s9 + $0x50] sm:$0x1]  ;;  %v321_v43 = vld [vmem:[%s6409_s9 + $0x58] sm:$0x1] }
  0x54   :  { %318 = vst [vmem:[#allocation2 + $0x4a] sm:$0x1] %v317_v41  ;;  %320 = vst [vmem:[#allocation2 + $0x52] sm:$0x1] %v319_v42  ;;  %v323_v44 = vld [vmem:[%s6409_s9 + $0x60] sm:$0x1] }
  0x55   :  { %322 = vst [vmem:[#allocation2 + $0x5a] sm:$0x1] %v321_v43  ;;  %v325_v45 = vld [vmem:[%s6409_s9 + $0x68] sm:$0x1]  ;;  %v327_v46 = vld [vmem:[%s6409_s9 + $0x70] sm:$0x1] }
  0x56   :  { %324 = vst [vmem:[#allocation2 + $0x62] sm:$0x1] %v323_v44  ;;  %326 = vst [vmem:[#allocation2 + $0x6a] sm:$0x1] %v325_v45  ;;  %v329_v47 = vld [vmem:[%s6409_s9 + $0x78] sm:$0x1] }
  0x57   :  { %328 = vst [vmem:[#allocation2 + $0x72] sm:$0x1] %v327_v46  ;;  %330 = vst [vmem:[#allocation2 + $0x7a] sm:$0x1] %v329_v47 }
  0x58   :  { %394 = vsyncadd [#allocation4 + $0x2], 256  ;;  %s5824_s0 = sld [smem:[#allocation7 + $0x3]] }
  0x5e   :  { %s396_s1 = sshrl.u32 %s5824_s0, 3  ;;  %s397_s10 = sand.u32 7, %s5824_s0  }
  0x5f   :  { %s5825_s11 = sshll.u32 %s396_s1, 7 }
  0x60   :  { %s399_s12 = sadd.s32 %s5825_s11, %s397_s10 }
  0x61   :  { %s6430_s15 = scalar_lea.vmem %s7643_s5, %s399_s12 }
  0x62   :  { %v421_v48 = vld [vmem:[%s6430_s15] sm:$0x1]  ;;  %v423_v49 = vld [vmem:[%s6430_s15 + $0x8] sm:$0x1]  ;;  %v425_v50 = vld [vmem:[%s6430_s15 + $0x10] sm:$0x1] }
  0x63   :  { %422 = vst [vmem:[#allocation2 + $0x3] sm:$0x1] %v421_v48  ;;  %424 = vst [vmem:[#allocation2 + $0xb] sm:$0x1] %v423_v49  ;;  %v427_v51 = vld [vmem:[%s6430_s15 + $0x18] sm:$0x1] }
  0x64   :  { %426 = vst [vmem:[#allocation2 + $0x13] sm:$0x1] %v425_v50  ;;  %v429_v52 = vld [vmem:[%s6430_s15 + $0x20] sm:$0x1]  ;;  %v431_v53 = vld [vmem:[%s6430_s15 + $0x28] sm:$0x1] }
  0x65   :  { %428 = vst [vmem:[#allocation2 + $0x1b] sm:$0x1] %v427_v51  ;;  %430 = vst [vmem:[#allocation2 + $0x23] sm:$0x1] %v429_v52  ;;  %v433_v54 = vld [vmem:[%s6430_s15 + $0x30] sm:$0x1] }
  0x66   :  { %432 = vst [vmem:[#allocation2 + $0x2b] sm:$0x1] %v431_v53  ;;  %v435_v55 = vld [vmem:[%s6430_s15 + $0x38] sm:$0x1]  ;;  %v437_v56 = vld [vmem:[%s6430_s15 + $0x40] sm:$0x1] }
  0x67   :  { %434 = vst [vmem:[#allocation2 + $0x33] sm:$0x1] %v433_v54  ;;  %436 = vst [vmem:[#allocation2 + $0x3b] sm:$0x1] %v435_v55  ;;  %v439_v57 = vld [vmem:[%s6430_s15 + $0x48] sm:$0x1] }
  0x68   :  { %438 = vst [vmem:[#allocation2 + $0x43] sm:$0x1] %v437_v56  ;;  %v441_v58 = vld [vmem:[%s6430_s15 + $0x50] sm:$0x1]  ;;  %v443_v59 = vld [vmem:[%s6430_s15 + $0x58] sm:$0x1] }
  0x69   :  { %440 = vst [vmem:[#allocation2 + $0x4b] sm:$0x1] %v439_v57  ;;  %442 = vst [vmem:[#allocation2 + $0x53] sm:$0x1] %v441_v58  ;;  %v445_v60 = vld [vmem:[%s6430_s15 + $0x60] sm:$0x1] }
  0x6a   :  { %444 = vst [vmem:[#allocation2 + $0x5b] sm:$0x1] %v443_v59  ;;  %v447_v61 = vld [vmem:[%s6430_s15 + $0x68] sm:$0x1]  ;;  %v449_v62 = vld [vmem:[%s6430_s15 + $0x70] sm:$0x1] }
  0x6b   :  { %446 = vst [vmem:[#allocation2 + $0x63] sm:$0x1] %v445_v60  ;;  %448 = vst [vmem:[#allocation2 + $0x6b] sm:$0x1] %v447_v61  ;;  %v451_v63 = vld [vmem:[%s6430_s15 + $0x78] sm:$0x1] }
  0x6c   :  { %450 = vst [vmem:[#allocation2 + $0x73] sm:$0x1] %v449_v62  ;;  %452 = vst [vmem:[#allocation2 + $0x7b] sm:$0x1] %v451_v63 }
  0x6d   :  { %516 = vsyncadd [#allocation4 + $0x3], 256  ;;  %s5826_s16 = sld [smem:[#allocation7 + $0x4]] }
  0x73   :  { %s518_s17 = sshrl.u32 %s5826_s16, 3  ;;  %s519_s18 = sand.u32 7, %s5826_s16  }
  0x74   :  { %s5827_s19 = sshll.u32 %s518_s17, 7 }
  0x75   :  { %s521_s20 = sadd.s32 %s5827_s19, %s519_s18 }
  0x76   :  { %s6451_s23 = scalar_lea.vmem %s7643_s5, %s521_s20 }
  0x77   :  { %v543_v0 = vld [vmem:[%s6451_s23] sm:$0x1]  ;;  %v545_v1 = vld [vmem:[%s6451_s23 + $0x8] sm:$0x1]  ;;  %v547_v2 = vld [vmem:[%s6451_s23 + $0x10] sm:$0x1] }
  0x78   :  { %544 = vst [vmem:[#allocation2 + $0x4] sm:$0x1] %v543_v0  ;;  %546 = vst [vmem:[#allocation2 + $0xc] sm:$0x1] %v545_v1  ;;  %v549_v3 = vld [vmem:[%s6451_s23 + $0x18] sm:$0x1] }
  0x79   :  { %548 = vst [vmem:[#allocation2 + $0x14] sm:$0x1] %v547_v2  ;;  %v551_v4 = vld [vmem:[%s6451_s23 + $0x20] sm:$0x1]  ;;  %v553_v5 = vld [vmem:[%s6451_s23 + $0x28] sm:$0x1] }
  0x7a   :  { %550 = vst [vmem:[#allocation2 + $0x1c] sm:$0x1] %v549_v3  ;;  %552 = vst [vmem:[#allocation2 + $0x24] sm:$0x1] %v551_v4  ;;  %v555_v6 = vld [vmem:[%s6451_s23 + $0x30] sm:$0x1] }
  0x7b   :  { %554 = vst [vmem:[#allocation2 + $0x2c] sm:$0x1] %v553_v5  ;;  %v557_v7 = vld [vmem:[%s6451_s23 + $0x38] sm:$0x1]  ;;  %v559_v8 = vld [vmem:[%s6451_s23 + $0x40] sm:$0x1] }
  0x7c   :  { %556 = vst [vmem:[#allocation2 + $0x34] sm:$0x1] %v555_v6  ;;  %558 = vst [vmem:[#allocation2 + $0x3c] sm:$0x1] %v557_v7  ;;  %v561_v9 = vld [vmem:[%s6451_s23 + $0x48] sm:$0x1] }
  0x7d   :  { %560 = vst [vmem:[#allocation2 + $0x44] sm:$0x1] %v559_v8  ;;  %v563_v10 = vld [vmem:[%s6451_s23 + $0x50] sm:$0x1]  ;;  %v565_v11 = vld [vmem:[%s6451_s23 + $0x58] sm:$0x1] }
  0x7e   :  { %562 = vst [vmem:[#allocation2 + $0x4c] sm:$0x1] %v561_v9  ;;  %564 = vst [vmem:[#allocation2 + $0x54] sm:$0x1] %v563_v10  ;;  %v567_v12 = vld [vmem:[%s6451_s23 + $0x60] sm:$0x1] }
  0x7f   :  { %566 = vst [vmem:[#allocation2 + $0x5c] sm:$0x1] %v565_v11  ;;  %v569_v13 = vld [vmem:[%s6451_s23 + $0x68] sm:$0x1]  ;;  %v571_v14 = vld [vmem:[%s6451_s23 + $0x70] sm:$0x1] }
  0x80   :  { %568 = vst [vmem:[#allocation2 + $0x64] sm:$0x1] %v567_v12  ;;  %570 = vst [vmem:[#allocation2 + $0x6c] sm:$0x1] %v569_v13  ;;  %v573_v15 = vld [vmem:[%s6451_s23 + $0x78] sm:$0x1] }
  0x81   :  { %572 = vst [vmem:[#allocation2 + $0x74] sm:$0x1] %v571_v14  ;;  %574 = vst [vmem:[#allocation2 + $0x7c] sm:$0x1] %v573_v15 }
  0x82   :  { %638 = vsyncadd [#allocation4 + $0x4], 256  ;;  %s5828_s24 = sld [smem:[#allocation7 + $0x5]] }
  0x88   :  { %s640_s25 = sshrl.u32 %s5828_s24, 3  ;;  %s641_s26 = sand.u32 7, %s5828_s24  }
  0x89   :  { %s5829_s27 = sshll.u32 %s640_s25, 7 }
  0x8a   :  { %s643_s28 = sadd.s32 %s5829_s27, %s641_s26 }
  0x8b   :  { %s6472_s8 = scalar_lea.vmem %s7643_s5, %s643_s28 }
  0x8c   :  { %v665_v16 = vld [vmem:[%s6472_s8] sm:$0x1]  ;;  %v667_v17 = vld [vmem:[%s6472_s8 + $0x8] sm:$0x1]  ;;  %v669_v18 = vld [vmem:[%s6472_s8 + $0x10] sm:$0x1] }
  0x8d   :  { %666 = vst [vmem:[#allocation2 + $0x5] sm:$0x1] %v665_v16  ;;  %668 = vst [vmem:[#allocation2 + $0xd] sm:$0x1] %v667_v17  ;;  %v671_v19 = vld [vmem:[%s6472_s8 + $0x18] sm:$0x1] }
  0x8e   :  { %670 = vst [vmem:[#allocation2 + $0x15] sm:$0x1] %v669_v18  ;;  %v673_v20 = vld [vmem:[%s6472_s8 + $0x20] sm:$0x1]  ;;  %v675_v21 = vld [vmem:[%s6472_s8 + $0x28] sm:$0x1] }
  0x8f   :  { %672 = vst [vmem:[#allocation2 + $0x1d] sm:$0x1] %v671_v19  ;;  %674 = vst [vmem:[#allocation2 + $0x25] sm:$0x1] %v673_v20  ;;  %v677_v22 = vld [vmem:[%s6472_s8 + $0x30] sm:$0x1] }
  0x90   :  { %676 = vst [vmem:[#allocation2 + $0x2d] sm:$0x1] %v675_v21  ;;  %v679_v23 = vld [vmem:[%s6472_s8 + $0x38] sm:$0x1]  ;;  %v681_v24 = vld [vmem:[%s6472_s8 + $0x40] sm:$0x1] }
  0x91   :  { %678 = vst [vmem:[#allocation2 + $0x35] sm:$0x1] %v677_v22  ;;  %680 = vst [vmem:[#allocation2 + $0x3d] sm:$0x1] %v679_v23  ;;  %v683_v25 = vld [vmem:[%s6472_s8 + $0x48] sm:$0x1] }
  0x92   :  { %682 = vst [vmem:[#allocation2 + $0x45] sm:$0x1] %v681_v24  ;;  %v685_v26 = vld [vmem:[%s6472_s8 + $0x50] sm:$0x1]  ;;  %v687_v27 = vld [vmem:[%s6472_s8 + $0x58] sm:$0x1] }
  0x93   :  { %684 = vst [vmem:[#allocation2 + $0x4d] sm:$0x1] %v683_v25  ;;  %686 = vst [vmem:[#allocation2 + $0x55] sm:$0x1] %v685_v26  ;;  %v689_v28 = vld [vmem:[%s6472_s8 + $0x60] sm:$0x1] }
  0x94   :  { %688 = vst [vmem:[#allocation2 + $0x5d] sm:$0x1] %v687_v27  ;;  %v691_v29 = vld [vmem:[%s6472_s8 + $0x68] sm:$0x1]  ;;  %v693_v30 = vld [vmem:[%s6472_s8 + $0x70] sm:$0x1] }
  0x95   :  { %690 = vst [vmem:[#allocation2 + $0x65] sm:$0x1] %v689_v28  ;;  %692 = vst [vmem:[#allocation2 + $0x6d] sm:$0x1] %v691_v29  ;;  %v695_v31 = vld [vmem:[%s6472_s8 + $0x78] sm:$0x1] }
  0x96   :  { %694 = vst [vmem:[#allocation2 + $0x75] sm:$0x1] %v693_v30  ;;  %696 = vst [vmem:[#allocation2 + $0x7d] sm:$0x1] %v695_v31 }
  0x97   :  { %760 = vsyncadd [#allocation4 + $0x5], 256  ;;  %s5830_s9 = sld [smem:[#allocation7 + $0x6]] }
  0x9d   :  { %s762_s0 = sshrl.u32 %s5830_s9, 3  ;;  %s763_s1 = sand.u32 7, %s5830_s9  }
  0x9e   :  { %s5831_s10 = sshll.u32 %s762_s0, 7 }
  0x9f   :  { %s765_s11 = sadd.s32 %s5831_s10, %s763_s1 }
  0xa0   :  { %s6493_s14 = scalar_lea.vmem %s7643_s5, %s765_s11 }
  0xa1   :  { %v787_v32 = vld [vmem:[%s6493_s14] sm:$0x1]  ;;  %v789_v33 = vld [vmem:[%s6493_s14 + $0x8] sm:$0x1]  ;;  %v791_v34 = vld [vmem:[%s6493_s14 + $0x10] sm:$0x1] }
  0xa2   :  { %788 = vst [vmem:[#allocation2 + $0x6] sm:$0x1] %v787_v32  ;;  %790 = vst [vmem:[#allocation2 + $0xe] sm:$0x1] %v789_v33  ;;  %v793_v35 = vld [vmem:[%s6493_s14 + $0x18] sm:$0x1] }
  0xa3   :  { %792 = vst [vmem:[#allocation2 + $0x16] sm:$0x1] %v791_v34  ;;  %v795_v36 = vld [vmem:[%s6493_s14 + $0x20] sm:$0x1]  ;;  %v797_v37 = vld [vmem:[%s6493_s14 + $0x28] sm:$0x1] }
  0xa4   :  { %794 = vst [vmem:[#allocation2 + $0x1e] sm:$0x1] %v793_v35  ;;  %796 = vst [vmem:[#allocation2 + $0x26] sm:$0x1] %v795_v36  ;;  %v799_v38 = vld [vmem:[%s6493_s14 + $0x30] sm:$0x1] }
  0xa5   :  { %798 = vst [vmem:[#allocation2 + $0x2e] sm:$0x1] %v797_v37  ;;  %v801_v39 = vld [vmem:[%s6493_s14 + $0x38] sm:$0x1]  ;;  %v803_v40 = vld [vmem:[%s6493_s14 + $0x40] sm:$0x1] }
  0xa6   :  { %800 = vst [vmem:[#allocation2 + $0x36] sm:$0x1] %v799_v38  ;;  %802 = vst [vmem:[#allocation2 + $0x3e] sm:$0x1] %v801_v39  ;;  %v805_v41 = vld [vmem:[%s6493_s14 + $0x48] sm:$0x1] }
  0xa7   :  { %804 = vst [vmem:[#allocation2 + $0x46] sm:$0x1] %v803_v40  ;;  %v807_v42 = vld [vmem:[%s6493_s14 + $0x50] sm:$0x1]  ;;  %v809_v43 = vld [vmem:[%s6493_s14 + $0x58] sm:$0x1] }
  0xa8   :  { %806 = vst [vmem:[#allocation2 + $0x4e] sm:$0x1] %v805_v41  ;;  %808 = vst [vmem:[#allocation2 + $0x56] sm:$0x1] %v807_v42  ;;  %v811_v44 = vld [vmem:[%s6493_s14 + $0x60] sm:$0x1] }
  0xa9   :  { %810 = vst [vmem:[#allocation2 + $0x5e] sm:$0x1] %v809_v43  ;;  %v813_v45 = vld [vmem:[%s6493_s14 + $0x68] sm:$0x1]  ;;  %v815_v46 = vld [vmem:[%s6493_s14 + $0x70] sm:$0x1] }
  0xaa   :  { %812 = vst [vmem:[#allocation2 + $0x66] sm:$0x1] %v811_v44  ;;  %814 = vst [vmem:[#allocation2 + $0x6e] sm:$0x1] %v813_v45  ;;  %v817_v47 = vld [vmem:[%s6493_s14 + $0x78] sm:$0x1] }
  0xab   :  { %816 = vst [vmem:[#allocation2 + $0x76] sm:$0x1] %v815_v46  ;;  %818 = vst [vmem:[#allocation2 + $0x7e] sm:$0x1] %v817_v47 }
  0xac   :  { %882 = vsyncadd [#allocation4 + $0x6], 256  ;;  %s5832_s15 = sld [smem:[#allocation7 + $0x7]] }
  0xb2   :  { %s884_s16 = sshrl.u32 %s5832_s15, 3  ;;  %s885_s17 = sand.u32 7, %s5832_s15  }
  0xb3   :  { %s5833_s18 = sshll.u32 %s884_s16, 7 }
  0xb4   :  { %s887_s19 = sadd.s32 %s5833_s18, %s885_s17 }
  0xb5   :  { %s6514_s22 = scalar_lea.vmem %s7643_s5, %s887_s19 }
  0xb6   :  { %v909_v48 = vld [vmem:[%s6514_s22] sm:$0x1]  ;;  %v911_v49 = vld [vmem:[%s6514_s22 + $0x8] sm:$0x1]  ;;  %v913_v50 = vld [vmem:[%s6514_s22 + $0x10] sm:$0x1] }
  0xb7   :  { %910 = vst [vmem:[#allocation2 + $0x7] sm:$0x1] %v909_v48  ;;  %912 = vst [vmem:[#allocation2 + $0xf] sm:$0x1] %v911_v49  ;;  %v915_v51 = vld [vmem:[%s6514_s22 + $0x18] sm:$0x1] }
  0xb8   :  { %914 = vst [vmem:[#allocation2 + $0x17] sm:$0x1] %v913_v50  ;;  %v917_v52 = vld [vmem:[%s6514_s22 + $0x20] sm:$0x1]  ;;  %v919_v53 = vld [vmem:[%s6514_s22 + $0x28] sm:$0x1] }
  0xb9   :  { %916 = vst [vmem:[#allocation2 + $0x1f] sm:$0x1] %v915_v51  ;;  %918 = vst [vmem:[#allocation2 + $0x27] sm:$0x1] %v917_v52  ;;  %v921_v54 = vld [vmem:[%s6514_s22 + $0x30] sm:$0x1] }
  0xba   :  { %920 = vst [vmem:[#allocation2 + $0x2f] sm:$0x1] %v919_v53  ;;  %v923_v55 = vld [vmem:[%s6514_s22 + $0x38] sm:$0x1]  ;;  %v925_v56 = vld [vmem:[%s6514_s22 + $0x40] sm:$0x1] }
  0xbb   :  { %922 = vst [vmem:[#allocation2 + $0x37] sm:$0x1] %v921_v54  ;;  %924 = vst [vmem:[#allocation2 + $0x3f] sm:$0x1] %v923_v55  ;;  %v927_v57 = vld [vmem:[%s6514_s22 + $0x48] sm:$0x1] }
  0xbc   :  { %926 = vst [vmem:[#allocation2 + $0x47] sm:$0x1] %v925_v56  ;;  %v929_v58 = vld [vmem:[%s6514_s22 + $0x50] sm:$0x1]  ;;  %v931_v59 = vld [vmem:[%s6514_s22 + $0x58] sm:$0x1] }
  0xbd   :  { %928 = vst [vmem:[#allocation2 + $0x4f] sm:$0x1] %v927_v57  ;;  %930 = vst [vmem:[#allocation2 + $0x57] sm:$0x1] %v929_v58  ;;  %v933_v60 = vld [vmem:[%s6514_s22 + $0x60] sm:$0x1] }
  0xbe   :  { %932 = vst [vmem:[#allocation2 + $0x5f] sm:$0x1] %v931_v59  ;;  %v935_v61 = vld [vmem:[%s6514_s22 + $0x68] sm:$0x1]  ;;  %v937_v62 = vld [vmem:[%s6514_s22 + $0x70] sm:$0x1] }
  0xbf   :  { %934 = vst [vmem:[#allocation2 + $0x67] sm:$0x1] %v933_v60  ;;  %936 = vst [vmem:[#allocation2 + $0x6f] sm:$0x1] %v935_v61  ;;  %v939_v63 = vld [vmem:[%s6514_s22 + $0x78] sm:$0x1] }
  0xc0   :  { %938 = vst [vmem:[#allocation2 + $0x77] sm:$0x1] %v937_v62  ;;  %940 = vst [vmem:[#allocation2 + $0x7f] sm:$0x1] %v939_v63 }
  0xc1   :  { %1004 = vsyncadd [#allocation4 + $0x7], 256  ;;  %s5834_s23 = sld [smem:[#allocation7 + $0x80]] }
  0xc7   :  { %s1006_s24 = sshrl.u32 %s5834_s23, 3  ;;  %s1007_s25 = sand.u32 7, %s5834_s23  }
  0xc8   :  { %s5835_s26 = sshll.u32 %s1006_s24, 7 }
  0xc9   :  { %s1009_s27 = sadd.s32 %s5835_s26, %s1007_s25 }
  0xca   :  { %s6535_s30 = scalar_lea.vmem %s7643_s5, %s1009_s27 }
  0xcb   :  { %v1031_v0 = vld [vmem:[%s6535_s30] sm:$0x1]  ;;  %v1033_v1 = vld [vmem:[%s6535_s30 + $0x8] sm:$0x1]  ;;  %v1035_v2 = vld [vmem:[%s6535_s30 + $0x10] sm:$0x1] }
  0xcc   :  { %1032 = vst [vmem:[#allocation2 + $0x80] sm:$0x1] %v1031_v0  ;;  %1034 = vst [vmem:[#allocation2 + $0x88] sm:$0x1] %v1033_v1  ;;  %v1037_v3 = vld [vmem:[%s6535_s30 + $0x18] sm:$0x1] }
  0xcd   :  { %1036 = vst [vmem:[#allocation2 + $0x90] sm:$0x1] %v1035_v2  ;;  %v1039_v4 = vld [vmem:[%s6535_s30 + $0x20] sm:$0x1]  ;;  %v1041_v5 = vld [vmem:[%s6535_s30 + $0x28] sm:$0x1] }
  0xce   :  { %1038 = vst [vmem:[#allocation2 + $0x98] sm:$0x1] %v1037_v3  ;;  %1040 = vst [vmem:[#allocation2 + $0xa0] sm:$0x1] %v1039_v4  ;;  %v1043_v6 = vld [vmem:[%s6535_s30 + $0x30] sm:$0x1] }
  0xcf   :  { %1042 = vst [vmem:[#allocation2 + $0xa8] sm:$0x1] %v1041_v5  ;;  %v1045_v7 = vld [vmem:[%s6535_s30 + $0x38] sm:$0x1]  ;;  %v1047_v8 = vld [vmem:[%s6535_s30 + $0x40] sm:$0x1] }
  0xd0   :  { %1044 = vst [vmem:[#allocation2 + $0xb0] sm:$0x1] %v1043_v6  ;;  %1046 = vst [vmem:[#allocation2 + $0xb8] sm:$0x1] %v1045_v7  ;;  %v1049_v9 = vld [vmem:[%s6535_s30 + $0x48] sm:$0x1] }
  0xd1   :  { %1048 = vst [vmem:[#allocation2 + $0xc0] sm:$0x1] %v1047_v8  ;;  %v1051_v10 = vld [vmem:[%s6535_s30 + $0x50] sm:$0x1]  ;;  %v1053_v11 = vld [vmem:[%s6535_s30 + $0x58] sm:$0x1] }
  0xd2   :  { %1050 = vst [vmem:[#allocation2 + $0xc8] sm:$0x1] %v1049_v9  ;;  %1052 = vst [vmem:[#allocation2 + $0xd0] sm:$0x1] %v1051_v10  ;;  %v1055_v12 = vld [vmem:[%s6535_s30 + $0x60] sm:$0x1] }
  0xd3   :  { %1054 = vst [vmem:[#allocation2 + $0xd8] sm:$0x1] %v1053_v11  ;;  %v1057_v13 = vld [vmem:[%s6535_s30 + $0x68] sm:$0x1]  ;;  %v1059_v14 = vld [vmem:[%s6535_s30 + $0x70] sm:$0x1] }
  0xd4   :  { %1056 = vst [vmem:[#allocation2 + $0xe0] sm:$0x1] %v1055_v12  ;;  %1058 = vst [vmem:[#allocation2 + $0xe8] sm:$0x1] %v1057_v13  ;;  %v1061_v15 = vld [vmem:[%s6535_s30 + $0x78] sm:$0x1] }
  0xd5   :  { %1060 = vst [vmem:[#allocation2 + $0xf0] sm:$0x1] %v1059_v14  ;;  %1062 = vst [vmem:[#allocation2 + $0xf8] sm:$0x1] %v1061_v15 }
  0xd6   :  { %1126 = vsyncadd [#allocation4 + $0x8], 256  ;;  %s5836_s8 = sld [smem:[#allocation7 + $0x81]] }
  0xdc   :  { %s1128_s9 = sshrl.u32 %s5836_s8, 3  ;;  %s1129_s0 = sand.u32 7, %s5836_s8  }
  0xdd   :  { %s5837_s1 = sshll.u32 %s1128_s9, 7 }
  0xde   :  { %s1131_s10 = sadd.s32 %s5837_s1, %s1129_s0 }
  0xdf   :  { %s6556_s13 = scalar_lea.vmem %s7643_s5, %s1131_s10 }
  0xe0   :  { %v1153_v16 = vld [vmem:[%s6556_s13] sm:$0x1]  ;;  %v1155_v17 = vld [vmem:[%s6556_s13 + $0x8] sm:$0x1]  ;;  %v1157_v18 = vld [vmem:[%s6556_s13 + $0x10] sm:$0x1] }
  0xe1   :  { %1154 = vst [vmem:[#allocation2 + $0x81] sm:$0x1] %v1153_v16  ;;  %1156 = vst [vmem:[#allocation2 + $0x89] sm:$0x1] %v1155_v17  ;;  %v1159_v19 = vld [vmem:[%s6556_s13 + $0x18] sm:$0x1] }
  0xe2   :  { %1158 = vst [vmem:[#allocation2 + $0x91] sm:$0x1] %v1157_v18  ;;  %v1161_v20 = vld [vmem:[%s6556_s13 + $0x20] sm:$0x1]  ;;  %v1163_v21 = vld [vmem:[%s6556_s13 + $0x28] sm:$0x1] }
  0xe3   :  { %1160 = vst [vmem:[#allocation2 + $0x99] sm:$0x1] %v1159_v19  ;;  %1162 = vst [vmem:[#allocation2 + $0xa1] sm:$0x1] %v1161_v20  ;;  %v1165_v22 = vld [vmem:[%s6556_s13 + $0x30] sm:$0x1] }
  0xe4   :  { %1164 = vst [vmem:[#allocation2 + $0xa9] sm:$0x1] %v1163_v21  ;;  %v1167_v23 = vld [vmem:[%s6556_s13 + $0x38] sm:$0x1]  ;;  %v1169_v24 = vld [vmem:[%s6556_s13 + $0x40] sm:$0x1] }
  0xe5   :  { %1166 = vst [vmem:[#allocation2 + $0xb1] sm:$0x1] %v1165_v22  ;;  %1168 = vst [vmem:[#allocation2 + $0xb9] sm:$0x1] %v1167_v23  ;;  %v1171_v25 = vld [vmem:[%s6556_s13 + $0x48] sm:$0x1] }
  0xe6   :  { %1170 = vst [vmem:[#allocation2 + $0xc1] sm:$0x1] %v1169_v24  ;;  %v1173_v26 = vld [vmem:[%s6556_s13 + $0x50] sm:$0x1]  ;;  %v1175_v27 = vld [vmem:[%s6556_s13 + $0x58] sm:$0x1] }
  0xe7   :  { %1172 = vst [vmem:[#allocation2 + $0xc9] sm:$0x1] %v1171_v25  ;;  %1174 = vst [vmem:[#allocation2 + $0xd1] sm:$0x1] %v1173_v26  ;;  %v1177_v28 = vld [vmem:[%s6556_s13 + $0x60] sm:$0x1] }
  0xe8   :  { %1176 = vst [vmem:[#allocation2 + $0xd9] sm:$0x1] %v1175_v27  ;;  %v1179_v29 = vld [vmem:[%s6556_s13 + $0x68] sm:$0x1]  ;;  %v1181_v30 = vld [vmem:[%s6556_s13 + $0x70] sm:$0x1] }
  0xe9   :  { %1178 = vst [vmem:[#allocation2 + $0xe1] sm:$0x1] %v1177_v28  ;;  %1180 = vst [vmem:[#allocation2 + $0xe9] sm:$0x1] %v1179_v29  ;;  %v1183_v31 = vld [vmem:[%s6556_s13 + $0x78] sm:$0x1] }
  0xea   :  { %1182 = vst [vmem:[#allocation2 + $0xf1] sm:$0x1] %v1181_v30  ;;  %1184 = vst [vmem:[#allocation2 + $0xf9] sm:$0x1] %v1183_v31 }
  0xeb   :  { %1248 = vsyncadd [#allocation4 + $0x9], 256  ;;  %s5838_s14 = sld [smem:[#allocation7 + $0x82]] }
  0xf1   :  { %s1250_s15 = sshrl.u32 %s5838_s14, 3  ;;  %s1251_s16 = sand.u32 7, %s5838_s14  }
  0xf2   :  { %s5839_s17 = sshll.u32 %s1250_s15, 7 }
  0xf3   :  { %s1253_s18 = sadd.s32 %s5839_s17, %s1251_s16 }
  0xf4   :  { %s6577_s21 = scalar_lea.vmem %s7643_s5, %s1253_s18 }
  0xf5   :  { %v1275_v32 = vld [vmem:[%s6577_s21] sm:$0x1]  ;;  %v1277_v33 = vld [vmem:[%s6577_s21 + $0x8] sm:$0x1]  ;;  %v1279_v34 = vld [vmem:[%s6577_s21 + $0x10] sm:$0x1] }
  0xf6   :  { %1276 = vst [vmem:[#allocation2 + $0x82] sm:$0x1] %v1275_v32  ;;  %1278 = vst [vmem:[#allocation2 + $0x8a] sm:$0x1] %v1277_v33  ;;  %v1281_v35 = vld [vmem:[%s6577_s21 + $0x18] sm:$0x1] }
  0xf7   :  { %1280 = vst [vmem:[#allocation2 + $0x92] sm:$0x1] %v1279_v34  ;;  %v1283_v36 = vld [vmem:[%s6577_s21 + $0x20] sm:$0x1]  ;;  %v1285_v37 = vld [vmem:[%s6577_s21 + $0x28] sm:$0x1] }
  0xf8   :  { %1282 = vst [vmem:[#allocation2 + $0x9a] sm:$0x1] %v1281_v35  ;;  %1284 = vst [vmem:[#allocation2 + $0xa2] sm:$0x1] %v1283_v36  ;;  %v1287_v38 = vld [vmem:[%s6577_s21 + $0x30] sm:$0x1] }
  0xf9   :  { %1286 = vst [vmem:[#allocation2 + $0xaa] sm:$0x1] %v1285_v37  ;;  %v1289_v39 = vld [vmem:[%s6577_s21 + $0x38] sm:$0x1]  ;;  %v1291_v40 = vld [vmem:[%s6577_s21 + $0x40] sm:$0x1] }
  0xfa   :  { %1288 = vst [vmem:[#allocation2 + $0xb2] sm:$0x1] %v1287_v38  ;;  %1290 = vst [vmem:[#allocation2 + $0xba] sm:$0x1] %v1289_v39  ;;  %v1293_v41 = vld [vmem:[%s6577_s21 + $0x48] sm:$0x1] }
  0xfb   :  { %1292 = vst [vmem:[#allocation2 + $0xc2] sm:$0x1] %v1291_v40  ;;  %v1295_v42 = vld [vmem:[%s6577_s21 + $0x50] sm:$0x1]  ;;  %v1297_v43 = vld [vmem:[%s6577_s21 + $0x58] sm:$0x1] }
  0xfc   :  { %1294 = vst [vmem:[#allocation2 + $0xca] sm:$0x1] %v1293_v41  ;;  %1296 = vst [vmem:[#allocation2 + $0xd2] sm:$0x1] %v1295_v42  ;;  %v1299_v44 = vld [vmem:[%s6577_s21 + $0x60] sm:$0x1] }
  0xfd   :  { %1298 = vst [vmem:[#allocation2 + $0xda] sm:$0x1] %v1297_v43  ;;  %v1301_v45 = vld [vmem:[%s6577_s21 + $0x68] sm:$0x1]  ;;  %v1303_v46 = vld [vmem:[%s6577_s21 + $0x70] sm:$0x1] }
  0xfe   :  { %1300 = vst [vmem:[#allocation2 + $0xe2] sm:$0x1] %v1299_v44  ;;  %1302 = vst [vmem:[#allocation2 + $0xea] sm:$0x1] %v1301_v45  ;;  %v1305_v47 = vld [vmem:[%s6577_s21 + $0x78] sm:$0x1] }
  0xff   :  { %1304 = vst [vmem:[#allocation2 + $0xf2] sm:$0x1] %v1303_v46  ;;  %1306 = vst [vmem:[#allocation2 + $0xfa] sm:$0x1] %v1305_v47 }
 0x100   :  { %1370 = vsyncadd [#allocation4 + $0xa], 256  ;;  %s5840_s22 = sld [smem:[#allocation7 + $0x83]] }
 0x106   :  { %s1372_s23 = sshrl.u32 %s5840_s22, 3  ;;  %s1373_s24 = sand.u32 7, %s5840_s22  }
 0x107   :  { %s5841_s25 = sshll.u32 %s1372_s23, 7 }
 0x108   :  { %s1375_s26 = sadd.s32 %s5841_s25, %s1373_s24 }
 0x109   :  { %s6598_s29 = scalar_lea.vmem %s7643_s5, %s1375_s26 }
 0x10a   :  { %v1397_v48 = vld [vmem:[%s6598_s29] sm:$0x1]  ;;  %v1399_v49 = vld [vmem:[%s6598_s29 + $0x8] sm:$0x1]  ;;  %v1401_v50 = vld [vmem:[%s6598_s29 + $0x10] sm:$0x1] }
 0x10b   :  { %1398 = vst [vmem:[#allocation2 + $0x83] sm:$0x1] %v1397_v48  ;;  %1400 = vst [vmem:[#allocation2 + $0x8b] sm:$0x1] %v1399_v49  ;;  %v1403_v51 = vld [vmem:[%s6598_s29 + $0x18] sm:$0x1] }
 0x10c   :  { %1402 = vst [vmem:[#allocation2 + $0x93] sm:$0x1] %v1401_v50  ;;  %v1405_v52 = vld [vmem:[%s6598_s29 + $0x20] sm:$0x1]  ;;  %v1407_v53 = vld [vmem:[%s6598_s29 + $0x28] sm:$0x1] }
 0x10d   :  { %1404 = vst [vmem:[#allocation2 + $0x9b] sm:$0x1] %v1403_v51  ;;  %1406 = vst [vmem:[#allocation2 + $0xa3] sm:$0x1] %v1405_v52  ;;  %v1409_v54 = vld [vmem:[%s6598_s29 + $0x30] sm:$0x1] }
 0x10e   :  { %1408 = vst [vmem:[#allocation2 + $0xab] sm:$0x1] %v1407_v53  ;;  %v1411_v55 = vld [vmem:[%s6598_s29 + $0x38] sm:$0x1]  ;;  %v1413_v56 = vld [vmem:[%s6598_s29 + $0x40] sm:$0x1] }
 0x10f   :  { %1410 = vst [vmem:[#allocation2 + $0xb3] sm:$0x1] %v1409_v54  ;;  %1412 = vst [vmem:[#allocation2 + $0xbb] sm:$0x1] %v1411_v55  ;;  %v1415_v57 = vld [vmem:[%s6598_s29 + $0x48] sm:$0x1] }
 0x110   :  { %1414 = vst [vmem:[#allocation2 + $0xc3] sm:$0x1] %v1413_v56  ;;  %v1417_v58 = vld [vmem:[%s6598_s29 + $0x50] sm:$0x1]  ;;  %v1419_v59 = vld [vmem:[%s6598_s29 + $0x58] sm:$0x1] }
 0x111   :  { %1416 = vst [vmem:[#allocation2 + $0xcb] sm:$0x1] %v1415_v57  ;;  %1418 = vst [vmem:[#allocation2 + $0xd3] sm:$0x1] %v1417_v58  ;;  %v1421_v60 = vld [vmem:[%s6598_s29 + $0x60] sm:$0x1] }
 0x112   :  { %1420 = vst [vmem:[#allocation2 + $0xdb] sm:$0x1] %v1419_v59  ;;  %v1423_v61 = vld [vmem:[%s6598_s29 + $0x68] sm:$0x1]  ;;  %v1425_v62 = vld [vmem:[%s6598_s29 + $0x70] sm:$0x1] }
 0x113   :  { %1422 = vst [vmem:[#allocation2 + $0xe3] sm:$0x1] %v1421_v60  ;;  %1424 = vst [vmem:[#allocation2 + $0xeb] sm:$0x1] %v1423_v61  ;;  %v1427_v63 = vld [vmem:[%s6598_s29 + $0x78] sm:$0x1] }
 0x114   :  { %1426 = vst [vmem:[#allocation2 + $0xf3] sm:$0x1] %v1425_v62  ;;  %1428 = vst [vmem:[#allocation2 + $0xfb] sm:$0x1] %v1427_v63 }
 0x115   :  { %1492 = vsyncadd [#allocation4 + $0xb], 256  ;;  %s5842_s30 = sld [smem:[#allocation7 + $0x84]] }
 0x11b   :  { %s1494_s8 = sshrl.u32 %s5842_s30, 3  ;;  %s1495_s9 = sand.u32 7, %s5842_s30  }
 0x11c   :  { %s5843_s0 = sshll.u32 %s1494_s8, 7 }
 0x11d   :  { %s1497_s1 = sadd.s32 %s5843_s0, %s1495_s9 }
 0x11e   :  { %s6619_s12 = scalar_lea.vmem %s7643_s5, %s1497_s1 }
 0x11f   :  { %v1519_v0 = vld [vmem:[%s6619_s12] sm:$0x1]  ;;  %v1521_v1 = vld [vmem:[%s6619_s12 + $0x8] sm:$0x1]  ;;  %v1523_v2 = vld [vmem:[%s6619_s12 + $0x10] sm:$0x1] }
 0x120   :  { %1520 = vst [vmem:[#allocation2 + $0x84] sm:$0x1] %v1519_v0  ;;  %1522 = vst [vmem:[#allocation2 + $0x8c] sm:$0x1] %v1521_v1  ;;  %v1525_v3 = vld [vmem:[%s6619_s12 + $0x18] sm:$0x1] }
 0x121   :  { %1524 = vst [vmem:[#allocation2 + $0x94] sm:$0x1] %v1523_v2  ;;  %v1527_v4 = vld [vmem:[%s6619_s12 + $0x20] sm:$0x1]  ;;  %v1529_v5 = vld [vmem:[%s6619_s12 + $0x28] sm:$0x1] }
 0x122   :  { %1526 = vst [vmem:[#allocation2 + $0x9c] sm:$0x1] %v1525_v3  ;;  %1528 = vst [vmem:[#allocation2 + $0xa4] sm:$0x1] %v1527_v4  ;;  %v1531_v6 = vld [vmem:[%s6619_s12 + $0x30] sm:$0x1] }
 0x123   :  { %1530 = vst [vmem:[#allocation2 + $0xac] sm:$0x1] %v1529_v5  ;;  %v1533_v7 = vld [vmem:[%s6619_s12 + $0x38] sm:$0x1]  ;;  %v1535_v8 = vld [vmem:[%s6619_s12 + $0x40] sm:$0x1] }
 0x124   :  { %1532 = vst [vmem:[#allocation2 + $0xb4] sm:$0x1] %v1531_v6  ;;  %1534 = vst [vmem:[#allocation2 + $0xbc] sm:$0x1] %v1533_v7  ;;  %v1537_v9 = vld [vmem:[%s6619_s12 + $0x48] sm:$0x1] }
 0x125   :  { %1536 = vst [vmem:[#allocation2 + $0xc4] sm:$0x1] %v1535_v8  ;;  %v1539_v10 = vld [vmem:[%s6619_s12 + $0x50] sm:$0x1]  ;;  %v1541_v11 = vld [vmem:[%s6619_s12 + $0x58] sm:$0x1] }
 0x126   :  { %1538 = vst [vmem:[#allocation2 + $0xcc] sm:$0x1] %v1537_v9  ;;  %1540 = vst [vmem:[#allocation2 + $0xd4] sm:$0x1] %v1539_v10  ;;  %v1543_v12 = vld [vmem:[%s6619_s12 + $0x60] sm:$0x1] }
 0x127   :  { %1542 = vst [vmem:[#allocation2 + $0xdc] sm:$0x1] %v1541_v11  ;;  %v1545_v13 = vld [vmem:[%s6619_s12 + $0x68] sm:$0x1]  ;;  %v1547_v14 = vld [vmem:[%s6619_s12 + $0x70] sm:$0x1] }
 0x128   :  { %1544 = vst [vmem:[#allocation2 + $0xe4] sm:$0x1] %v1543_v12  ;;  %1546 = vst [vmem:[#allocation2 + $0xec] sm:$0x1] %v1545_v13  ;;  %v1549_v15 = vld [vmem:[%s6619_s12 + $0x78] sm:$0x1] }
 0x129   :  { %1548 = vst [vmem:[#allocation2 + $0xf4] sm:$0x1] %v1547_v14  ;;  %1550 = vst [vmem:[#allocation2 + $0xfc] sm:$0x1] %v1549_v15 }
 0x12a   :  { %1614 = vsyncadd [#allocation4 + $0xc], 256  ;;  %s5844_s13 = sld [smem:[#allocation7 + $0x85]] }
 0x130   :  { %s1616_s14 = sshrl.u32 %s5844_s13, 3  ;;  %s1617_s15 = sand.u32 7, %s5844_s13  }
 0x131   :  { %s5845_s16 = sshll.u32 %s1616_s14, 7 }
 0x132   :  { %s1619_s17 = sadd.s32 %s5845_s16, %s1617_s15 }
 0x133   :  { %s6640_s20 = scalar_lea.vmem %s7643_s5, %s1619_s17 }
 0x134   :  { %v1641_v16 = vld [vmem:[%s6640_s20] sm:$0x1]  ;;  %v1643_v17 = vld [vmem:[%s6640_s20 + $0x8] sm:$0x1]  ;;  %v1645_v18 = vld [vmem:[%s6640_s20 + $0x10] sm:$0x1] }
 0x135   :  { %1642 = vst [vmem:[#allocation2 + $0x85] sm:$0x1] %v1641_v16  ;;  %1644 = vst [vmem:[#allocation2 + $0x8d] sm:$0x1] %v1643_v17  ;;  %v1647_v19 = vld [vmem:[%s6640_s20 + $0x18] sm:$0x1] }
 0x136   :  { %1646 = vst [vmem:[#allocation2 + $0x95] sm:$0x1] %v1645_v18  ;;  %v1649_v20 = vld [vmem:[%s6640_s20 + $0x20] sm:$0x1]  ;;  %v1651_v21 = vld [vmem:[%s6640_s20 + $0x28] sm:$0x1] }
 0x137   :  { %1648 = vst [vmem:[#allocation2 + $0x9d] sm:$0x1] %v1647_v19  ;;  %1650 = vst [vmem:[#allocation2 + $0xa5] sm:$0x1] %v1649_v20  ;;  %v1653_v22 = vld [vmem:[%s6640_s20 + $0x30] sm:$0x1] }
 0x138   :  { %1652 = vst [vmem:[#allocation2 + $0xad] sm:$0x1] %v1651_v21  ;;  %v1655_v23 = vld [vmem:[%s6640_s20 + $0x38] sm:$0x1]  ;;  %v1657_v24 = vld [vmem:[%s6640_s20 + $0x40] sm:$0x1] }
 0x139   :  { %1654 = vst [vmem:[#allocation2 + $0xb5] sm:$0x1] %v1653_v22  ;;  %1656 = vst [vmem:[#allocation2 + $0xbd] sm:$0x1] %v1655_v23  ;;  %v1659_v25 = vld [vmem:[%s6640_s20 + $0x48] sm:$0x1] }
 0x13a   :  { %1658 = vst [vmem:[#allocation2 + $0xc5] sm:$0x1] %v1657_v24  ;;  %v1661_v26 = vld [vmem:[%s6640_s20 + $0x50] sm:$0x1]  ;;  %v1663_v27 = vld [vmem:[%s6640_s20 + $0x58] sm:$0x1] }
 0x13b   :  { %1660 = vst [vmem:[#allocation2 + $0xcd] sm:$0x1] %v1659_v25  ;;  %1662 = vst [vmem:[#allocation2 + $0xd5] sm:$0x1] %v1661_v26  ;;  %v1665_v28 = vld [vmem:[%s6640_s20 + $0x60] sm:$0x1] }
 0x13c   :  { %1664 = vst [vmem:[#allocation2 + $0xdd] sm:$0x1] %v1663_v27  ;;  %v1667_v29 = vld [vmem:[%s6640_s20 + $0x68] sm:$0x1]  ;;  %v1669_v30 = vld [vmem:[%s6640_s20 + $0x70] sm:$0x1] }
 0x13d   :  { %1666 = vst [vmem:[#allocation2 + $0xe5] sm:$0x1] %v1665_v28  ;;  %1668 = vst [vmem:[#allocation2 + $0xed] sm:$0x1] %v1667_v29  ;;  %v1671_v31 = vld [vmem:[%s6640_s20 + $0x78] sm:$0x1] }
 0x13e   :  { %1670 = vst [vmem:[#allocation2 + $0xf5] sm:$0x1] %v1669_v30  ;;  %1672 = vst [vmem:[#allocation2 + $0xfd] sm:$0x1] %v1671_v31 }
 0x13f   :  { %1736 = vsyncadd [#allocation4 + $0xd], 256  ;;  %s5846_s21 = sld [smem:[#allocation7 + $0x86]] }
 0x145   :  { %s1738_s22 = sshrl.u32 %s5846_s21, 3  ;;  %s1739_s23 = sand.u32 7, %s5846_s21  }
 0x146   :  { %s5847_s24 = sshll.u32 %s1738_s22, 7 }
 0x147   :  { %s1741_s25 = sadd.s32 %s5847_s24, %s1739_s23 }
 0x148   :  { %s6661_s28 = scalar_lea.vmem %s7643_s5, %s1741_s25 }
 0x149   :  { %v1763_v32 = vld [vmem:[%s6661_s28] sm:$0x1]  ;;  %v1765_v33 = vld [vmem:[%s6661_s28 + $0x8] sm:$0x1]  ;;  %v1767_v34 = vld [vmem:[%s6661_s28 + $0x10] sm:$0x1] }
 0x14a   :  { %1764 = vst [vmem:[#allocation2 + $0x86] sm:$0x1] %v1763_v32  ;;  %1766 = vst [vmem:[#allocation2 + $0x8e] sm:$0x1] %v1765_v33  ;;  %v1769_v35 = vld [vmem:[%s6661_s28 + $0x18] sm:$0x1] }
 0x14b   :  { %1768 = vst [vmem:[#allocation2 + $0x96] sm:$0x1] %v1767_v34  ;;  %v1771_v36 = vld [vmem:[%s6661_s28 + $0x20] sm:$0x1]  ;;  %v1773_v37 = vld [vmem:[%s6661_s28 + $0x28] sm:$0x1] }
 0x14c   :  { %1770 = vst [vmem:[#allocation2 + $0x9e] sm:$0x1] %v1769_v35  ;;  %1772 = vst [vmem:[#allocation2 + $0xa6] sm:$0x1] %v1771_v36  ;;  %v1775_v38 = vld [vmem:[%s6661_s28 + $0x30] sm:$0x1] }
 0x14d   :  { %1774 = vst [vmem:[#allocation2 + $0xae] sm:$0x1] %v1773_v37  ;;  %v1777_v39 = vld [vmem:[%s6661_s28 + $0x38] sm:$0x1]  ;;  %v1779_v40 = vld [vmem:[%s6661_s28 + $0x40] sm:$0x1] }
 0x14e   :  { %1776 = vst [vmem:[#allocation2 + $0xb6] sm:$0x1] %v1775_v38  ;;  %1778 = vst [vmem:[#allocation2 + $0xbe] sm:$0x1] %v1777_v39  ;;  %v1781_v41 = vld [vmem:[%s6661_s28 + $0x48] sm:$0x1] }
 0x14f   :  { %1780 = vst [vmem:[#allocation2 + $0xc6] sm:$0x1] %v1779_v40  ;;  %v1783_v42 = vld [vmem:[%s6661_s28 + $0x50] sm:$0x1]  ;;  %v1785_v43 = vld [vmem:[%s6661_s28 + $0x58] sm:$0x1] }
 0x150   :  { %1782 = vst [vmem:[#allocation2 + $0xce] sm:$0x1] %v1781_v41  ;;  %1784 = vst [vmem:[#allocation2 + $0xd6] sm:$0x1] %v1783_v42  ;;  %v1787_v44 = vld [vmem:[%s6661_s28 + $0x60] sm:$0x1] }
 0x151   :  { %1786 = vst [vmem:[#allocation2 + $0xde] sm:$0x1] %v1785_v43  ;;  %v1789_v45 = vld [vmem:[%s6661_s28 + $0x68] sm:$0x1]  ;;  %v1791_v46 = vld [vmem:[%s6661_s28 + $0x70] sm:$0x1] }
 0x152   :  { %1788 = vst [vmem:[#allocation2 + $0xe6] sm:$0x1] %v1787_v44  ;;  %1790 = vst [vmem:[#allocation2 + $0xee] sm:$0x1] %v1789_v45  ;;  %v1793_v47 = vld [vmem:[%s6661_s28 + $0x78] sm:$0x1] }
 0x153   :  { %1792 = vst [vmem:[#allocation2 + $0xf6] sm:$0x1] %v1791_v46  ;;  %1794 = vst [vmem:[#allocation2 + $0xfe] sm:$0x1] %v1793_v47 }
 0x154   :  { %1858 = vsyncadd [#allocation4 + $0xe], 256  ;;  %s5848_s29 = sld [smem:[#allocation7 + $0x87]] }
 0x15a   :  { %s1860_s30 = sshrl.u32 %s5848_s29, 3  ;;  %s1861_s8 = sand.u32 7, %s5848_s29  }
 0x15b   :  { %s5849_s9 = sshll.u32 %s1860_s30, 7 }
 0x15c   :  { %s1863_s0 = sadd.s32 %s5849_s9, %s1861_s8 }
 0x15d   :  { %s6682_s11 = scalar_lea.vmem %s7643_s5, %s1863_s0 }
 0x15e   :  { %v1885_v48 = vld [vmem:[%s6682_s11] sm:$0x1]  ;;  %v1887_v49 = vld [vmem:[%s6682_s11 + $0x8] sm:$0x1]  ;;  %v1889_v50 = vld [vmem:[%s6682_s11 + $0x10] sm:$0x1] }
 0x15f   :  { %1886 = vst [vmem:[#allocation2 + $0x87] sm:$0x1] %v1885_v48  ;;  %1888 = vst [vmem:[#allocation2 + $0x8f] sm:$0x1] %v1887_v49  ;;  %v1891_v51 = vld [vmem:[%s6682_s11 + $0x18] sm:$0x1] }
 0x160   :  { %1890 = vst [vmem:[#allocation2 + $0x97] sm:$0x1] %v1889_v50  ;;  %v1893_v52 = vld [vmem:[%s6682_s11 + $0x20] sm:$0x1]  ;;  %v1895_v53 = vld [vmem:[%s6682_s11 + $0x28] sm:$0x1] }
 0x161   :  { %1892 = vst [vmem:[#allocation2 + $0x9f] sm:$0x1] %v1891_v51  ;;  %1894 = vst [vmem:[#allocation2 + $0xa7] sm:$0x1] %v1893_v52  ;;  %v1897_v54 = vld [vmem:[%s6682_s11 + $0x30] sm:$0x1] }
 0x162   :  { %1896 = vst [vmem:[#allocation2 + $0xaf] sm:$0x1] %v1895_v53  ;;  %v1899_v55 = vld [vmem:[%s6682_s11 + $0x38] sm:$0x1]  ;;  %v1901_v56 = vld [vmem:[%s6682_s11 + $0x40] sm:$0x1] }
 0x163   :  { %1898 = vst [vmem:[#allocation2 + $0xb7] sm:$0x1] %v1897_v54  ;;  %1900 = vst [vmem:[#allocation2 + $0xbf] sm:$0x1] %v1899_v55  ;;  %v1903_v57 = vld [vmem:[%s6682_s11 + $0x48] sm:$0x1] }
 0x164   :  { %1902 = vst [vmem:[#allocation2 + $0xc7] sm:$0x1] %v1901_v56  ;;  %v1905_v58 = vld [vmem:[%s6682_s11 + $0x50] sm:$0x1]  ;;  %v1907_v59 = vld [vmem:[%s6682_s11 + $0x58] sm:$0x1] }
 0x165   :  { %1904 = vst [vmem:[#allocation2 + $0xcf] sm:$0x1] %v1903_v57  ;;  %1906 = vst [vmem:[#allocation2 + $0xd7] sm:$0x1] %v1905_v58  ;;  %v1909_v60 = vld [vmem:[%s6682_s11 + $0x60] sm:$0x1] }
 0x166   :  { %1908 = vst [vmem:[#allocation2 + $0xdf] sm:$0x1] %v1907_v59  ;;  %v1911_v61 = vld [vmem:[%s6682_s11 + $0x68] sm:$0x1]  ;;  %v1913_v62 = vld [vmem:[%s6682_s11 + $0x70] sm:$0x1] }
 0x167   :  { %1910 = vst [vmem:[#allocation2 + $0xe7] sm:$0x1] %v1909_v60  ;;  %1912 = vst [vmem:[#allocation2 + $0xef] sm:$0x1] %v1911_v61  ;;  %v1915_v63 = vld [vmem:[%s6682_s11 + $0x78] sm:$0x1] }
 0x168   :  { %1914 = vst [vmem:[#allocation2 + $0xf7] sm:$0x1] %v1913_v62  ;;  %1916 = vst [vmem:[#allocation2 + $0xff] sm:$0x1] %v1915_v63 }
 0x169   :  { %1980 = vsyncadd [#allocation4 + $0xf], 256  ;;  %v6187_v0 = vld [vmem:[%s7641_s3 + $0x38] sm:$0xff]   ;;  %v6313_v1 = vmov 0.0   ;;  %v6188_v2 = vld [vmem:[%s7641_s3 + $0x30] sm:$0xff]   ;;  %vm6314_vm0 = vmmov 0  }
 0x16a   :  { %6044 = vmatprep.subr.bf16.mxu0 %v6313_v1  ;;  %6112 = vmatprep.subr.bf16.mxu1 %v6313_v1  ;;  %v6189_v3 = vld [vmem:[%s7641_s3 + $0x28] sm:$0xff]   ;;  %v6190_v4 = vld [vmem:[%s7641_s3 + $0x20] sm:$0xff]   ;;  %v6191_v5 = vld [vmem:[%s7641_s3 + $0x18] sm:$0xff]   ;;  %vm2307_vm1 = vcmask 523264   ;;  %vm2355_vm2 = vcmask 519168   ;;  %vm2682_vm3 = vcmask 1040384  }
 0x16b   :  { %6045 = vmatpush3.bf16.msra.mxu0 %v6187_v0  ;;  %6113 = vmatpush3.bf16.msra.mxu1 %v6187_v0  ;;  %v6192_v6 = vld [vmem:[%s7641_s3 + $0x10] sm:$0xff]   ;;  %v6193_v7 = vld [vmem:[%s7641_s3 + $0x8] sm:$0xff]   ;;  %v6194_v8 = vld [vmem:[%s7641_s3] sm:$0xff]   ;;  %vm3416_vm4 = vcmask 1041408  }
 0x16c   :  { %6046 = vmatprep.subr.bf16.mxu0 %v6313_v1  ;;  %6114 = vmatprep.subr.bf16.mxu1 %v6313_v1  ;;  %v6195_v9 = vld [vmem:[%s7640_s2] sm:$0xff]   ;;  %v6197_v11 = vld [vmem:[%s7640_s2 + $0x8] sm:$0xff]   ;;  %v6199_v13 = vld [vmem:[%s7640_s2 + $0x10] sm:$0xff]  }
 0x16d   :  { %6060 = vmatprep.mubr.msk.bf16.mxu0 %vm6314_vm0, %v6313_v1  ;;  %6128 = vmatprep.mubr.msk.bf16.mxu1 %vm6314_vm0, %v6313_v1  ;;  %v6196_v10 = vld [vmem:[%s7640_s2 + $0x64] sm:$0xff]   ;;  %v6198_v12 = vld [vmem:[%s7640_s2 + $0x6c] sm:$0xff]   ;;  %v6200_v14 = vld [vmem:[%s7640_s2 + $0x74] sm:$0xff]  }
 0x16e   :  { %v6201_v15 = vld [vmem:[%s7640_s2 + $0x18] sm:$0xff]   ;;  %v6203_v17 = vld [vmem:[%s7640_s2 + $0x20] sm:$0xff]   ;;  %v6205_v19 = vld [vmem:[%s7640_s2 + $0x28] sm:$0xff]  }
 0x16f   :  { %6047 = vmatpush3.bf16.msra.mxu0 %v6188_v2  ;;  %6115 = vmatpush3.bf16.msra.mxu1 %v6188_v2  ;;  %v6202_v16 = vld [vmem:[%s7640_s2 + $0x7c] sm:$0xff]   ;;  %v6204_v18 = vld [vmem:[%s7640_s2 + $0x84] sm:$0xff]   ;;  %v6206_v20 = vld [vmem:[%s7640_s2 + $0x8c] sm:$0xff]  }
 0x170   :  { %6048 = vmatprep.subr.bf16.mxu0 %v6313_v1  ;;  %6116 = vmatprep.subr.bf16.mxu1 %v6313_v1  ;;  %v6207_v21 = vld [vmem:[%s7640_s2 + $0x30] sm:$0xff]   ;;  %v6209_v23 = vld [vmem:[%s7640_s2 + $0x38] sm:$0xff]   ;;  %v6211_v25 = vld [vmem:[%s7640_s2 + $0x40] sm:$0xff]  }
 0x171   :  { %v6208_v22 = vld [vmem:[%s7640_s2 + $0x94] sm:$0xff]   ;;  %v6210_v24 = vld [vmem:[%s7640_s2 + $0x9c] sm:$0xff]   ;;  %v6212_v26 = vld [vmem:[%s7640_s2 + $0xa4] sm:$0xff]  }
 0x172   :  { %v6213_v27 = vld [vmem:[%s7640_s2 + $0x48] sm:$0xff]   ;;  %v6215_v29 = vld [vmem:[%s7640_s2 + $0x50] sm:$0xff]   ;;  %v2733_v31 = vld [vmem:[%s7642_s4 + $0x180] sm:$0xff] }
 0x173   :  { %6049 = vmatpush3.bf16.msra.mxu0 %v6189_v3  ;;  %6117 = vmatpush3.bf16.msra.mxu1 %v6189_v3  ;;  %v6214_v28 = vld [vmem:[%s7640_s2 + $0xac] sm:$0xff]   ;;  %v6216_v30 = vld [vmem:[%s7640_s2 + $0xb4] sm:$0xff]   ;;  %v2741_v32 = vld [vmem:[%s7642_s4 + $0x1c0] sm:$0xff] }
 0x174   :  { %6050 = vmatprep.subr.bf16.mxu0 %v6313_v1  ;;  %6118 = vmatprep.subr.bf16.mxu1 %v6313_v1  ;;  %v5957_v33 = vcombine.low %v2733_v31, %v2741_v32  ;;  %v5958_v34 = vcombine.high %v2733_v31, %v2741_v32  ;;  %v6217_v35 = vld [vmem:[%s7640_s2 + $0x58] sm:$0xff]   ;;  %v2734_v37 = vld [vmem:[%s7642_s4 + $0x188] sm:$0xff]  ;;  %v6219_v41 = vld [vmem:[%s7640_s2 + $0x60] ss:$0 sps:$4 sm:$0x33]  }
 0x175   :  { %v6218_v36 = vld [vmem:[%s7640_s2 + $0xbc] sm:$0xff]   ;;  %v2742_v38 = vld [vmem:[%s7642_s4 + $0x1c8] sm:$0xff]  ;;  %v6220_v42 = vld [vmem:[%s7640_s2 + $0xc4] ss:$0 sps:$4 sm:$0x33]  }
 0x176   :  { %v5960_v39 = vcombine.high %v2734_v37, %v2742_v38  ;;  %v5959_v40 = vcombine.low %v2734_v37, %v2742_v38  ;;  %v2717_v43 = vld [vmem:[%s7642_s4 + $0x100] sm:$0xff]  ;;  %v2718_v47 = vld [vmem:[%s7642_s4 + $0x108] sm:$0xff]  ;;  %v6921_v3 = vld [vmem:[%s7642_s4 + $0x190] sm:$0xff] }
 0x177   :  { %6051 = vmatpush3.bf16.msra.mxu0 %v6190_v4  ;;  %6119 = vmatpush3.bf16.msra.mxu1 %v6190_v4  ;;  %v2725_v44 = vld [vmem:[%s7642_s4 + $0x140] sm:$0xff]  ;;  %v2726_v48 = vld [vmem:[%s7642_s4 + $0x148] sm:$0xff]  ;;  %v6926_v4 = vld [vmem:[%s7642_s4 + $0x1d0] sm:$0xff] }
 0x178   :  { %6052 = vmatprep.subr.bf16.mxu0 %v6313_v1  ;;  %6120 = vmatprep.subr.bf16.mxu1 %v6313_v1  ;;  %v5941_v45 = vcombine.low %v2717_v43, %v2725_v44  ;;  %v5942_v46 = vcombine.high %v2717_v43, %v2725_v44  ;;  %v5943_v49 = vcombine.low %v2718_v47, %v2726_v48  ;;  %v2701_v51 = vld [vmem:[%s7642_s4 + $0x80] sm:$0xff]  ;;  %v2702_v55 = vld [vmem:[%s7642_s4 + $0x88] sm:$0xff] }
 0x179   :  { %v5944_v50 = vcombine.high %v2718_v47, %v2726_v48  ;;  %v2709_v52 = vld [vmem:[%s7642_s4 + $0xc0] sm:$0xff]  ;;  %v2710_v56 = vld [vmem:[%s7642_s4 + $0xc8] sm:$0xff] }
 0x17a   :  { %v5925_v53 = vcombine.low %v2701_v51, %v2709_v52  ;;  %v5926_v54 = vcombine.high %v2701_v51, %v2709_v52  ;;  %v5927_v57 = vcombine.low %v2702_v55, %v2710_v56  ;;  %v5928_v58 = vcombine.high %v2702_v55, %v2710_v56  ;;  %v2685_v59 = vld [vmem:[%s7642_s4] sm:$0xff]  ;;  %v2686_v63 = vld [vmem:[%s7642_s4 + $0x8] sm:$0xff] }
 0x17b   :  { %6053 = vmatpush3.bf16.msra.mxu0 %v6191_v5  ;;  %6121 = vmatpush3.bf16.msra.mxu1 %v6191_v5  ;;  %v2693_v60 = vld [vmem:[%s7642_s4 + $0x40] sm:$0xff]  ;;  %v2694_v0 = vld [vmem:[%s7642_s4 + $0x48] sm:$0xff]  ;;  %v6931_v5 = vld [vmem:[%s7642_s4 + $0x198] sm:$0xff] }
 0x17c   :  { %6054 = vmatprep.subr.bf16.mxu0 %v6313_v1  ;;  %6122 = vmatprep.subr.bf16.mxu1 %v6313_v1  ;;  %v5909_v61 = vcombine.low %v2685_v59, %v2693_v60  ;;  %v5910_v62 = vcombine.high %v2685_v59, %v2693_v60  ;;  %v5912_v2 = vcombine.high %v2686_v63, %v2694_v0 }
 0x17f   :  { %6055 = vmatpush3.bf16.msra.mxu0 %v6192_v6  ;;  %6123 = vmatpush3.bf16.msra.mxu1 %v6192_v6  ;;  %v5962_v6 = vcombine.high %v6921_v3, %v6926_v4 }
 0x180   :  { %6056 = vmatprep.subr.bf16.mxu0 %v6313_v1  ;;  %6124 = vmatprep.subr.bf16.mxu1 %v6313_v1 }
 0x183   :  { %6057 = vmatpush3.bf16.msra.mxu0 %v6193_v7  ;;  %6125 = vmatpush3.bf16.msra.mxu1 %v6193_v7  ;;  %v6938_v7 = vld [vmem:[%s7642_s4 + $0x1d8] sm:$0xff] }
 0x184   :  { %6058 = vmatprep.subr.bf16.mxu0 %v6313_v1  ;;  %6126 = vmatprep.subr.bf16.mxu1 %v6313_v1 }
 0x187   :  { %6059 = vmatpush3.bf16.msra.mxu0 %v6194_v8  ;;  %6127 = vmatpush3.bf16.msra.mxu1 %v6194_v8  ;;  %v5961_v8 = vcombine.low %v6921_v3, %v6926_v4  ;;  %v2688_v3 = vld [vmem:[%s7642_s4 + $0x18] sm:$0xff] }
 0x188   :  { %3080 = vmatprep.subr.bf16.mxu0 %v5958_v34  ;;  %3121 = vmatprep.subr.bf16.mxu1 %v5960_v39  ;;  %v2696_v4 = vld [vmem:[%s7642_s4 + $0x58] sm:$0xff] }
 0x18a   :  { %6061 = vmatmul.mubr.bf16.vlgmr.msra.gmra.mxu0 %v6195_v9  ;;  %6129 = vmatmul.mubr.bf16.vlgmr.msra.gmra.mxu1 %v6196_v10  ;;  %v5963_v9 = vcombine.low %v6931_v5, %v6938_v7  ;;  %v5964_v10 = vcombine.high %v6931_v5, %v6938_v7 }
 0x18b   :  { %6064 = vmatprep.mubr.msk.bf16.mxu0 %vm6314_vm0, %v6313_v1  ;;  %6132 = vmatprep.mubr.msk.bf16.mxu1 %vm6314_vm0, %v6313_v1 }
 0x18c   :  { %3081 = vmatpush1.bf16.msra.mxu0 %v5957_v33  ;;  %3122 = vmatpush1.bf16.msra.mxu1 %v5959_v40 }
 0x18d   :  { %3082 = vmatprep.subr.bf16.mxu0 %v5942_v46  ;;  %3123 = vmatprep.subr.bf16.mxu1 %v5944_v50 }
 0x190   :  { %3083 = vmatpush1.bf16.msra.mxu0 %v5941_v45  ;;  %3124 = vmatpush1.bf16.msra.mxu1 %v5943_v49 }
 0x191   :  { %3084 = vmatprep.subr.bf16.mxu0 %v5926_v54  ;;  %3125 = vmatprep.subr.bf16.mxu1 %v5928_v58 }
 0x192   :  { %6065 = vmatmul.mubr.bf16.gmra.mxu0 %v6197_v11  ;;  %6133 = vmatmul.mubr.bf16.gmra.mxu1 %v6198_v12  ;;  %v6315_v11 = vmov 0  }
 0x193   :  { %6068 = vmatprep.mubr.msk.bf16.mxu0 %vm6314_vm0, %v6313_v1  ;;  %6136 = vmatprep.mubr.msk.bf16.mxu1 %vm6314_vm0, %v6313_v1 }
 0x194   :  { %3085 = vmatpush1.bf16.msra.mxu0 %v5925_v53  ;;  %3126 = vmatpush1.bf16.msra.mxu1 %v5927_v57 }
 0x195   :  { %3086 = vmatprep.subr.bf16.mxu0 %v5910_v62  ;;  %3127 = vmatprep.subr.bf16.mxu1 %v5912_v2 }
 0x198   :  { %3087 = vmatpush1.bf16.msra.mxu0 %v5909_v61 }
 0x199   :  { %3162 = vmatprep.subr.bf16.mxu0 %v5962_v6 }
 0x19a   :  { %6069 = vmatmul.mubr.bf16.gmra.mxu0 %v6199_v13  ;;  %6137 = vmatmul.mubr.bf16.gmra.mxu1 %v6200_v14 }
 0x19b   :  { %6072 = vmatprep.mubr.msk.bf16.mxu0 %vm6314_vm0, %v6313_v1  ;;  %6140 = vmatprep.mubr.msk.bf16.mxu1 %vm6314_vm0, %v6313_v1 }
 0x1a2   :  { %6073 = vmatmul.mubr.bf16.gmra.mxu0 %v6201_v15  ;;  %6141 = vmatmul.mubr.bf16.gmra.mxu1 %v6202_v16 }
 0x1a3   :  { %6076 = vmatprep.mubr.msk.bf16.mxu0 %vm6314_vm0, %v6313_v1  ;;  %6144 = vmatprep.mubr.msk.bf16.mxu1 %vm6314_vm0, %v6313_v1 }
 0x1aa   :  { %6077 = vmatmul.mubr.bf16.gmra.mxu0 %v6203_v17  ;;  %6145 = vmatmul.mubr.bf16.gmra.mxu1 %v6204_v18 }
 0x1ab   :  { %6080 = vmatprep.mubr.msk.bf16.mxu0 %vm6314_vm0, %v6313_v1  ;;  %6148 = vmatprep.mubr.msk.bf16.mxu1 %vm6314_vm0, %v6313_v1 }
 0x1b2   :  { %6081 = vmatmul.mubr.bf16.gmra.mxu0 %v6205_v19  ;;  %6149 = vmatmul.mubr.bf16.gmra.mxu1 %v6206_v20 }
 0x1b3   :  { %6084 = vmatprep.mubr.msk.bf16.mxu0 %vm6314_vm0, %v6313_v1  ;;  %6152 = vmatprep.mubr.msk.bf16.mxu1 %vm6314_vm0, %v6313_v1 }
 0x1ba   :  { %6085 = vmatmul.mubr.bf16.gmra.mxu0 %v6207_v21  ;;  %6153 = vmatmul.mubr.bf16.gmra.mxu1 %v6208_v22 }
 0x1bb   :  { %6088 = vmatprep.mubr.msk.bf16.mxu0 %vm6314_vm0, %v6313_v1  ;;  %6156 = vmatprep.mubr.msk.bf16.mxu1 %vm6314_vm0, %v6313_v1 }
 0x1c2   :  { %6089 = vmatmul.mubr.bf16.gmra.mxu0 %v6209_v23  ;;  %6157 = vmatmul.mubr.bf16.gmra.mxu1 %v6210_v24 }
 0x1c3   :  { %6092 = vmatprep.mubr.msk.bf16.mxu0 %vm6314_vm0, %v6313_v1  ;;  %6160 = vmatprep.mubr.msk.bf16.mxu1 %vm6314_vm0, %v6313_v1 }
 0x1ca   :  { %6093 = vmatmul.mubr.bf16.gmra.mxu0 %v6211_v25  ;;  %6161 = vmatmul.mubr.bf16.gmra.mxu1 %v6212_v26 }
 0x1cb   :  { %6096 = vmatprep.mubr.msk.bf16.mxu0 %vm6314_vm0, %v6313_v1  ;;  %6164 = vmatprep.mubr.msk.bf16.mxu1 %vm6314_vm0, %v6313_v1 }
 0x1d2   :  { %6097 = vmatmul.mubr.bf16.gmra.mxu0 %v6213_v27  ;;  %6165 = vmatmul.mubr.bf16.gmra.mxu1 %v6214_v28 }
 0x1d3   :  { %6100 = vmatprep.mubr.msk.bf16.mxu0 %vm6314_vm0, %v6313_v1  ;;  %6168 = vmatprep.mubr.msk.bf16.mxu1 %vm6314_vm0, %v6313_v1 }
 0x1da   :  { %6101 = vmatmul.mubr.bf16.gmra.mxu0 %v6215_v29  ;;  %6169 = vmatmul.mubr.bf16.gmra.mxu1 %v6216_v30 }
 0x1db   :  { %6104 = vmatprep.mubr.msk.bf16.mxu0 %vm6314_vm0, %v6313_v1  ;;  %6172 = vmatprep.mubr.msk.bf16.mxu1 %vm6314_vm0, %v6313_v1 }
 0x1e2   :  { %6105 = vmatmul.mubr.bf16.gmra.mxu0 %v6217_v35  ;;  %6173 = vmatmul.mubr.bf16.gmra.mxu1 %v6218_v36 }
 0x1e3   :  { %6108 = vmatprep.mubr.msk.bf16.mxu0 %vm6314_vm0, %v6313_v1  ;;  %6176 = vmatprep.mubr.msk.bf16.mxu1 %vm6314_vm0, %v6313_v1  ;;  %v5911_v1 = vcombine.low %v2686_v63, %v2694_v0 }
 0x1e5   :  { %3128 = vmatpush1.bf16.msra.mxu1 %v5911_v1 }
 0x1e6   :  { %3203 = vmatprep.subr.bf16.mxu1 %v5964_v10 }
 0x1ea   :  { %6109 = vmatmul.mubr.bf16.gmra.mxu0 %v6219_v41  ;;  %6177 = vmatmul.mubr.bf16.gmra.mxu1 %v6220_v42 }
 0x1eb   :  { %3104 = vmatprep.mubr.bf16.mxu0 %v6315_v11  ;;  %3145 = vmatprep.mubr.bf16.mxu1 %v6315_v11 }
 0x24a   :  { %v6948_v12 = vpop.f32.mrf.mxu0  ;;  %v6950_v13 = vpop.f32.mrf.mxu1 }
 0x24b   :  { %v2282_v62 = vmax.f32 %v6948_v12, 0.0  ;;  %v2602_v63 = vmax.f32 %v6950_v13, 0.0 }
 0x24c   :  { %v6062_v14 = vpop.f32.mrf.mxu0  ;;  %v6130_v15 = vpop.f32.mrf.mxu1 }
 0x24d   :  { %v2308_v12 = vsel %vm2307_vm1, %v2282_v62, 0.0  ;;  %v2627_v13 = vsel %vm2307_vm1, %v2602_v63, 0.0 }
 0x24e   :  { %v2183_v16 = vpop.f32.mrf.mxu0  ;;  %v2503_v17 = vpop.f32.mrf.mxu1 }
 0x24f   :  { %v2283_v60 = vmax.f32 %v2183_v16, 0.0  ;;  %v2603_v61 = vmax.f32 %v2503_v17, 0.0 }
 0x250   :  { %v6063_v18 = vpop.f32.mrf.mxu0  ;;  %v6131_v19 = vpop.f32.mrf.mxu1 }
 0x251   :  { %v2309_v15 = vsel %vm2307_vm1, %v2283_v60, 0.0  ;;  %v2628_v18 = vsel %vm2307_vm1, %v2603_v61, 0.0 }
 0x252   :  { %v2188_v20 = vpop.f32.mrf.mxu0  ;;  %v2508_v21 = vpop.f32.mrf.mxu1 }
 0x253   :  { %v2284_v2 = vmax.f32 %v2188_v20, 0.0  ;;  %v2604_v6 = vmax.f32 %v2508_v21, 0.0 }
 0x254   :  { %v6066_v22 = vpop.f32.mrf.mxu0  ;;  %v6134_v23 = vpop.f32.mrf.mxu1 }
 0x255   :  { %v2311_v20 = vsel %vm2307_vm1, %v2284_v2, 0.0  ;;  %v2630_v21 = vsel %vm2307_vm1, %v2604_v6, 0.0 }
 0x256   :  { %v6952_v24 = vpop.f32.mrf.mxu0  ;;  %v6954_v25 = vpop.f32.mrf.mxu1 }
 0x257   :  { %v2285_v16 = vmax.f32 %v6952_v24, 0.0  ;;  %v2605_v17 = vmax.f32 %v6954_v25, 0.0  ;;  %v2629_v24 = vadd.f32 %v2628_v18, %v2627_v13 }
 0x258   :  { %v6067_v26 = vpop.f32.mrf.mxu0  ;;  %v6135_v27 = vpop.f32.mrf.mxu1 }
 0x259   :  { %v2310_v27 = vadd.f32 %v2309_v15, %v2308_v12 }
 0x25a   :  { %v6956_v28 = vpop.f32.mrf.mxu0  ;;  %v6958_v29 = vpop.f32.mrf.mxu1 }
 0x25b   :  { %v2286_v23 = vmax.f32 %v6956_v28, 0.0  ;;  %v2606_v26 = vmax.f32 %v6958_v29, 0.0 }
 0x25c   :  { %v6070_v30 = vpop.f32.mrf.mxu0  ;;  %v6138_v31 = vpop.f32.mrf.mxu1 }
 0x25d   :  { %v2313_v31 = vsel %vm2307_vm1, %v2285_v16, 0.0  ;;  %v2315_v28 = vsel %vm2307_vm1, %v2286_v23, 0.0  ;;  %v2634_v29 = vsel %vm2307_vm1, %v2606_v26, 0.0 }
 0x25e   :  { %v6960_v32 = vpop.f32.mrf.mxu0  ;;  %v6962_v33 = vpop.f32.mrf.mxu1 }
 0x260   :  { %v6071_v34 = vpop.f32.mrf.mxu0  ;;  %v6139_v35 = vpop.f32.mrf.mxu1 }
 0x261   :  { %v2632_v34 = vsel %vm2307_vm1, %v2605_v17, 0.0  ;;  %v2287_v35 = vmax.f32 %v6960_v32, 0.0 }
 0x262   :  { %v6964_v36 = vpop.f32.mrf.mxu0  ;;  %v6966_v37 = vpop.f32.mrf.mxu1 }
 0x264   :  { %v6074_v38 = vpop.f32.mrf.mxu0  ;;  %v6142_v39 = vpop.f32.mrf.mxu1 }
 0x265   :  { %v2607_v38 = vmax.f32 %v6962_v33, 0.0  ;;  %v2312_v39 = vadd.f32 %v2311_v20, %v2310_v27  ;;  %v2317_v33 = vsel %vm2307_vm1, %v2287_v35, 0.0 }
 0x266   :  { %v6968_v40 = vpop.f32.mrf.mxu0  ;;  %v6970_v41 = vpop.f32.mrf.mxu1 }
 0x267   :  { %v2609_v60 = vmax.f32 %v6970_v41, 0.0 }
 0x268   :  { %v6075_v42 = vpop.f32.mrf.mxu0  ;;  %v6143_v43 = vpop.f32.mrf.mxu1 }
 0x269   :  { %v2631_v42 = vadd.f32 %v2630_v21, %v2629_v24  ;;  %v2640_v16 = vsel %vm2307_vm1, %v2609_v60, 0.0 }
 0x26a   :  { %v6972_v44 = vpop.f32.mrf.mxu0  ;;  %v6974_v45 = vpop.f32.mrf.mxu1 }
 0x26b   :  { %v2290_v6 = vmax.f32 %v6972_v44, 0.0 }
 0x26c   :  { %v6078_v46 = vpop.f32.mrf.mxu0  ;;  %v6146_v47 = vpop.f32.mrf.mxu1 }
 0x26d   :  { %v2288_v47 = vmax.f32 %v6964_v36, 0.0  ;;  %v2323_v44 = vsel %vm2307_vm1, %v2290_v6, 0.0 }
 0x26e   :  { %v6976_v48 = vpop.f32.mrf.mxu0  ;;  %v6978_v49 = vpop.f32.mrf.mxu1 }
 0x26f   :  { %v2319_v36 = vsel %vm2307_vm1, %v2288_v47, 0.0  ;;  %v2291_v17 = vmax.f32 %v6976_v48, 0.0  ;;  %v2611_v12 = vmax.f32 %v6978_v49, 0.0 }
 0x270   :  { %v6079_v50 = vpop.f32.mrf.mxu0  ;;  %v6147_v51 = vpop.f32.mrf.mxu1 }
 0x271   :  { %v2608_v50 = vmax.f32 %v6966_v37, 0.0  ;;  %v2314_v51 = vadd.f32 %v2313_v31, %v2312_v39  ;;  %v2325_v49 = vsel %vm2307_vm1, %v2291_v17, 0.0  ;;  %v2644_v31 = vsel %vm2307_vm1, %v2611_v12, 0.0 }
 0x272   :  { %v6980_v52 = vpop.f32.mrf.mxu0  ;;  %v6982_v53 = vpop.f32.mrf.mxu1 }
 0x273   :  { %v2316_v61 = vadd.f32 %v2315_v28, %v2314_v51  ;;  %v2638_v37 = vsel %vm2307_vm1, %v2608_v50, 0.0  ;;  %v2292_v26 = vmax.f32 %v6980_v52, 0.0  ;;  %v2612_v27 = vmax.f32 %v6982_v53, 0.0 }
 0x274   :  { %v6082_v54 = vpop.f32.mrf.mxu0  ;;  %v6150_v55 = vpop.f32.mrf.mxu1 }
 0x275   :  { %v2633_v54 = vadd.f32 %v2632_v34, %v2631_v42  ;;  %v2327_v52 = vsel %vm2307_vm1, %v2292_v26, 0.0  ;;  %v2646_v53 = vsel %vm2307_vm1, %v2612_v27, 0.0 }
 0x276   :  { %v6984_v56 = vpop.f32.mrf.mxu0  ;;  %v6986_v57 = vpop.f32.mrf.mxu1 }
 0x277   :  { %v2635_v62 = vadd.f32 %v2634_v29, %v2633_v54  ;;  %v2293_v34 = vmax.f32 %v6984_v56, 0.0  ;;  %v2613_v35 = vmax.f32 %v6986_v57, 0.0 }
 0x278   :  { %v6083_v58 = vpop.f32.mrf.mxu0  ;;  %v6151_v59 = vpop.f32.mrf.mxu1 }
 0x279   :  { %v2636_v58 = vsel %vm2307_vm1, %v2607_v38, 0.0  ;;  %v2289_v59 = vmax.f32 %v6968_v40, 0.0  ;;  %v2329_v56 = vsel %vm2307_vm1, %v2293_v34, 0.0  ;;  %v2648_v57 = vsel %vm2307_vm1, %v2613_v35, 0.0 }
 0x27a   :  { %v6990_v0 = vpop.f32.mrf.mxu0  ;;  %v6992_v1 = vpop.f32.mrf.mxu1  ;;  %v2637_v15 = vadd.f32 %v2636_v58, %v2635_v62 }
 0x27b   :  { %v2321_v41 = vsel %vm2307_vm1, %v2289_v59, 0.0  ;;  %v2294_v29 = vmax.f32 %v6990_v0, 0.0  ;;  %v2614_v47 = vmax.f32 %v6992_v1, 0.0 }
 0x27c   :  { %v6086_v10 = vpop.f32.mrf.mxu0  ;;  %v6154_v14 = vpop.f32.mrf.mxu1  ;;  %v2639_v20 = vadd.f32 %v2638_v37, %v2637_v15 }
 0x27d   :  { %v2610_v10 = vmax.f32 %v6974_v45, 0.0  ;;  %v2318_v14 = vadd.f32 %v2317_v33, %v2316_v61  ;;  %v2331_v0 = vsel %vm2307_vm1, %v2294_v29, 0.0  ;;  %v2650_v1 = vsel %vm2307_vm1, %v2614_v47, 0.0 }
 0x27e   :  { %v7000_v19 = vpop.f32.mrf.mxu0  ;;  %v7002_v22 = vpop.f32.mrf.mxu1 }
 0x27f   :  { %v2320_v13 = vadd.f32 %v2319_v36, %v2318_v14  ;;  %v2642_v45 = vsel %vm2307_vm1, %v2610_v10, 0.0  ;;  %v2615_v33 = vmax.f32 %v7002_v22, 0.0 }
 0x280   :  { %v6087_v30 = vpop.f32.mrf.mxu0  ;;  %v6155_v25 = vpop.f32.mrf.mxu1 }
 0x281   :  { %v2322_v24 = vadd.f32 %v2321_v41, %v2320_v13  ;;  %v2641_v30 = vadd.f32 %v2640_v16, %v2639_v20  ;;  %v2652_v22 = vsel %vm2307_vm1, %v2615_v33, 0.0 }
 0x282   :  { %v7012_v43 = vpop.f32.mrf.mxu0  ;;  %v7014_v46 = vpop.f32.mrf.mxu1 }
 0x283   :  { %v2324_v38 = vadd.f32 %v2323_v44, %v2322_v24  ;;  %v2643_v39 = vadd.f32 %v2642_v45, %v2641_v30  ;;  %v2296_v62 = vmax.f32 %v7012_v43, 0.0  ;;  %v2616_v36 = vmax.f32 %v7014_v46, 0.0 }
 0x284   :  { %v6090_v55 = vpop.f32.mrf.mxu0  ;;  %v6158_v32 = vpop.f32.mrf.mxu1 }
 0x285   :  { %v2326_v50 = vadd.f32 %v2325_v49, %v2324_v38  ;;  %v2645_v51 = vadd.f32 %v2644_v31, %v2643_v39  ;;  %v2295_v32 = vmax.f32 %v7000_v19, 0.0  ;;  %v2335_v43 = vsel %vm2307_vm1, %v2296_v62, 0.0 }
 0x286   :  { %v7024_v63 = vpop.f32.mrf.mxu0  ;;  %v7026_v2 = vpop.f32.mrf.mxu1  ;;  %v2654_v46 = vsel %vm2307_vm1, %v2616_v36, 0.0 }
 0x287   :  { %v2328_v58 = vadd.f32 %v2327_v52, %v2326_v50  ;;  %v2647_v59 = vadd.f32 %v2646_v53, %v2645_v51  ;;  %v2333_v19 = vsel %vm2307_vm1, %v2295_v32, 0.0  ;;  %v2297_v15 = vmax.f32 %v7024_v63, 0.0 }
 0x288   :  { %v6091_v18 = vpop.f32.mrf.mxu0  ;;  %v6159_v40 = vpop.f32.mrf.mxu1 }
 0x289   :  { %v2330_v37 = vadd.f32 %v2329_v56, %v2328_v58  ;;  %v2649_v6 = vadd.f32 %v2648_v57, %v2647_v59  ;;  %v2617_v18 = vmax.f32 %v7026_v2, 0.0  ;;  %v2337_v63 = vsel %vm2307_vm1, %v2297_v15, 0.0 }
 0x28a   :  { %v7036_v21 = vpop.f32.mrf.mxu0  ;;  %v7038_v23 = vpop.f32.mrf.mxu1 }
 0x28b   :  { %v2332_v40 = vadd.f32 %v2331_v0, %v2330_v37  ;;  %v2651_v41 = vadd.f32 %v2650_v1, %v2649_v6  ;;  %v2298_v12 = vmax.f32 %v7036_v21, 0.0  ;;  %v2618_v13 = vmax.f32 %v7038_v23, 0.0 }
 0x28c   :  { %v6094_v25 = vpop.f32.mrf.mxu0  ;;  %v6162_v48 = vpop.f32.mrf.mxu1  ;;  %v2656_v2 = vsel %vm2307_vm1, %v2617_v18, 0.0 }
 0x28d   :  { %v2334_v20 = vadd.f32 %v2333_v19, %v2332_v40  ;;  %v2653_v44 = vadd.f32 %v2652_v22, %v2651_v41  ;;  %v2339_v31 = vsel %vm2307_vm1, %v2298_v12, 0.0  ;;  %v2658_v21 = vsel %vm2307_vm1, %v2618_v13, 0.0 }
 0x28e   :  { %v2247_v42 = vpop.f32.mrf.mxu0  ;;  %v2567_v28 = vpop.f32.mrf.mxu1 }
 0x28f   :  { %v2299_v27 = vmax.f32 %v2247_v42, 0.0  ;;  %v2619_v24 = vmax.f32 %v2567_v28, 0.0  ;;  %v2336_v30 = vadd.f32 %v2335_v43, %v2334_v20  ;;  %v2655_v25 = vadd.f32 %v2654_v46, %v2653_v44 }
 0x290   :  { %v6095_v54 = vpop.f32.mrf.mxu0  ;;  %v6163_v55 = vpop.f32.mrf.mxu1 }
 0x291   :  { %v2338_v35 = vadd.f32 %v2337_v63, %v2336_v30  ;;  %v2657_v38 = vadd.f32 %v2656_v2, %v2655_v25  ;;  %v2341_v53 = vsel %vm2307_vm1, %v2299_v27, 0.0  ;;  %v2660_v29 = vsel %vm2307_vm1, %v2619_v24, 0.0 }
 0x292   :  { %v2252_v60 = vpop.f32.mrf.mxu0  ;;  %v2572_v61 = vpop.f32.mrf.mxu1 }
 0x293   :  { %v2300_v34 = vmax.f32 %v2252_v60, 0.0  ;;  %v2620_v23 = vmax.f32 %v2572_v61, 0.0  ;;  %v2340_v47 = vadd.f32 %v2339_v31, %v2338_v35  ;;  %v2659_v50 = vadd.f32 %v2658_v21, %v2657_v38 }
 0x294   :  { %v6098_v10 = vpop.f32.mrf.mxu0  ;;  %v6166_v14 = vpop.f32.mrf.mxu1 }
 0x295   :  { %v2343_v55 = vsel %vm2307_vm1, %v2300_v34, 0.0  ;;  %v2662_v56 = vsel %vm2307_vm1, %v2620_v23, 0.0  ;;  %v2342_v33 = vadd.f32 %v2341_v53, %v2340_v47  ;;  %v2661_v58 = vadd.f32 %v2660_v29, %v2659_v50 }
 0x296   :  { %v2255_v16 = vpop.f32.mrf.mxu0  ;;  %v2575_v17 = vpop.f32.mrf.mxu1 }
 0x297   :  { %v2301_v42 = vmax.f32 %v2255_v16, 0.0  ;;  %v2621_v28 = vmax.f32 %v2575_v17, 0.0  ;;  %v2344_v36 = vadd.f32 %v2343_v55, %v2342_v33  ;;  %v2663_v37 = vadd.f32 %v2662_v56, %v2661_v58 }
 0x298   :  { %v6099_v45 = vpop.f32.mrf.mxu0  ;;  %v6167_v26 = vpop.f32.mrf.mxu1 }
 0x299   :  { %v2345_v61 = vsel %vm2307_vm1, %v2301_v42, 0.0  ;;  %v2664_v0 = vsel %vm2307_vm1, %v2621_v28, 0.0 }
 0x29a   :  { %v2260_v48 = vpop.f32.mrf.mxu0  ;;  %v2580_v49 = vpop.f32.mrf.mxu1  ;;  %v2346_v18 = vadd.f32 %v2345_v61, %v2344_v36  ;;  %v2665_v40 = vadd.f32 %v2664_v0, %v2663_v37 }
 0x29b   :  { %v2302_v57 = vmax.f32 %v2260_v48, 0.0  ;;  %v2622_v32 = vmax.f32 %v2580_v49, 0.0 }
 0x29c   :  { %v6102_v39 = vpop.f32.mrf.mxu0  ;;  %v6170_v52 = vpop.f32.mrf.mxu1 }
 0x29d   :  { %v2347_v14 = vsel %vm2307_vm1, %v2302_v57, 0.0  ;;  %v2666_v19 = vsel %vm2307_vm1, %v2622_v32, 0.0 }
 0x29e   :  { %v2263_v51 = vpop.f32.mrf.mxu0  ;;  %v2583_v54 = vpop.f32.mrf.mxu1  ;;  %v2348_v46 = vadd.f32 %v2347_v14, %v2346_v18  ;;  %v2667_v12 = vadd.f32 %v2666_v19, %v2665_v40  ;;  %v2728_v14 = vld [vmem:[%s7642_s4 + $0x158] sm:$0xff]  ;;  %v2703_v40 = vld [vmem:[%s7642_s4 + $0x90] sm:$0xff] }
 0x29f   :  { %v2303_v1 = vmax.f32 %v2263_v51, 0.0  ;;  %v2623_v62 = vmax.f32 %v2583_v54, 0.0 }
 0x2a0   :  { %v6103_v59 = vpop.f32.mrf.mxu0  ;;  %v6171_v60 = vpop.f32.mrf.mxu1 }
 0x2a1   :  { %v2349_v17 = vsel %vm2307_vm1, %v2303_v1, 0.0  ;;  %v2668_v43 = vsel %vm2307_vm1, %v2623_v62, 0.0  ;;  %v2719_v62 = vld [vmem:[%s7642_s4 + $0x110] sm:$0xff] }
 0x2a2   :  { %v2268_v6 = vpop.f32.mrf.mxu0  ;;  %v2588_v10 = vpop.f32.mrf.mxu1  ;;  %v2350_v2 = vadd.f32 %v2349_v17, %v2348_v46  ;;  %v2669_v27 = vadd.f32 %v2668_v43, %v2667_v12  ;;  %v2712_v17 = vld [vmem:[%s7642_s4 + $0xd8] sm:$0xff] }
 0x2a3   :  { %v2304_v22 = vmax.f32 %v2268_v6, 0.0  ;;  %v2624_v15 = vmax.f32 %v2588_v10, 0.0  ;;  %v2727_v6 = vld [vmem:[%s7642_s4 + $0x150] sm:$0xff]  ;;  %v2720_v10 = vld [vmem:[%s7642_s4 + $0x118] sm:$0xff] }
 0x2a4   :  { %v6106_v41 = vpop.f32.mrf.mxu0  ;;  %v6174_v16 = vpop.f32.mrf.mxu1  ;;  %v5948_v18 = vcombine.high %v2720_v10, %v2728_v14  ;;  %v5945_v43 = vcombine.low %v2719_v62, %v2727_v6  ;;  %v5947_v46 = vcombine.low %v2720_v10, %v2728_v14  ;;  %v2731_v10 = vld [vmem:[%s7642_s4 + $0x170] sm:$0xff]  ;;  %v2724_v14 = vld [vmem:[%s7642_s4 + $0x138] sm:$0xff] }
 0x2a5   :  { %v2351_v44 = vsel %vm2307_vm1, %v2304_v22, 0.0  ;;  %v2670_v45 = vsel %vm2307_vm1, %v2624_v15, 0.0  ;;  %v5946_v15 = vcombine.high %v2719_v62, %v2727_v6  ;;  %v2711_v41 = vld [vmem:[%s7642_s4 + $0xd0] sm:$0xff]  ;;  %v2704_v16 = vld [vmem:[%s7642_s4 + $0x98] sm:$0xff] }
 0x2a6   :  { %v2271_v13 = vpop.f32.mrf.mxu0  ;;  %v2591_v20 = vpop.f32.mrf.mxu1  ;;  %v2352_v49 = vadd.f32 %v2351_v44, %v2350_v2  ;;  %v2671_v31 = vadd.f32 %v2670_v45, %v2669_v27  ;;  %v5930_v12 = vcombine.high %v2703_v40, %v2711_v41  ;;  %v2695_v44 = vld [vmem:[%s7642_s4 + $0x50] sm:$0xff]  ;;  %v5929_v5 = vcombine.low %v2703_v40, %v2711_v41  ;;  %v2737_v45 = vld [vmem:[%s7642_s4 + $0x1a0] sm:$0xff]  ;;  %v2746_v2 = vld [vmem:[%s7642_s4 + $0x1e8] sm:$0xff] }
 0x2a7   :  { %v2305_v26 = vmax.f32 %v2271_v13, 0.0  ;;  %v2625_v63 = vmax.f32 %v2591_v20, 0.0  ;;  %v5932_v13 = vcombine.high %v2704_v16, %v2712_v17  ;;  %v2687_v20 = vld [vmem:[%s7642_s4 + $0x10] sm:$0xff]  ;;  %v5931_v7 = vcombine.low %v2704_v16, %v2712_v17 }
 0x2a8   :  { %v6107_v24 = vpop.f32.mrf.mxu0  ;;  %v6175_v30 = vpop.f32.mrf.mxu1  ;;  %v5913_v27 = vcombine.low %v2687_v20, %v2695_v44  ;;  %v2723_v6 = vld [vmem:[%s7642_s4 + $0x130] sm:$0xff] }
 0x2a9   :  { %v2353_v25 = vsel %vm2307_vm1, %v2305_v26, 0.0  ;;  %v2672_v48 = vsel %vm2307_vm1, %v2625_v63, 0.0  ;;  %v2745_v26 = vld [vmem:[%s7642_s4 + $0x1e0] sm:$0xff]  ;;  %v2738_v63 = vld [vmem:[%s7642_s4 + $0x1a8] sm:$0xff]  ;;  %v5915_v24 = vcombine.low %v2688_v3, %v2696_v4  ;;  %v5954_v40 = vcombine.high %v2723_v6, %v2731_v10  ;;  %v2707_v16 = vld [vmem:[%s7642_s4 + $0xb0] sm:$0xff] }
 0x2aa   :  { %v2276_v21 = vpop.f32.mrf.mxu0  ;;  %v2596_v34 = vpop.f32.mrf.mxu1  ;;  %v2354_v38 = vadd.f32 %v2353_v25, %v2352_v49  ;;  %v2673_v39 = vadd.f32 %v2672_v48, %v2671_v31  ;;  %v5966_v30 = vcombine.high %v2737_v45, %v2745_v26  ;;  %v5968_v25 = vcombine.high %v2738_v63, %v2746_v2  ;;  %v2721_v48 = vld [vmem:[%s7642_s4 + $0x120] sm:$0xff]  ;;  %v2722_v31 = vld [vmem:[%s7642_s4 + $0x128] sm:$0xff]  ;;  %v2715_v17 = vld [vmem:[%s7642_s4 + $0xf0] sm:$0xff] }
 0x2ab   :  { %v2306_v23 = vmax.f32 %v2276_v21, 0.0  ;;  %v2626_v35 = vmax.f32 %v2596_v34, 0.0  ;;  %v2729_v49 = vld [vmem:[%s7642_s4 + $0x160] sm:$0xff]  ;;  %v2730_v21 = vld [vmem:[%s7642_s4 + $0x168] sm:$0xff]  ;;  %v5965_v34 = vcombine.low %v2737_v45, %v2745_v26 }
 0x2ac   :  { %v6110_v52 = vpop.f32.mrf.mxu0  ;;  %v6178_v53 = vpop.f32.mrf.mxu1 }
 0x2ad   :  { %v2356_v29 = vsel %vm2355_vm2, %v2306_v23, 0.0  ;;  %v2674_v42 = vsel %vm2355_vm2, %v2626_v35, 0.0  ;;  %v5967_v23 = vcombine.low %v2738_v63, %v2746_v2  ;;  %v5950_v35 = vcombine.high %v2721_v48, %v2729_v49  ;;  %v2713_v52 = vld [vmem:[%s7642_s4 + $0xe0] sm:$0xff]  ;;  %v2706_v53 = vld [vmem:[%s7642_s4 + $0xa8] sm:$0xff] }
 0x2ae   :  { %v2357_v28 = vadd.f32 %v2356_v29, %v2354_v38  ;;  %v2675_v47 = vadd.f32 %v2674_v42, %v2673_v39  ;;  %v2279_v50 = vpop.f32.mrf.mxu0  ;;  %v2599_v51 = vpop.f32.mrf.mxu1  ;;  %v5952_v38 = vcombine.high %v2722_v31, %v2730_v21  ;;  %v2705_v39 = vld [vmem:[%s7642_s4 + $0xa0] sm:$0xff]  ;;  %v2714_v29 = vld [vmem:[%s7642_s4 + $0xe8] sm:$0xff]  ;;  %v5949_v42 = vcombine.low %v2721_v48, %v2729_v49 }
 0x2af   :  { %v5936_v50 = vcombine.high %v2706_v53, %v2714_v29  ;;  %v2689_v51 = vld [vmem:[%s7642_s4 + $0x20] sm:$0xff] }
 0x2b0   :  { %v2358_v54 = vrot.slane %v2357_v28, 4  ;;  %v2676_v55 = vrot.slane %v2675_v47, 4  ;;  %v6111_v56 = vpop.f32.mrf.mxu0  ;;  %v6179_v57 = vpop.f32.mrf.mxu1 }
 0x2b1   :  { %v2698_v56 = vld [vmem:[%s7642_s4 + $0x68] sm:$0xff]  ;;  %v5933_v57 = vcombine.low %v2705_v39, %v2713_v52 }
 0x2b2   :  { %v2359_v32 = vadd.f32 %v2358_v54, %v2357_v28  ;;  %v2677_v33 = vadd.f32 %v2676_v55, %v2675_v47  ;;  %v5951_v28 = vcombine.low %v2722_v31, %v2730_v21  ;;  %v5934_v47 = vcombine.high %v2705_v39, %v2713_v52  ;;  %v2697_v54 = vld [vmem:[%s7642_s4 + $0x60] sm:$0xff]  ;;  %v2690_v55 = vld [vmem:[%s7642_s4 + $0x28] sm:$0xff] }
 0x2b3   :  { %v5919_v62 = vcombine.low %v2690_v55, %v2698_v56 }
 0x2b4   :  { %v2360_v58 = vrot.slane %v2359_v32, 2  ;;  %v2678_v59 = vrot.slane %v2677_v33, 2 }
 0x2b6   :  { %v2361_v60 = vadd.f32 %v2360_v58, %v2359_v32  ;;  %v2679_v61 = vadd.f32 %v2678_v59, %v2677_v33  ;;  %v5935_v32 = vcombine.low %v2706_v53, %v2714_v29  ;;  %v5918_v33 = vcombine.high %v2689_v51, %v2697_v54  ;;  %v2739_v59 = vld [vmem:[%s7642_s4 + $0x1b0] sm:$0xff] }
 0x2b7   :  { %v5920_v58 = vcombine.high %v2690_v55, %v2698_v56 }
 0x2b8   :  { %v2362_v0 = vrot.slane %v2361_v60, 1  ;;  %v2680_v1 = vrot.slane %v2679_v61, 1 }
 0x2ba   :  { %v2363_v36 = vadd.f32 %v2362_v0, %v2361_v60  ;;  %v2681_v37 = vadd.f32 %v2680_v1, %v2679_v61  ;;  %v2747_v60 = vld [vmem:[%s7642_s4 + $0x1f0] sm:$0xff]  ;;  %v2740_v61 = vld [vmem:[%s7642_s4 + $0x1b8] sm:$0xff]  ;;  %v5917_v1 = vcombine.low %v2689_v51, %v2697_v54 }
 0x2bb   :  { %v2748_v0 = vld [vmem:[%s7642_s4 + $0x1f8] sm:$0xff] }
 0x2bc   :  { %v2683_v19 = vsel %vm2682_vm3, %v2363_v36, %v2681_v37  ;;  %v5970_v36 = vcombine.high %v2739_v59, %v2747_v60  ;;  %v5972_v37 = vcombine.high %v2740_v61, %v2748_v0 }
 0x2bd   :  { %v7099_v22 = vpack.c.bf16 %v2683_v19, %v2683_v19  ;;  %v2732_v19 = vld [vmem:[%s7642_s4 + $0x178] sm:$0xff] }
 0x2be   :  { %v5956_v41 = vcombine.high %v2724_v14, %v2732_v19 }
 0x2bf   :  { %5973 = vmatmul.mubr.msk.bf16.vlgmr.msra.gmra.mxu0 %vm2307_vm1, %v7099_v22  ;;  %5974 = vmatmul.mubr.msk.bf16.vlgmr.msra.gmra.mxu1 %vm2307_vm1, %v7099_v22 }
 0x2c0   :  { %3163 = vmatpush1.bf16.msra.mxu0 %v5961_v8  ;;  %3204 = vmatpush1.bf16.msra.mxu1 %v5963_v9  ;;  %v5914_v8 = vcombine.high %v2687_v20, %v2695_v44  ;;  %v5916_v9 = vcombine.high %v2688_v3, %v2696_v4  ;;  %v5938_v20 = vcombine.high %v2707_v16, %v2715_v17  ;;  %v2691_v3 = vld [vmem:[%s7642_s4 + $0x30] sm:$0xff] }
 0x2c1   :  { %3164 = vmatprep.subr.bf16.mxu0 %v5946_v15  ;;  %3205 = vmatprep.subr.bf16.mxu1 %v5948_v18  ;;  %v5969_v15 = vcombine.low %v2739_v59, %v2747_v60  ;;  %v5971_v18 = vcombine.low %v2740_v61, %v2748_v0  ;;  %v2699_v4 = vld [vmem:[%s7642_s4 + $0x70] sm:$0xff] }
 0x2c2   :  { %3186 = vmatprep.mubr.bf16.mxu0 %v6315_v11  ;;  %3227 = vmatprep.mubr.bf16.mxu1 %v6315_v11  ;;  %v5922_v45 = vcombine.high %v2691_v3, %v2699_v4  ;;  %v5921_v63 = vcombine.low %v2691_v3, %v2699_v4 }
 0x2c4   :  { %3165 = vmatpush1.bf16.msra.mxu0 %v5945_v43  ;;  %3206 = vmatpush1.bf16.msra.mxu1 %v5947_v46  ;;  %v2708_v43 = vld [vmem:[%s7642_s4 + $0xb8] sm:$0xff] }
 0x2c5   :  { %3166 = vmatprep.subr.bf16.mxu0 %v5930_v12  ;;  %3207 = vmatprep.subr.bf16.mxu1 %v5932_v13  ;;  %v2716_v46 = vld [vmem:[%s7642_s4 + $0xf8] sm:$0xff]  ;;  %v5953_v12 = vcombine.low %v2723_v6, %v2731_v10  ;;  %v5955_v13 = vcombine.low %v2724_v14, %v2732_v19 }
 0x2c6   :  { %v5940_v44 = vcombine.high %v2708_v43, %v2716_v46 }
 0x2c8   :  { %3167 = vmatpush1.bf16.msra.mxu0 %v5929_v5  ;;  %3208 = vmatpush1.bf16.msra.mxu1 %v5931_v7  ;;  %v2692_v5 = vld [vmem:[%s7642_s4 + $0x38] sm:$0xff] }
 0x2c9   :  { %3168 = vmatprep.subr.bf16.mxu0 %v5914_v8  ;;  %3209 = vmatprep.subr.bf16.mxu1 %v5916_v9  ;;  %v2700_v7 = vld [vmem:[%s7642_s4 + $0x78] sm:$0xff]  ;;  %v5937_v8 = vcombine.low %v2707_v16, %v2715_v17  ;;  %v5939_v9 = vcombine.low %v2708_v43, %v2716_v46 }
 0x2ca   :  { %v5924_v26 = vcombine.high %v2692_v5, %v2700_v7  ;;  %v5923_v2 = vcombine.low %v2692_v5, %v2700_v7 }
 0x2cc   :  { %3169 = vmatpush1.bf16.msra.mxu0 %v5913_v27  ;;  %3210 = vmatpush1.bf16.msra.mxu1 %v5915_v24 }
 0x2cd   :  { %3244 = vmatprep.subr.bf16.mxu0 %v5966_v30  ;;  %3285 = vmatprep.subr.bf16.mxu1 %v5968_v25 }
 0x2cf   :  { %5975 = vmatmul.mubr.msk.bf16.vlgmr.msra.gmra.mxu0 %vm2307_vm1, %v7099_v22  ;;  %5976 = vmatmul.mubr.msk.bf16.vlgmr.msra.gmra.mxu1 %vm2307_vm1, %v7099_v22 }
 0x2d0   :  { %3245 = vmatpush1.bf16.msra.mxu0 %v5965_v34  ;;  %3286 = vmatpush1.bf16.msra.mxu1 %v5967_v23 }
 0x2d1   :  { %3246 = vmatprep.subr.bf16.mxu0 %v5950_v35  ;;  %3287 = vmatprep.subr.bf16.mxu1 %v5952_v38 }
 0x2d2   :  { %3268 = vmatprep.mubr.bf16.mxu0 %v6315_v11  ;;  %3309 = vmatprep.mubr.bf16.mxu1 %v6315_v11 }
 0x2d4   :  { %3247 = vmatpush1.bf16.msra.mxu0 %v5949_v42  ;;  %3288 = vmatpush1.bf16.msra.mxu1 %v5951_v28 }
 0x2d5   :  { %3248 = vmatprep.subr.bf16.mxu0 %v5934_v47  ;;  %3289 = vmatprep.subr.bf16.mxu1 %v5936_v50 }
 0x2d8   :  { %3249 = vmatpush1.bf16.msra.mxu0 %v5933_v57  ;;  %3290 = vmatpush1.bf16.msra.mxu1 %v5935_v32 }
 0x2d9   :  { %3250 = vmatprep.subr.bf16.mxu0 %v5918_v33  ;;  %3291 = vmatprep.subr.bf16.mxu1 %v5920_v58 }
 0x2dc   :  { %3251 = vmatpush1.bf16.msra.mxu0 %v5917_v1  ;;  %3292 = vmatpush1.bf16.msra.mxu1 %v5919_v62 }
 0x2dd   :  { %3326 = vmatprep.subr.bf16.mxu0 %v5970_v36  ;;  %3367 = vmatprep.subr.bf16.mxu1 %v5972_v37 }
 0x2df   :  { %5977 = vmatmul.mubr.msk.bf16.vlgmr.msra.gmra.mxu0 %vm2307_vm1, %v7099_v22  ;;  %5978 = vmatmul.mubr.msk.bf16.vlgmr.msra.gmra.mxu1 %vm2307_vm1, %v7099_v22 }
 0x2e0   :  { %3327 = vmatpush1.bf16.msra.mxu0 %v5969_v15  ;;  %3368 = vmatpush1.bf16.msra.mxu1 %v5971_v18 }
 0x2e1   :  { %3328 = vmatprep.subr.bf16.mxu0 %v5954_v40  ;;  %3369 = vmatprep.subr.bf16.mxu1 %v5956_v41 }
 0x2e2   :  { %3350 = vmatprep.mubr.bf16.mxu0 %v6315_v11  ;;  %3391 = vmatprep.mubr.bf16.mxu1 %v6315_v11 }
 0x2e4   :  { %3329 = vmatpush1.bf16.msra.mxu0 %v5953_v12  ;;  %3370 = vmatpush1.bf16.msra.mxu1 %v5955_v13 }
 0x2e5   :  { %3330 = vmatprep.subr.bf16.mxu0 %v5938_v20  ;;  %3371 = vmatprep.subr.bf16.mxu1 %v5940_v44 }
 0x2e8   :  { %3331 = vmatpush1.bf16.msra.mxu0 %v5937_v8  ;;  %3372 = vmatpush1.bf16.msra.mxu1 %v5939_v9 }
 0x2e9   :  { %3332 = vmatprep.subr.bf16.mxu0 %v5922_v45  ;;  %3373 = vmatprep.subr.bf16.mxu1 %v5924_v26 }
 0x2ec   :  { %3333 = vmatpush1.bf16.msra.mxu0 %v5921_v63  ;;  %3374 = vmatpush1.bf16.msra.mxu1 %v5923_v2 }
 0x2ef   :  { %5979 = vmatmul.mubr.msk.bf16.vlgmr.msra.gmra.mxu0 %vm2307_vm1, %v7099_v22  ;;  %5980 = vmatmul.mubr.msk.bf16.vlgmr.msra.gmra.mxu1 %vm2307_vm1, %v7099_v22 }
 0x37f   :  { %v7249_v11 = vpop.f32.mrf.mxu0  ;;  %v7251_v27 = vpop.f32.mrf.mxu1 }
 0x380   :  { %v3400_v34 = vmul.f32 %v7249_v11, %v7249_v11  ;;  %v3402_v35 = vmul.f32 %v7251_v27, %v7251_v27 }
 0x381   :  { %v7253_v24 = vpop.f32.mrf.mxu0  ;;  %v7255_v30 = vpop.f32.mrf.mxu1 }
 0x382   :  { %v3401_v21 = vmul.f32 %v7253_v24, %v7253_v24  ;;  %v3417_v23 = vsel %vm3416_vm4, %v3400_v34, 0.0  ;;  %v3420_v53 = vsel %vm3416_vm4, %v3402_v35, 0.0  ;;  %v3403_v29 = vmul.f32 %v7255_v30, %v7255_v30 }
 0x383   :  { %v3110_v25 = vpop.f32.mrf.mxu0  ;;  %v3151_v48 = vpop.f32.mrf.mxu1 }
 0x384   :  { %v3418_v22 = vsel %vm3416_vm4, %v3401_v21, 0.0  ;;  %v3422_v55 = vsel %vm3416_vm4, %v3403_v29, 0.0 }
 0x385   :  { %v3111_v49 = vpop.f32.mrf.mxu0  ;;  %v3152_v31 = vpop.f32.mrf.mxu1  ;;  %v3419_v38 = vadd.f32 %v3418_v22, %v3417_v23 }
 0x387   :  { %v3421_v28 = vadd.f32 %v3420_v53, %v3419_v38 }
 0x389   :  { %v3423_v32 = vadd.f32 %v3422_v55, %v3421_v28 }
 0x38f   :  { %v7265_v39 = vpop.f32.mrf.mxu0  ;;  %v7267_v52 = vpop.f32.mrf.mxu1 }
 0x390   :  { %v3404_v42 = vmul.f32 %v7265_v39, %v7265_v39  ;;  %v3406_v61 = vmul.f32 %v7267_v52, %v7267_v52 }
 0x391   :  { %v7274_v47 = vpop.f32.mrf.mxu0  ;;  %v7276_v50 = vpop.f32.mrf.mxu1 }
 0x392   :  { %v3424_v56 = vsel %vm3416_vm4, %v3404_v42, 0.0  ;;  %v3405_v57 = vmul.f32 %v7274_v47, %v7274_v47  ;;  %v3428_v1 = vsel %vm3416_vm4, %v3406_v61, 0.0  ;;  %v3407_v62 = vmul.f32 %v7276_v50, %v7276_v50 }
 0x393   :  { %v3192_v51 = vpop.f32.mrf.mxu0  ;;  %v3233_v54 = vpop.f32.mrf.mxu1  ;;  %v3425_v59 = vadd.f32 %v3424_v56, %v3423_v32 }
 0x394   :  { %v3426_v60 = vsel %vm3416_vm4, %v3405_v57, 0.0  ;;  %v3430_v15 = vsel %vm3416_vm4, %v3407_v62, 0.0 }
 0x395   :  { %v3193_v33 = vpop.f32.mrf.mxu0  ;;  %v3234_v58 = vpop.f32.mrf.mxu1  ;;  %v3427_v0 = vadd.f32 %v3426_v60, %v3425_v59 }
 0x397   :  { %v3429_v36 = vadd.f32 %v3428_v1, %v3427_v0 }
 0x399   :  { %v3431_v41 = vadd.f32 %v3430_v15, %v3429_v36 }
 0x39f   :  { %v3270_v37 = vpop.f32.mrf.mxu0  ;;  %v3311_v6 = vpop.f32.mrf.mxu1 }
 0x3a0   :  { %v3408_v10 = vmul.f32 %v3270_v37, %v3270_v37  ;;  %v3410_v20 = vmul.f32 %v3311_v6, %v3311_v6 }
 0x3a1   :  { %v3272_v14 = vpop.f32.mrf.mxu0  ;;  %v3313_v19 = vpop.f32.mrf.mxu1 }
 0x3a2   :  { %v3432_v18 = vsel %vm3416_vm4, %v3408_v10, 0.0  ;;  %v3409_v40 = vmul.f32 %v3272_v14, %v3272_v14  ;;  %v3436_v3 = vsel %vm3416_vm4, %v3410_v20, 0.0  ;;  %v3411_v4 = vmul.f32 %v3313_v19, %v3313_v19 }
 0x3a3   :  { %v3274_v16 = vpop.f32.mrf.mxu0  ;;  %v3315_v17 = vpop.f32.mrf.mxu1  ;;  %v3433_v43 = vadd.f32 %v3432_v18, %v3431_v41 }
 0x3a4   :  { %v3434_v13 = vsel %vm3416_vm4, %v3409_v40, 0.0  ;;  %v3438_v9 = vsel %vm3416_vm4, %v3411_v4, 0.0 }
 0x3a5   :  { %v3275_v46 = vpop.f32.mrf.mxu0  ;;  %v3316_v12 = vpop.f32.mrf.mxu1  ;;  %v3435_v44 = vadd.f32 %v3434_v13, %v3433_v43 }
 0x3a7   :  { %v3437_v5 = vadd.f32 %v3436_v3, %v3435_v44 }
 0x3a9   :  { %v3439_v26 = vadd.f32 %v3438_v9, %v3437_v5 }
 0x3af   :  { %v3352_v7 = vpop.f32.mrf.mxu0  ;;  %v3393_v8 = vpop.f32.mrf.mxu1 }
 0x3b0   :  { %v3412_v45 = vmul.f32 %v3352_v7, %v3352_v7  ;;  %v3414_v48 = vmul.f32 %v3393_v8, %v3393_v8 }
 0x3b1   :  { %v3354_v63 = vpop.f32.mrf.mxu0  ;;  %v3395_v2 = vpop.f32.mrf.mxu1 }
 0x3b2   :  { %v3440_v25 = vsel %vm3416_vm4, %v3412_v45, 0.0  ;;  %v3413_v49 = vmul.f32 %v3354_v63, %v3354_v63  ;;  %v3415_v23 = vmul.f32 %v3395_v2, %v3395_v2  ;;  %v3444_v29 = vsel %vm3416_vm4, %v3414_v48, 0.0 }
 0x3b3   :  { %v3441_v31 = vadd.f32 %v3440_v25, %v3439_v26  ;;  %v3356_v21 = vpop.f32.mrf.mxu0  ;;  %v3397_v34 = vpop.f32.mrf.mxu1 }
 0x3b4   :  { %v3442_v22 = vsel %vm3416_vm4, %v3413_v49, 0.0  ;;  %v3446_v28 = vsel %vm3416_vm4, %v3415_v23, 0.0 }
 0x3b5   :  { %v3357_v35 = vpop.f32.mrf.mxu0  ;;  %v3398_v38 = vpop.f32.mrf.mxu1  ;;  %v3443_v53 = vadd.f32 %v3442_v22, %v3441_v31 }
 0x3b7   :  { %v3445_v42 = vadd.f32 %v3444_v29, %v3443_v53 }
 0x3b9   :  { %v3447_v51 = vadd.f32 %v3446_v28, %v3445_v42 }
 0x3bb   :  { %3448 = vadd.xlane.f32.xlu0 %v3447_v51 }
 0x444   :  { %v3449_v54 = vpop.xlane.xlu0 %3448 }
 0x445   :  { %v3450_v55 = vadd.f32 1e-12, %v3449_v54 }
 0x447   :  { %6221 = vrsqrt.f32 %v3450_v55 }
 0x454   :  { %v6222_v56 = vpop.eup %6221 }
 0x455   :  { %v7298_v57 = vmul.f32 %v6222_v56, %v7249_v11  ;;  %v7301_v32 = vmul.f32 %v6222_v56, %v7253_v24  ;;  %v7304_v33 = vmul.f32 %v6222_v56, %v7251_v27  ;;  %v7307_v58 = vmul.f32 %v6222_v56, %v7255_v30 }
 0x456   :  { %v7310_v59 = vmul.f32 %v6222_v56, %v7265_v39  ;;  %v7313_v60 = vmul.f32 %v6222_v56, %v7274_v47  ;;  %v7316_v61 = vmul.f32 %v6222_v56, %v7267_v52  ;;  %v7319_v11 = vmul.f32 %v6222_v56, %v7276_v50 }
 0x457   :  { %v7321_v24 = vmul.f32 %v6222_v56, %v3270_v37  ;;  %v7323_v0 = vmul.f32 %v6222_v56, %v3272_v14  ;;  %v7325_v27 = vmul.f32 %v6222_v56, %v3311_v6  ;;  %v7327_v30 = vmul.f32 %v6222_v56, %v3313_v19 }
 0x458   :  { %v7329_v1 = vmul.f32 %v6222_v56, %v3352_v7  ;;  %v7331_v39 = vmul.f32 %v6222_v56, %v3354_v63  ;;  %v7333_v47 = vmul.f32 %v6222_v56, %v3393_v8  ;;  %v7335_v62 = vmul.f32 %v6222_v56, %v3395_v2 }
 0x459   :  { %6273 = dma.done.wait [#allocation4], 256 }
 0x45a   :  { %6274 = vsyncadd [#allocation4], 4294967040 }
 0x45b   :  { %6275 = dma.done.wait [#allocation4 + $0x1], 256 }
 0x45c   :  { %6276 = vsyncadd [#allocation4 + $0x1], 4294967040 }
 0x45d   :  { %6277 = dma.done.wait [#allocation4 + $0x2], 256 }
 0x45e   :  { %6278 = vsyncadd [#allocation4 + $0x2], 4294967040 }
 0x45f   :  { %6279 = dma.done.wait [#allocation4 + $0x3], 256 }
 0x460   :  { %6280 = vsyncadd [#allocation4 + $0x3], 4294967040 }
 0x461   :  { %6281 = dma.done.wait [#allocation4 + $0x4], 256 }
 0x462   :  { %6282 = vsyncadd [#allocation4 + $0x4], 4294967040 }
 0x463   :  { %6283 = dma.done.wait [#allocation4 + $0x5], 256 }
 0x464   :  { %6284 = vsyncadd [#allocation4 + $0x5], 4294967040 }
 0x465   :  { %6285 = dma.done.wait [#allocation4 + $0x6], 256 }
 0x466   :  { %6286 = vsyncadd [#allocation4 + $0x6], 4294967040 }
 0x467   :  { %6287 = dma.done.wait [#allocation4 + $0x7], 256 }
 0x468   :  { %6288 = vsyncadd [#allocation4 + $0x7], 4294967040 }
 0x469   :  { %6289 = dma.done.wait [#allocation4 + $0x8], 256 }
 0x46a   :  { %6290 = vsyncadd [#allocation4 + $0x8], 4294967040 }
 0x46b   :  { %6291 = dma.done.wait [#allocation4 + $0x9], 256 }
 0x46c   :  { %6292 = vsyncadd [#allocation4 + $0x9], 4294967040 }
 0x46d   :  { %6293 = dma.done.wait [#allocation4 + $0xa], 256 }
 0x46e   :  { %6294 = vsyncadd [#allocation4 + $0xa], 4294967040 }
 0x46f   :  { %6295 = dma.done.wait [#allocation4 + $0xb], 256 }
 0x470   :  { %6296 = vsyncadd [#allocation4 + $0xb], 4294967040 }
 0x471   :  { %6297 = dma.done.wait [#allocation4 + $0xc], 256 }
 0x472   :  { %6298 = vsyncadd [#allocation4 + $0xc], 4294967040 }
 0x473   :  { %6299 = dma.done.wait [#allocation4 + $0xd], 256 }
 0x474   :  { %6300 = vsyncadd [#allocation4 + $0xd], 4294967040 }
 0x475   :  { %6301 = dma.done.wait [#allocation4 + $0xe], 256 }
 0x476   :  { %6302 = vsyncadd [#allocation4 + $0xe], 4294967040 }
 0x477   :  { %6303 = dma.done.wait [#allocation4 + $0xf], 256 }
 0x478   :  { %6304 = vsyncadd [#allocation4 + $0xf], 4294967040  ;;  %3581 = vmatprep.mubr.f32.mxu0 %v7301_v32  ;;  %3651 = vmatprep.mubr.f32.mxu1 %v7307_v58  ;;  %v3502_v52 = vld [vmem:[#allocation2 + $0x8] sm:$0xff]  ;;  %v3501_v50 = vld [vmem:[#allocation2] sm:$0xff]  ;;  %v4728_v43 = vlaneseq  ;;  %v4110_v4 = vrot.slane %v7301_v32, 1  ;;  %v4112_v5 = vrot.slane %v7307_v58, 1 }
 0x479   :  { %v3504_v36 = vld [vmem:[#allocation2 + $0x18] sm:$0xff]  ;;  %3547 = vmatprep.subr.mxu0 %v3502_v52  ;;  %v3503_v37 = vld [vmem:[#allocation2 + $0x10] sm:$0xff]  ;;  %v3506_v6 = vld [vmem:[#allocation2 + $0x28] sm:$0xff]  ;;  %v4109_v63 = vrot.slane %v7298_v57, 1  ;;  %v4111_v25 = vrot.slane %v7304_v33, 1  ;;  %v4114_v49 = vrot.slane %v7313_v60, 1 }
 0x47a   :  { %3617 = vmatprep.subr.mxu1 %v3504_v36  ;;  %3548 = vmatpush1.xpose.msra.mxu0 %v3501_v50  ;;  %v3508_v10 = vld [vmem:[#allocation2 + $0x38] sm:$0xff]  ;;  %v3505_v14 = vld [vmem:[#allocation2 + $0x20] sm:$0xff]  ;;  %v3507_v19 = vld [vmem:[#allocation2 + $0x30] sm:$0xff]  ;;  %v7351_v7 = vshrl.u32 %v4728_v43, 7  ;;  %v4113_v34 = vrot.slane %v7310_v59, 1  ;;  %v4116_v22 = vrot.slane %v7319_v11, 1 }
 0x47b   :  { %3618 = vmatpush1.xpose.msra.mxu1 %v3503_v37  ;;  %3687 = vmatprep.subr.mxu0 %v3506_v6  ;;  %v3510_v15 = vld [vmem:[#allocation2 + $0x48] sm:$0xff]  ;;  %v3512_v18 = vld [vmem:[#allocation2 + $0x58] sm:$0xff]  ;;  %v3509_v40 = vld [vmem:[#allocation2 + $0x40] sm:$0xff]  ;;  %v4115_v29 = vrot.slane %v7316_v61, 1  ;;  %v4118_v42 = vrot.slane %v7323_v0, 1  ;;  %v4117_v28 = vrot.slane %v7321_v24, 1 }
 0x47c   :  { %3757 = vmatprep.subr.mxu1 %v3508_v10  ;;  %v3511_v41 = vld [vmem:[#allocation2 + $0x50] sm:$0xff]  ;;  %v3514_v16 = vld [vmem:[#allocation2 + $0x68] sm:$0xff]  ;;  %v3516_v17 = vld [vmem:[#allocation2 + $0x78] sm:$0xff]  ;;  %v7363_v21 = vsub.s32 0, %v7351_v7  ;;  %v7370_v35 = vsub.s32 1, %v7351_v7  ;;  %v7376_v51 = vsub.s32 2, %v7351_v7 }
 0x47d   :  { %3582 = vmatmul.mubr.f32.vlgmr.msra.gmra.mxu0 %v7298_v57  ;;  %v3513_v46 = vld [vmem:[#allocation2 + $0x60] sm:$0xff]  ;;  %v3515_v12 = vld [vmem:[#allocation2 + $0x70] sm:$0xff]  ;;  %v4078_v13 = vld [vmem:[#allocation2 + $0x88] sm:$0xff]  ;;  %v4120_v54 = vrot.slane %v7327_v30, 1  ;;  %v4119_v55 = vrot.slane %v7325_v27, 1  ;;  %v4122_v56 = vrot.slane %v7331_v39, 1 }
 0x47e   :  { %3652 = vmatmul.mubr.f32.vlgmr.msra.gmra.mxu1 %v7304_v33  ;;  %3688 = vmatpush1.xpose.msra.mxu0 %v3505_v14  ;;  %v4077_v20 = vld [vmem:[#allocation2 + $0x80] sm:$0xff]  ;;  %v4080_v44 = vld [vmem:[#allocation2 + $0x98] sm:$0xff]  ;;  %v4079_v3 = vld [vmem:[#allocation2 + $0x90] sm:$0xff]  ;;  %v7382_v52 = vsub.s32 3, %v7351_v7  ;;  %v4121_v37 = vrot.slane %v7329_v1, 1  ;;  %v4124_v6 = vrot.slane %v7335_v62, 1 }
 0x47f   :  { %3758 = vmatpush1.xpose.msra.mxu1 %v3507_v19  ;;  %3721 = vmatprep.mubr.f32.mxu0 %v7313_v60  ;;  %v4711_v8 = vld [vmem:[#allocation2] ss:$8 sm:$0xf]  ;;  %v7389_v14 = vsub.s32 4, %v7351_v7  ;;  %s7589_s4 = sld [smem:[#allocation8]]  ;;  %vm4709_vm5 = vcmask 58368  }
 0x480   :  { %3791 = vmatprep.mubr.f32.mxu1 %v7319_v11  ;;  %3827 = vmatprep.subr.mxu0 %v3510_v15  ;;  %v4712_v9 = vld [vmem:[#allocation2] ss:$8 sm:$0xf0] }
 0x481   :  { %3897 = vmatprep.subr.mxu1 %v3512_v18  ;;  %3722 = vmatmul.mubr.f32.vlgmr.msra.gmra.mxu0 %v7310_v59  ;;  %v4719_v45 = vld [vmem:[#allocation2 + $0x80] ss:$8 sm:$0xf]  ;;  %v7360_v31 = vor.u32 %v4712_v9, %v4711_v8  ;;  %v4123_v8 = vrot.slane %v7333_v47, 1 }
 0x482   :  { %3792 = vmatmul.mubr.f32.vlgmr.msra.gmra.mxu1 %v7316_v61  ;;  %3828 = vmatpush1.xpose.msra.mxu0 %v3509_v40  ;;  %v4720_v26 = vld [vmem:[#allocation2 + $0x80] ss:$8 sm:$0xf0]  ;;  %v7394_v40 = vsub.s32 5, %v7351_v7 }
 0x483   :  { %3898 = vmatpush1.xpose.msra.mxu1 %v3511_v41  ;;  %3861 = vmatprep.mubr.f32.mxu0 %v7323_v0  ;;  %v4082_v2 = vld [vmem:[#allocation2 + $0xa8] sm:$0xff]  ;;  %v4084_v48 = vld [vmem:[#allocation2 + $0xb8] sm:$0xff]  ;;  %v7367_v23 = vor.u32 %v4720_v26, %v4719_v45  ;;  %v4081_v38 = vld [vmem:[#allocation2 + $0xa0] sm:$0xff]  ;;  %v4731_v10 = vrot.slane %v7360_v31, %v7363_v21  ;;  %v4735_v18 = vrot.slane %v7360_v31, %v7370_v35  ;;  %v4922_v45 = vmul.f32 0.5, %v7298_v57 }
 0x484   :  { %3931 = vmatprep.mubr.f32.mxu1 %v7327_v30  ;;  %3967 = vmatprep.subr.mxu0 %v3514_v16  ;;  %v4083_v53 = vld [vmem:[#allocation2 + $0xb0] sm:$0xff]  ;;  %v4086_v50 = vld [vmem:[#allocation2 + $0xc8] sm:$0xff]  ;;  %v4088_v36 = vld [vmem:[#allocation2 + $0xd8] sm:$0xff]  ;;  %v4747_v9 = vrot.slane %v7360_v31, %v7389_v14  ;;  %v4923_v26 = vmul.f32 0.5, %v7301_v32  ;;  %v7425_v32 = vsub.s32 7, %v7351_v7 }
 0x485   :  { %4037 = vmatprep.subr.mxu1 %v3516_v17  ;;  %3862 = vmatmul.mubr.f32.vlgmr.msra.gmra.mxu0 %v7321_v24  ;;  %v4085_v19 = vld [vmem:[#allocation2 + $0xc0] sm:$0xff]  ;;  %v4087_v15 = vld [vmem:[#allocation2 + $0xd0] sm:$0xff]  ;;  %v4813_v41 = vrot.slane %v7367_v23, %v7363_v21  ;;  %v4817_v16 = vrot.slane %v7367_v23, %v7370_v35  ;;  %s5114_s13 = sshrl.u32 %s7589_s4, 3  ;;  %s5115_s14 = sand.u32 7, %s7589_s4  }
 0x486   :  { %3932 = vmatmul.mubr.f32.vlgmr.msra.gmra.mxu1 %v7325_v27  ;;  %3968 = vmatpush1.xpose.msra.mxu0 %v3513_v46  ;;  %v4715_v17 = vld [vmem:[#allocation2 + $0x40] ss:$8 sm:$0xf]  ;;  %v4739_v46 = vrot.slane %v7360_v31, %v7376_v51  ;;  %s5981_s15 = sshll.u32 %s5114_s13, 7 }
 0x487   :  { %4038 = vmatpush1.xpose.msra.mxu1 %v3515_v12  ;;  %4001 = vmatprep.mubr.f32.mxu0 %v7331_v39  ;;  %v4716_v43 = vld [vmem:[#allocation2 + $0x40] ss:$8 sm:$0xf0]  ;;  %v4821_v12 = vrot.slane %v7367_v23, %v7376_v51  ;;  %s5117_s16 = sadd.s32 %s5981_s15, %s5115_s14 }
 0x488   :  { %4071 = vmatprep.mubr.f32.mxu1 %v7335_v62  ;;  %4171 = vmatprep.subr.mxu0 %v4078_v13  ;;  %v4723_v13 = vld [vmem:[#allocation2 + $0xc0] ss:$8 sm:$0xf]  ;;  %s7615_s19 = scalar_lea.vmem %s7644_s6, %s5117_s16 }
 0x489   :  { %4241 = vmatprep.subr.mxu1 %v4080_v44  ;;  %4002 = vmatmul.mubr.f32.vlgmr.msra.gmra.mxu0 %v7329_v1  ;;  %v4743_v44 = vrot.slane %v7360_v31, %v7382_v52 }
 0x48a   :  { %4072 = vmatmul.mubr.f32.vlgmr.msra.gmra.mxu1 %v7333_v47  ;;  %4172 = vmatpush1.xpose.msra.mxu0 %v4077_v20  ;;  %v4724_v20 = vld [vmem:[#allocation2 + $0xc0] ss:$8 sm:$0xf0] }
 0x48b   :  { %4242 = vmatpush1.xpose.msra.mxu1 %v4079_v3  ;;  %4205 = vmatprep.mubr.f32.mxu0 %v4110_v4  ;;  %v4825_v3 = vrot.slane %v7367_v23, %v7382_v52  ;;  %v4090_v4 = vld [vmem:[#allocation2 + $0xe8] sm:$0xff]  ;;  %v7422_v57 = vor.u32 %v4724_v20, %v4723_v13  ;;  %v4932_v20 = vmul.f32 0.5, %v7325_v27 }
 0x48c   :  { %4275 = vmatprep.mubr.f32.mxu1 %v4112_v5  ;;  %4311 = vmatprep.subr.mxu0 %v4082_v2  ;;  %v4092_v5 = vld [vmem:[#allocation2 + $0xf8] sm:$0xff]  ;;  %v4829_v2 = vrot.slane %v7367_v23, %v7389_v14 }
 0x48d   :  { %4381 = vmatprep.subr.mxu1 %v4084_v48  ;;  %4206 = vmatmul.mubr.f32.vlgmr.msra.gmra.mxu0 %v4109_v63  ;;  %v7414_v63 = vsub.s32 6, %v7351_v7  ;;  %v4891_v48 = vsel %vm2682_vm3, %v4735_v18, %v4817_v16 }
 0x48e   :  { %4276 = vmatmul.mubr.f32.vlgmr.msra.gmra.mxu1 %v4111_v25  ;;  %4312 = vmatpush1.xpose.msra.mxu0 %v4081_v38  ;;  %v4890_v25 = vsel %vm2682_vm3, %v4731_v10, %v4813_v41  ;;  %v4892_v38 = vsel %vm2682_vm3, %v4739_v46, %v4821_v12  ;;  %v4925_v10 = vmul.f32 0.5, %v7307_v58  ;;  %v4759_v58 = vrot.slane %v7360_v31, %v7425_v32 }
 0x48f   :  { %4382 = vmatpush1.xpose.msra.mxu1 %v4083_v53  ;;  %4345 = vmatprep.mubr.f32.mxu0 %v4114_v49  ;;  %v4089_v49 = vld [vmem:[#allocation2 + $0xe0] sm:$0xff]  ;;  %v4751_v53 = vrot.slane %v7360_v31, %v7394_v40  ;;  %v4837_v18 = vrot.slane %v7367_v23, %v7414_v63  ;;  %v4908_v41 = vmul.f32 0.5, %v4892_v38  ;;  %v4931_v12 = vmul.f32 0.5, %v7323_v0 }
 0x490   :  { %4415 = vmatprep.mubr.f32.mxu1 %v4116_v22  ;;  %4451 = vmatprep.subr.mxu0 %v4086_v50  ;;  %v7420_v22 = vor.u32 %v4716_v43, %v4715_v17  ;;  %v4906_v50 = vmul.f32 0.5, %v4890_v25  ;;  %v4841_v17 = vrot.slane %v7367_v23, %v7425_v32 }
 0x491   :  { %4521 = vmatprep.subr.mxu1 %v4088_v36  ;;  %4346 = vmatmul.mubr.f32.vlgmr.msra.gmra.mxu0 %v4113_v34  ;;  %v4091_v34 = vld [vmem:[#allocation2 + $0xf0] sm:$0xff]  ;;  %v4907_v36 = vmul.f32 0.5, %v4891_v48 }
 0x492   :  { %4416 = vmatmul.mubr.f32.vlgmr.msra.gmra.mxu1 %v4115_v29  ;;  %4452 = vmatpush1.xpose.msra.mxu0 %v4085_v19  ;;  %v4833_v29 = vrot.slane %v7367_v23, %v7394_v40  ;;  %v4926_v19 = vmul.f32 0.5, %v7310_v59  ;;  %v4763_v16 = vrot.slane %v7420_v22, %v7363_v21  ;;  %v4930_v23 = vmul.f32 0.5, %v7321_v24 }
 0x493   :  { %4522 = vmatpush1.xpose.msra.mxu1 %v4087_v15  ;;  %4485 = vmatprep.mubr.f32.mxu0 %v4118_v42  ;;  %v4893_v42 = vsel %vm2682_vm3, %v4743_v44, %v4825_v3  ;;  %v4755_v15 = vrot.slane %v7360_v31, %v7414_v63  ;;  %v4849_v3 = vrot.slane %v7422_v57, %v7370_v35 }
 0x494   :  { %4555 = vmatprep.mubr.f32.mxu1 %v4120_v54  ;;  %4591 = vmatprep.subr.mxu0 %v4090_v4  ;;  %v4924_v54 = vmul.f32 0.5, %v7304_v33  ;;  %v4894_v33 = vsel %vm2682_vm3, %v4747_v9, %v4829_v2  ;;  %v4909_v59 = vmul.f32 0.5, %v4893_v42  ;;  %v4895_v43 = vsel %vm2682_vm3, %v4751_v53, %v4833_v29 }
 0x495   :  { %4661 = vmatprep.subr.mxu1 %v4092_v5  ;;  %4486 = vmatmul.mubr.f32.vlgmr.msra.gmra.mxu0 %v4117_v28  ;;  %v4927_v28 = vmul.f32 0.5, %v7313_v60  ;;  %v4910_v31 = vmul.f32 0.5, %v4894_v33  ;;  %v4929_v60 = vmul.f32 0.5, %v7319_v11  ;;  %v4896_v46 = vsel %vm2682_vm3, %v4755_v15, %v4837_v18 }
 0x496   :  { %4556 = vmatmul.mubr.f32.vlgmr.msra.gmra.mxu1 %v4119_v55  ;;  %4592 = vmatpush1.xpose.msra.mxu0 %v4089_v49  ;;  %v4928_v55 = vmul.f32 0.5, %v7316_v61  ;;  %v7463_v61 = vadd.f32 %v4923_v26, %v4907_v36  ;;  %v4911_v13 = vmul.f32 0.5, %v4895_v43  ;;  %v7472_v44 = vadd.f32 %v4925_v10, %v4909_v59 }
 0x497   :  { %4662 = vmatpush1.xpose.msra.mxu1 %v4091_v34  ;;  %4625 = vmatprep.mubr.f32.mxu0 %v4122_v56  ;;  %v4845_v56 = vrot.slane %v7422_v57, %v7363_v21  ;;  %v7468_v21 = vadd.f32 %v4924_v54, %v4908_v41  ;;  %v4767_v11 = vrot.slane %v7420_v22, %v7370_v35  ;;  %v4912_v0 = vmul.f32 0.5, %v4896_v46 }
 0x498   :  { %4695 = vmatprep.mubr.f32.mxu1 %v4124_v6  ;;  %v7461_v6 = vadd.f32 %v4922_v45, %v4906_v50  ;;  %v4897_v4 = vsel %vm2682_vm3, %v4759_v58, %v4841_v17  ;;  %v7480_v5 = vadd.f32 %v4926_v19, %v4910_v31  ;;  %v4853_v9 = vrot.slane %v7422_v57, %v7376_v51 }
 0x499   :  { %4626 = vmatmul.mubr.f32.vlgmr.msra.gmra.mxu0 %v4121_v37  ;;  %v4933_v37 = vmul.f32 0.5, %v7327_v30  ;;  %v4898_v24 = vsel %vm2682_vm3, %v4763_v16, %v4845_v56  ;;  %v4955_v30 = vmul.f32 %v7463_v61, %v7463_v61  ;;  %v4934_v35 = vmul.f32 0.5, %v7329_v1 }
 0x49a   :  { %4696 = vmatmul.mubr.f32.vlgmr.msra.gmra.mxu1 %v4123_v8  ;;  %v4954_v27 = vmul.f32 %v7461_v6, %v7461_v6  ;;  %v4771_v8 = vrot.slane %v7420_v22, %v7376_v51  ;;  %v4956_v45 = vmul.f32 %v7468_v21, %v7468_v21  ;;  %v4775_v26 = vrot.slane %v7420_v22, %v7382_v52 }
 0x49b   :  { %v4913_v2 = vmul.f32 0.5, %v4897_v4  ;;  %v7495_v25 = vadd.f32 %v4927_v28, %v4911_v13  ;;  %v4957_v48 = vmul.f32 %v7472_v44, %v7472_v44  ;;  %v4779_v49 = vrot.slane %v7420_v22, %v7389_v14 }
 0x49c   :  { %v4857_v51 = vrot.slane %v7422_v57, %v7382_v52  ;;  %v4899_v1 = vsel %vm2682_vm3, %v4767_v11, %v4849_v3  ;;  %v4914_v34 = vmul.f32 0.5, %v4898_v24  ;;  %v7504_v38 = vadd.f32 %v4928_v55, %v4912_v0 }
 0x49d   :  { %v4958_v53 = vmul.f32 %v7480_v5, %v7480_v5  ;;  %v4970_v29 = vsel %vm3416_vm4, %v4954_v27, 0.0  ;;  %v4971_v42 = vsel %vm3416_vm4, %v4955_v30, 0.0  ;;  %v4861_v54 = vrot.slane %v7422_v57, %v7389_v14 }
 0x49e   :  { %v4900_v50 = vsel %vm2682_vm3, %v4771_v8, %v4853_v9  ;;  %v4972_v36 = vadd.f32 %v4971_v42, %v4970_v29  ;;  %v4973_v52 = vsel %vm3416_vm4, %v4956_v45, 0.0  ;;  %v4915_v10 = vmul.f32 0.5, %v4899_v1 }
 0x49f   :  { %v7514_v19 = vadd.f32 %v4929_v60, %v4913_v2  ;;  %v4959_v15 = vmul.f32 %v7495_v25, %v7495_v25  ;;  %v4975_v18 = vsel %vm3416_vm4, %v4957_v48, 0.0  ;;  %v4783_v33 = vrot.slane %v7420_v22, %v7394_v40 }
 0x4a0   :  { %v4865_v41 = vrot.slane %v7422_v57, %v7394_v40  ;;  %v4901_v14 = vsel %vm2682_vm3, %v4775_v26, %v4857_v51  ;;  %v4974_v58 = vadd.f32 %v4973_v52, %v4972_v36  ;;  %v4916_v59 = vmul.f32 0.5, %v4900_v50 }
 0x4a1   :  { %v7524_v28 = vadd.f32 %v4930_v23, %v4914_v34  ;;  %v4960_v55 = vmul.f32 %v7504_v38, %v7504_v38  ;;  %v4977_v16 = vsel %vm3416_vm4, %v4958_v53, 0.0  ;;  %v4787_v17 = vrot.slane %v7420_v22, %v7414_v63 }
 0x4a2   :  { %v4869_v56 = vrot.slane %v7422_v57, %v7414_v63  ;;  %v4902_v43 = vsel %vm2682_vm3, %v4779_v49, %v4861_v54  ;;  %v4976_v40 = vadd.f32 %v4975_v18, %v4974_v58  ;;  %v4917_v31 = vmul.f32 0.5, %v4901_v14 }
 0x4a3   :  { %v7534_v60 = vadd.f32 %v4931_v12, %v4915_v10  ;;  %v4961_v46 = vmul.f32 %v7514_v19, %v7514_v19  ;;  %v4979_v23 = vsel %vm3416_vm4, %v4959_v15, 0.0  ;;  %v4791_v13 = vrot.slane %v7420_v22, %v7425_v32 }
 0x4a4   :  { %v4873_v11 = vrot.slane %v7422_v57, %v7425_v32  ;;  %v4903_v3 = vsel %vm2682_vm3, %v4783_v33, %v4865_v41  ;;  %v4978_v63 = vadd.f32 %v4977_v16, %v4976_v40  ;;  %v4918_v4 = vmul.f32 0.5, %v4902_v43 }
 0x4a5   :  { %v7544_v24 = vadd.f32 %v4932_v20, %v4916_v59  ;;  %v4962_v12 = vmul.f32 %v7524_v28, %v7524_v28  ;;  %v4981_v0 = vsel %vm3416_vm4, %v4960_v55, 0.0  ;;  %v4904_v27 = vsel %vm2682_vm3, %v4787_v17, %v4869_v56 }
 0x4a6   :  { %v4935_v30 = vmul.f32 0.5, %v7331_v39  ;;  %v4980_v8 = vadd.f32 %v4979_v23, %v4978_v63  ;;  %v4919_v22 = vmul.f32 0.5, %v4903_v3  ;;  %v7551_v9 = vadd.f32 %v4933_v37, %v4917_v31 }
 0x4a7   :  { %v4963_v57 = vmul.f32 %v7534_v60, %v7534_v60  ;;  %v4983_v32 = vsel %vm3416_vm4, %v4961_v46, 0.0  ;;  %v4905_v20 = vsel %vm2682_vm3, %v4791_v13, %v4873_v11  ;;  %v4936_v45 = vmul.f32 0.5, %v7333_v47 }
 0x4a8   :  { %v4982_v26 = vadd.f32 %v4981_v0, %v4980_v8  ;;  %v4920_v2 = vmul.f32 0.5, %v4904_v27  ;;  %v7558_v48 = vadd.f32 %v4934_v35, %v4918_v4  ;;  %v4964_v39 = vmul.f32 %v7544_v24, %v7544_v24 }
 0x4a9   :  { %v4985_v49 = vsel %vm3416_vm4, %v4962_v12, 0.0  ;;  %v4937_v37 = vmul.f32 0.5, %v7335_v62  ;;  %v4921_v1 = vmul.f32 0.5, %v4905_v20  ;;  %v7564_v34 = vadd.f32 %v4935_v30, %v4919_v22 }
 0x4aa   :  { %v4984_v51 = vadd.f32 %v4983_v32, %v4982_v26  ;;  %v4965_v53 = vmul.f32 %v7551_v9, %v7551_v9  ;;  %v4987_v47 = vsel %vm3416_vm4, %v4963_v57, 0.0  ;;  %v7569_v42 = vadd.f32 %v4936_v45, %v4920_v2 }
 0x4ab   :  { %v4966_v35 = vmul.f32 %v7558_v48, %v7558_v48  ;;  %v4989_v54 = vsel %vm3416_vm4, %v4964_v39, 0.0  ;;  %v7574_v36 = vadd.f32 %v4937_v37, %v4921_v1  ;;  %v4967_v62 = vmul.f32 %v7564_v34, %v7564_v34 }
 0x4ac   :  { %v4986_v29 = vadd.f32 %v4985_v49, %v4984_v51  ;;  %v4991_v52 = vsel %vm3416_vm4, %v4965_v53, 0.0  ;;  %v4968_v15 = vmul.f32 %v7569_v42, %v7569_v42 }
 0x4ad   :  { %v4993_v18 = vsel %vm3416_vm4, %v4966_v35, 0.0  ;;  %v4969_v41 = vmul.f32 %v7574_v36, %v7574_v36  ;;  %v4995_v14 = vsel %vm3416_vm4, %v4967_v62, 0.0 }
 0x4ae   :  { %v4988_v50 = vadd.f32 %v4987_v47, %v4986_v29  ;;  %v4997_v59 = vsel %vm3416_vm4, %v4968_v15, 0.0  ;;  %v6316_v47 = vmov 1983009808  }
 0x4af   :  { %v4999_v16 = vsel %vm3416_vm4, %v4969_v41, 0.0  ;;  %v5040_v29 = vunpack.c.l.s4 %v6316_v47 }
 0x4b0   :  { %v4990_v10 = vadd.f32 %v4989_v54, %v4988_v50 }
 0x4b2   :  { %v4992_v33 = vadd.f32 %v4991_v52, %v4990_v10 }
 0x4b4   :  { %v4994_v58 = vadd.f32 %v4993_v18, %v4992_v33  ;;  %v5041_v18 = vunpack.c.0.s8 %v5040_v29 }
 0x4b6   :  { %v4996_v55 = vadd.f32 %v4995_v14, %v4994_v58 }
 0x4b8   :  { %v4998_v17 = vadd.f32 %v4997_v59, %v4996_v55 }
 0x4ba   :  { %v5000_v56 = vadd.f32 %v4999_v16, %v4998_v17 }
 0x4bc   :  { %5001 = vadd.xlane.f32.xlu0 %v5000_v56  ;;  %v5044_v56 = vsub.s32 %v5041_v18, %v7351_v7 }
 0x53d   :  { %v3583_v43 = vpop.f32.mrf.mxu0 }
 0x53e   :  { %v3653_v40 = vpop.f32.mrf.mxu1 }
 0x53f   :  { %v3585_v31 = vpop.f32.mrf.mxu0  ;;  %v3654_v27 = vadd.f32 %v3653_v40, %v3583_v43 }
 0x540   :  { %v3655_v46 = vpop.f32.mrf.mxu1 }
 0x541   :  { %v3723_v23 = vpop.f32.mrf.mxu0 }
 0x542   :  { %v3793_v13 = vpop.f32.mrf.mxu1  ;;  %v3724_v22 = vadd.f32 %v3723_v23, %v3654_v27 }
 0x543   :  { %v3725_v11 = vpop.f32.mrf.mxu0 }
 0x544   :  { %v3795_v3 = vpop.f32.mrf.mxu1  ;;  %v3794_v39 = vadd.f32 %v3793_v13, %v3724_v22 }
 0x545   :  { %v3863_v63 = vpop.f32.mrf.mxu0  ;;  %v5002_v57 = vpop.xlane.xlu0 %5001 }
 0x546   :  { %v3933_v4 = vpop.f32.mrf.mxu1  ;;  %v5003_v45 = vadd.f32 1e-12, %v5002_v57  ;;  %v3864_v35 = vadd.f32 %v3863_v63, %v3794_v39 }
 0x547   :  { %v3865_v12 = vpop.f32.mrf.mxu0 }
 0x548   :  { %v3935_v0 = vpop.f32.mrf.mxu1  ;;  %6223 = vrsqrt.f32 %v5003_v45  ;;  %v3934_v33 = vadd.f32 %v3933_v4, %v3864_v35 }
 0x549   :  { %v4003_v30 = vpop.f32.mrf.mxu0 }
 0x54a   :  { %v7587_v8 = vpop.f32.mrf.mxu1  ;;  %v4004_v43 = vadd.f32 %v4003_v30, %v3934_v33 }
 0x54b   :  { %v4005_v32 = vpop.f32.mrf.mxu0 }
 0x54c   :  { %v4075_v20 = vpop.f32.mrf.mxu1 }
 0x54d   :  { %v4207_v26 = vpop.f32.mrf.mxu0 }
 0x54e   :  { %v4277_v2 = vpop.f32.mrf.mxu1 }
 0x54f   :  { %v4209_v49 = vpop.f32.mrf.mxu0  ;;  %v4278_v51 = vadd.f32 %v4277_v2, %v4207_v26 }
 0x550   :  { %v4279_v37 = vpop.f32.mrf.mxu1 }
 0x551   :  { %v4347_v1 = vpop.f32.mrf.mxu0 }
 0x552   :  { %v4417_v53 = vpop.f32.mrf.mxu1  ;;  %v4348_v54 = vadd.f32 %v4347_v1, %v4278_v51  ;;  %v4074_v51 = vadd.f32 %v7587_v8, %v4004_v43 }
 0x553   :  { %v4349_v50 = vpop.f32.mrf.mxu0 }
 0x554   :  { %v4419_v62 = vpop.f32.mrf.mxu1  ;;  %v4418_v52 = vadd.f32 %v4417_v53, %v4348_v54 }
 0x555   :  { %v4487_v10 = vpop.f32.mrf.mxu0  ;;  %v6224_v17 = vpop.eup %6223 }
 0x556   :  { %v4557_v15 = vpop.f32.mrf.mxu1  ;;  %v4488_v41 = vadd.f32 %v4487_v10, %v4418_v52  ;;  %v5005_v31 = vmul.f32 %v6224_v17, %v7461_v6  ;;  %v5006_v46 = vmul.f32 %v6224_v17, %v7463_v61  ;;  %v5007_v23 = vmul.f32 %v6224_v17, %v7468_v21 }
 0x557   :  { %v4489_v14 = vpop.f32.mrf.mxu0  ;;  %v5008_v13 = vmul.f32 %v6224_v17, %v7472_v44  ;;  %v5009_v63 = vmul.f32 %v6224_v17, %v7480_v5  ;;  %v5010_v4 = vmul.f32 %v6224_v17, %v7495_v25  ;;  %v5011_v12 = vmul.f32 %v6224_v17, %v7504_v38 }
 0x558   :  { %v4559_v58 = vpop.f32.mrf.mxu1  ;;  %v4558_v59 = vadd.f32 %v4557_v15, %v4488_v41  ;;  %v5012_v7 = vmul.f32 %v6224_v17, %v7514_v19  ;;  %v5013_v0 = vmul.f32 %v6224_v17, %v7524_v28  ;;  %v5014_v6 = vmul.f32 %v6224_v17, %v7534_v60 }
 0x559   :  { %v4627_v55 = vpop.f32.mrf.mxu0  ;;  %v5015_v61 = vmul.f32 %v6224_v17, %v7544_v24  ;;  %v5016_v21 = vmul.f32 %v6224_v17, %v7551_v9  ;;  %v5017_v44 = vmul.f32 %v6224_v17, %v7558_v48  ;;  %v5018_v27 = vmul.f32 %v6224_v17, %v7564_v34 }
 0x55a   :  { %v4697_v16 = vpop.f32.mrf.mxu1  ;;  %v4628_v40 = vadd.f32 %v4627_v55, %v4558_v59  ;;  %v5019_v5 = vmul.f32 %v6224_v17, %v7569_v42  ;;  %v5020_v25 = vmul.f32 %v6224_v17, %v7574_v36  ;;  %v5037_v38 = vcombine.low %v5005_v31, %v5006_v46 }
 0x55b   :  { %v4629_v11 = vpop.f32.mrf.mxu0  ;;  %v5038_v30 = vcombine.low %v5007_v23, %v5008_v13  ;;  %v5054_v19 = vcombine.low %v5009_v63, %v5010_v4  ;;  %v5055_v22 = vcombine.low %v5011_v12, %v5012_v7  ;;  %v5071_v28 = vcombine.low %v5013_v0, %v5014_v6 }
 0x55c   :  { %v4699_v3 = vpop.f32.mrf.mxu1  ;;  %v5072_v57 = vcombine.low %v5015_v61, %v5016_v21  ;;  %v5088_v60 = vcombine.low %v5017_v44, %v5018_v27  ;;  %v5089_v24 = vcombine.low %v5019_v5, %v5020_v25  ;;  %v5045_v32 = vrot.slane %v5037_v38, %v5044_v56 }
 0x55d   :  { %v5052_v9 = vrot.slane %v5038_v30, %v5044_v56  ;;  %v5062_v20 = vrot.slane %v5054_v19, %v5044_v56  ;;  %v5069_v48 = vrot.slane %v5055_v22, %v5044_v56  ;;  %v5079_v45 = vrot.slane %v5071_v28, %v5044_v56 }
 0x55e   :  { %v5086_v34 = vrot.slane %v5072_v57, %v5044_v56  ;;  %v5096_v26 = vrot.slane %v5088_v60, %v5044_v56  ;;  %v5103_v42 = vrot.slane %v5089_v24, %v5044_v56  ;;  %v4698_v39 = vadd.f32 %v4697_v16, %v4628_v40 }
 0x55f   :  { %v5053_v2 = vcombine.low %v5045_v32, %v5052_v9  ;;  %v5070_v36 = vcombine.low %v5062_v20, %v5069_v48 }
 0x560   :  { %v5087_v49 = vcombine.low %v5079_v45, %v5086_v34  ;;  %v5104_v37 = vcombine.low %v5096_v26, %v5103_v42  ;;  %v4702_v1 = vrot.slane %v4698_v39, 7 }
 0x561   :  { %5109 = vst [vmem:[#allocation3] sm:$0xff] %v5053_v2  ;;  %5110 = vst [vmem:[#allocation3 + $0x8] sm:$0xff] %v5070_v36 }
 0x562   :  { %5111 = vst [vmem:[#allocation3 + $0x10] sm:$0xff] %v5087_v49  ;;  %5112 = vst [vmem:[#allocation3 + $0x18] sm:$0xff] %v5104_v37  ;;  %v4704_v53 = vsel %vm2682_vm3, %v4074_v51, %v4702_v1 }
 0x563   :  { %v4705_v47 = vmul.f32 14.285714, %v4704_v53 }
 0x565   :  { %v4706_v8 = vmul.f32 1.442695, %v4705_v47 }
 0x567   :  { %6225 = vpow2.f32 %v4706_v8 }
 0x568   :  { %v5137_v29 = vld [vmem:[#allocation3] sm:$0x1]  ;;  %v5139_v35 = vld [vmem:[#allocation3 + $0x2] sm:$0x1]  ;;  %v5141_v54 = vld [vmem:[#allocation3 + $0x4] sm:$0x1] }
 0x569   :  { %5138 = vst [vmem:[%s7615_s19] sm:$0x1] %v5137_v29  ;;  %5140 = vst [vmem:[%s7615_s19 + $0x8] sm:$0x1] %v5139_v35  ;;  %v5143_v50 = vld [vmem:[#allocation3 + $0x6] sm:$0x1] }
 0x56a   :  { %5142 = vst [vmem:[%s7615_s19 + $0x10] sm:$0x1] %v5141_v54  ;;  %v5145_v62 = vld [vmem:[#allocation3 + $0x8] sm:$0x1]  ;;  %v5147_v52 = vld [vmem:[#allocation3 + $0xa] sm:$0x1] }
 0x56b   :  { %5144 = vst [vmem:[%s7615_s19 + $0x18] sm:$0x1] %v5143_v50  ;;  %5146 = vst [vmem:[%s7615_s19 + $0x20] sm:$0x1] %v5145_v62  ;;  %v5149_v10 = vld [vmem:[#allocation3 + $0xc] sm:$0x1] }
 0x56c   :  { %5148 = vst [vmem:[%s7615_s19 + $0x28] sm:$0x1] %v5147_v52  ;;  %v5151_v15 = vld [vmem:[#allocation3 + $0xe] sm:$0x1]  ;;  %v5153_v18 = vld [vmem:[#allocation3 + $0x10] sm:$0x1] }
 0x56d   :  { %5150 = vst [vmem:[%s7615_s19 + $0x30] sm:$0x1] %v5149_v10  ;;  %5152 = vst [vmem:[%s7615_s19 + $0x38] sm:$0x1] %v5151_v15  ;;  %v5155_v33 = vld [vmem:[#allocation3 + $0x12] sm:$0x1] }
 0x56e   :  { %5154 = vst [vmem:[%s7615_s19 + $0x40] sm:$0x1] %v5153_v18  ;;  %v5157_v41 = vld [vmem:[#allocation3 + $0x14] sm:$0x1]  ;;  %v5159_v14 = vld [vmem:[#allocation3 + $0x16] sm:$0x1] }
 0x56f   :  { %5156 = vst [vmem:[%s7615_s19 + $0x48] sm:$0x1] %v5155_v33  ;;  %5158 = vst [vmem:[%s7615_s19 + $0x50] sm:$0x1] %v5157_v41  ;;  %v5161_v58 = vld [vmem:[#allocation3 + $0x18] sm:$0x1] }
 0x570   :  { %5160 = vst [vmem:[%s7615_s19 + $0x58] sm:$0x1] %v5159_v14  ;;  %v5163_v59 = vld [vmem:[#allocation3 + $0x1a] sm:$0x1]  ;;  %v5165_v55 = vld [vmem:[#allocation3 + $0x1c] sm:$0x1] }
 0x571   :  { %5162 = vst [vmem:[%s7615_s19 + $0x60] sm:$0x1] %v5161_v58  ;;  %5164 = vst [vmem:[%s7615_s19 + $0x68] sm:$0x1] %v5163_v59  ;;  %v5167_v16 = vld [vmem:[#allocation3 + $0x1e] sm:$0x1] }
 0x572   :  { %5166 = vst [vmem:[%s7615_s19 + $0x70] sm:$0x1] %v5165_v55  ;;  %5168 = vst [vmem:[%s7615_s19 + $0x78] sm:$0x1] %v5167_v16 }
 0x574   :  { %v6226_v17 = vpop.eup %6225 }
 0x575   :  { %v4708_v56 = vmul.f32 1.9018638e-05, %v6226_v17 }
 0x577   :  { %4710 = vst.msk [vmem:[#allocation9] sm:$0x3] %vm4709_vm5, %v4708_v56 }
 0x578   :  { %5232 = vsyncadd [#allocation5], 256  ;;  %s5982_s20 = sld [smem:[#allocation8 + $0x1]]  ;;  %v5259_v43 = vld [vmem:[#allocation3 + $0x1] sm:$0x1] }
 0x579   :  { %v5261_v40 = vld [vmem:[#allocation3 + $0x3] sm:$0x1]  ;;  %v5263_v31 = vld [vmem:[#allocation3 + $0x5] sm:$0x1]  ;;  %v5265_v46 = vld [vmem:[#allocation3 + $0x7] sm:$0x1] }
 0x57a   :  { %v5267_v23 = vld [vmem:[#allocation3 + $0x9] sm:$0x1]  ;;  %v5269_v13 = vld [vmem:[#allocation3 + $0xb] sm:$0x1]  ;;  %v5271_v11 = vld [vmem:[#allocation3 + $0xd] sm:$0x1] }
 0x57b   :  { %v5273_v3 = vld [vmem:[#allocation3 + $0xf] sm:$0x1]  ;;  %v5275_v63 = vld [vmem:[#allocation3 + $0x11] sm:$0x1]  ;;  %v5277_v4 = vld [vmem:[#allocation3 + $0x13] sm:$0x1] }
 0x57c   :  { %v5279_v12 = vld [vmem:[#allocation3 + $0x15] sm:$0x1]  ;;  %v5281_v7 = vld [vmem:[#allocation3 + $0x17] sm:$0x1]  ;;  %v5283_v0 = vld [vmem:[#allocation3 + $0x19] sm:$0x1] }
 0x57d   :  { %v5285_v6 = vld [vmem:[#allocation3 + $0x1b] sm:$0x1]  ;;  %v5287_v61 = vld [vmem:[#allocation3 + $0x1d] sm:$0x1]  ;;  %v5289_v21 = vld [vmem:[#allocation3 + $0x1f] sm:$0x1] }
 0x57e   :  { %s5235_s21 = sshrl.u32 %s5982_s20, 3  ;;  %s5236_s22 = sand.u32 7, %s5982_s20  }
 0x57f   :  { %s5983_s23 = sshll.u32 %s5235_s21, 7 }
 0x580   :  { %s5238_s24 = sadd.s32 %s5983_s23, %s5236_s22 }
 0x581   :  { %s5239_s27 = scalar_lea.vmem %s7644_s6, %s5238_s24 }
 0x582   :  { %5260 = vst [vmem:[%s5239_s27] sm:$0x1] %v5259_v43  ;;  %5262 = vst [vmem:[%s5239_s27 + $0x8] sm:$0x1] %v5261_v40 }
 0x583   :  { %5264 = vst [vmem:[%s5239_s27 + $0x10] sm:$0x1] %v5263_v31  ;;  %5266 = vst [vmem:[%s5239_s27 + $0x18] sm:$0x1] %v5265_v46 }
 0x584   :  { %5268 = vst [vmem:[%s5239_s27 + $0x20] sm:$0x1] %v5267_v23  ;;  %5270 = vst [vmem:[%s5239_s27 + $0x28] sm:$0x1] %v5269_v13 }
 0x585   :  { %5272 = vst [vmem:[%s5239_s27 + $0x30] sm:$0x1] %v5271_v11  ;;  %5274 = vst [vmem:[%s5239_s27 + $0x38] sm:$0x1] %v5273_v3 }
 0x586   :  { %5276 = vst [vmem:[%s5239_s27 + $0x40] sm:$0x1] %v5275_v63  ;;  %5278 = vst [vmem:[%s5239_s27 + $0x48] sm:$0x1] %v5277_v4 }
 0x587   :  { %5280 = vst [vmem:[%s5239_s27 + $0x50] sm:$0x1] %v5279_v12  ;;  %5282 = vst [vmem:[%s5239_s27 + $0x58] sm:$0x1] %v5281_v7 }
 0x588   :  { %5284 = vst [vmem:[%s5239_s27 + $0x60] sm:$0x1] %v5283_v0  ;;  %5286 = vst [vmem:[%s5239_s27 + $0x68] sm:$0x1] %v5285_v6 }
 0x589   :  { %5288 = vst [vmem:[%s5239_s27 + $0x70] sm:$0x1] %v5287_v61  ;;  %5290 = vst [vmem:[%s5239_s27 + $0x78] sm:$0x1] %v5289_v21 }
 0x58a   :  { %5354 = vsyncadd [#allocation5 + $0x1], 256 }
 0x58b   :  { %6305 = dma.done.wait [#allocation5], 256 }
 0x58c   :  { %6306 = vsyncadd [#allocation5], 4294967040 }
 0x58d   :  { %6307 = dma.done.wait [#allocation5 + $0x1], 256 }
 0x58e   :  { %6308 = vsyncadd [#allocation5 + $0x1], 4294967040  ;;  %s6317_s6 = smov [#allocation9]  }
 0x58f   :  { %s5365_s28 = sshll.u32 %s6317_s6, 4  ;;  %s5366_s28 = int_to_ptr.vmem [resolvable:$true] %s5365_s28 }
 0x590   :  { %s6251_s29 = scalar_lea.vmem %s5366_s28, 32  ;;  %p6256_p11 = scmp.lt.s32.totalorder %s5366_s28, %s5366_s28 }
 0x591   :  { %p6252_p10 = scmp.ne.s32.totalorder %s5366_s28, %s6251_s29  ;;  %p6257_p12 = scmp.lt.s32.totalorder %s6251_s29, %s6251_s29 }
 0x593   :  { %p6258_p13 = por %p6257_p12, %p6256_p11 }
 0x595   :  { %p6259_p0 = pnand %p6258_p13, %p6252_p10 }
 0x597   :  { %6262 = shalt.err (!%p6259_p0)
}
 0x598   :  { %5368 = dma.vmem_to_hbm [thread:$0]  %s5366_s28, 32, %s7645_s7, [#allocation10]  }
 0x599   :  { %6309 = dma.done.wait [#allocation10], 32  }
 0x59a   :  { %6310 = vsyncadd [#allocation10], 4294967264 }
 0x59b   :  { %5372 = vsyncpa [#allocation10], 1 }
 0x59c   :  { %5373 = vsyncmov [#allocation4] }
 0x59f   :  { %s5374_s8 = vpop.sfrf %5373 }
 0x5a0   :  { %p5984_p1 = scmp.ne.s32.totalorder %s5374_s8, 0 }
 0x5a2   :  { %5378 = shalt.err (%p5984_p1)  }
 0x5a3   :  { %5380 = vsyncmov [#allocation4 + $0x1] }
 0x5a6   :  { %s5381_s9 = vpop.sfrf %5380 }
 0x5a7   :  { %p5985_p2 = scmp.ne.s32.totalorder %s5381_s9, 0 }
 0x5a9   :  { %5385 = shalt.err (%p5985_p2)  }
 0x5aa   :  { %5387 = vsyncmov [#allocation4 + $0x2] }
 0x5ad   :  { %s5388_s0 = vpop.sfrf %5387 }
 0x5ae   :  { %p5986_p3 = scmp.ne.s32.totalorder %s5388_s0, 0 }
 0x5b0   :  { %5392 = shalt.err (%p5986_p3)  }
 0x5b1   :  { %5394 = vsyncmov [#allocation4 + $0x3] }
 0x5b4   :  { %s5395_s1 = vpop.sfrf %5394 }
 0x5b5   :  { %p5987_p4 = scmp.ne.s32.totalorder %s5395_s1, 0 }
 0x5b7   :  { %5399 = shalt.err (%p5987_p4)  }
 0x5b8   :  { %5401 = vsyncmov [#allocation4 + $0x4] }
 0x5bb   :  { %s5402_s7 = vpop.sfrf %5401 }
 0x5bc   :  { %p5988_p5 = scmp.ne.s32.totalorder %s5402_s7, 0 }
 0x5be   :  { %5406 = shalt.err (%p5988_p5)  }
 0x5bf   :  { %5408 = vsyncmov [#allocation4 + $0x5] }
 0x5c2   :  { %s5409_s10 = vpop.sfrf %5408 }
 0x5c3   :  { %p5989_p6 = scmp.ne.s32.totalorder %s5409_s10, 0 }
 0x5c5   :  { %5413 = shalt.err (%p5989_p6)  }
 0x5c6   :  { %5415 = vsyncmov [#allocation4 + $0x6] }
 0x5c9   :  { %s5416_s11 = vpop.sfrf %5415 }
 0x5ca   :  { %p5990_p7 = scmp.ne.s32.totalorder %s5416_s11, 0 }
 0x5cc   :  { %5420 = shalt.err (%p5990_p7)  }
 0x5cd   :  { %5422 = vsyncmov [#allocation4 + $0x7] }
 0x5d0   :  { %s5423_s5 = vpop.sfrf %5422 }
 0x5d1   :  { %p5991_p8 = scmp.ne.s32.totalorder %s5423_s5, 0 }
 0x5d3   :  { %5427 = shalt.err (%p5991_p8)  }
 0x5d4   :  { %5429 = vsyncmov [#allocation4 + $0x8] }
 0x5d7   :  { %s5430_s12 = vpop.sfrf %5429 }
 0x5d8   :  { %p5992_p9 = scmp.ne.s32.totalorder %s5430_s12, 0 }
 0x5da   :  { %5434 = shalt.err (%p5992_p9)  }
 0x5db   :  { %5436 = vsyncmov [#allocation4 + $0x9] }
 0x5de   :  { %s5437_s2 = vpop.sfrf %5436 }
 0x5df   :  { %p5993_p10 = scmp.ne.s32.totalorder %s5437_s2, 0 }
 0x5e1   :  { %5441 = shalt.err (%p5993_p10)  }
 0x5e2   :  { %5443 = vsyncmov [#allocation4 + $0xa] }
 0x5e5   :  { %s5444_s4 = vpop.sfrf %5443 }
 0x5e6   :  { %p5994_p11 = scmp.ne.s32.totalorder %s5444_s4, 0 }
 0x5e8   :  { %5448 = shalt.err (%p5994_p11)  }
 0x5e9   :  { %5450 = vsyncmov [#allocation4 + $0xb] }
 0x5ec   :  { %s5451_s13 = vpop.sfrf %5450 }
 0x5ed   :  { %p5995_p12 = scmp.ne.s32.totalorder %s5451_s13, 0 }
 0x5ef   :  { %5455 = shalt.err (%p5995_p12)  }
 0x5f0   :  { %5457 = vsyncmov [#allocation4 + $0xc] }
 0x5f3   :  { %s5458_s14 = vpop.sfrf %5457 }
 0x5f4   :  { %p5996_p13 = scmp.ne.s32.totalorder %s5458_s14, 0 }
 0x5f6   :  { %5462 = shalt.err (%p5996_p13)  }
 0x5f7   :  { %5464 = vsyncmov [#allocation4 + $0xd] }
 0x5fa   :  { %s5465_s15 = vpop.sfrf %5464 }
 0x5fb   :  { %p5997_p0 = scmp.ne.s32.totalorder %s5465_s15, 0 }
 0x5fd   :  { %5469 = shalt.err (%p5997_p0)  }
 0x5fe   :  { %5471 = vsyncmov [#allocation4 + $0xe] }
 0x601   :  { %s5472_s16 = vpop.sfrf %5471 }
 0x602   :  { %p5998_p1 = scmp.ne.s32.totalorder %s5472_s16, 0 }
 0x604   :  { %5476 = shalt.err (%p5998_p1)  }
 0x605   :  { %5478 = vsyncmov [#allocation4 + $0xf] }
 0x608   :  { %s5479_s17 = vpop.sfrf %5478 }
 0x609   :  { %p5999_p2 = scmp.ne.s32.totalorder %s5479_s17, 0 }
 0x60b   :  { %5483 = shalt.err (%p5999_p2)  }
 0x60c   :  { %5484 = vsyncmov [#allocation5] }
 0x60f   :  { %s5485_s18 = vpop.sfrf %5484 }
 0x610   :  { %p6000_p3 = scmp.ne.s32.totalorder %s5485_s18, 0 }
 0x612   :  { %5489 = shalt.err (%p6000_p3)  }
 0x613   :  { %5491 = vsyncmov [#allocation5 + $0x1] }
 0x616   :  { %s5492_s19 = vpop.sfrf %5491 }
 0x617   :  { %p6001_p4 = scmp.ne.s32.totalorder %s5492_s19, 0 }
 0x619   :  { %5496 = shalt.err (%p6001_p4)  }

</bundles_post_ra>
